<compile_context>
chip_gen: v5e
topology: v5e:2x2
jax: 0.10.0
libtpu: 0.0.40
codegen_flags: <defaults>
</compile_context>

<pallas_src>
import functools

import jax
import jax.numpy as jnp
from jax.experimental import pallas as pl
from jax.experimental.pallas import tpu as pltpu


# ----------------------------- Fused CBAM kernel ----------------------------
def _cbam_kernel(H, W, LPAD, x_ref, w1_ref, b1_ref, w2_ref, b2_ref,
                 wc_ref, bc_ref, out_ref, pad_ref):
    HW = H * W
    x = x_ref[0].astype(jnp.float32)                     # (C, HW), lane-dense

    # ---------------- channel attention ----------------
    avg = jnp.mean(x, axis=1, keepdims=True)             # (C, 1)
    mx = jnp.max(x, axis=1, keepdims=True)               # (C, 1)

    w1 = w1_ref[...]   # (C, mid)  == torch Linear1.weight.T
    b1 = b1_ref[...]   # (1, mid)
    w2 = w2_ref[...]   # (C, mid)  == torch Linear2.weight
    b2 = b2_ref[...]   # (C, 1)

    # layer 1 for both pooled vectors (broadcast-mul + sublane reduce)
    h_avg = jnp.sum(w1 * avg, axis=0, keepdims=True) + b1      # (1, mid)
    h_max = jnp.sum(w1 * mx, axis=0, keepdims=True) + b1       # (1, mid)
    h_sum = jnp.maximum(h_avg, 0.0) + jnp.maximum(h_max, 0.0)  # (1, mid)
    # layer 2 applied once to the ReLU'd sum; mlp(avg)+mlp(max) adds b2 twice.
    logits = jnp.sum(w2 * h_sum, axis=1, keepdims=True) + 2.0 * b2  # (C, 1)
    ca = jax.nn.sigmoid(logits)                          # (C, 1) channel gate
    x1 = x * ca                                          # (C, HW)

    # ---------------- spatial stats (over channels) ----------------
    mean_c = jnp.mean(x1, axis=0, keepdims=True)         # (1, HW)
    max_c = jnp.max(x1, axis=0, keepdims=True)           # (1, HW)

    # Zero-padded flat stats map in VMEM scratch: rows = {mean, max},
    # lanes = [LPAD zeros | HW stats | LPAD zeros].  LPAD is 128-aligned and
    # >= 3*W+3, so row out-of-bounds taps land in the zero pad automatically.
    pad_ref[...] = jnp.zeros_like(pad_ref)
    pad_ref[pl.ds(0, 1), pl.ds(LPAD, HW)] = mean_c       # aligned stores
    pad_ref[pl.ds(1, 1), pl.ds(LPAD, HW)] = max_c

    # Column validity masks depend only on dw -> hoist (7 masks total).
    col = jax.lax.broadcasted_iota(jnp.int32, (1, HW), 1) % W
    col_masks = [(col + dw >= 0) & (col + dw < W) for dw in range(-3, 4)]

    # 7x7 conv (2->1 channels, padding=3) on the flattened spatial axis.
    acc = jnp.full((1, HW), bc_ref[0], dtype=jnp.float32)
    for dw in range(-3, 4):
        part = jnp.zeros((1, HW), jnp.float32)
        for dh in range(-3, 4):
            off = dh * W + dw
            win = pad_ref[:, pl.ds(LPAD + off, HW)]      # (2, HW) tap window
            k_mean = wc_ref[(dh + 3) * 7 + (dw + 3)]     # scalar (SMEM)
            k_max = wc_ref[49 + (dh + 3) * 7 + (dw + 3)]
            part = part + win[0:1] * k_mean + win[1:2] * k_max
        # column mask is identical for all dh at this dw -> apply once
        acc = acc + jnp.where(col_masks[dw + 3], part, 0.0)

    sa = jax.nn.sigmoid(acc)                             # (1, HW) spatial gate
    out_ref[0] = (x1 * sa).astype(out_ref.dtype)         # dense 256-lane store


# ----------------------------- Wrapper --------------------------------------
def cbam_forward(x, params):
    B, C, H, W = x.shape
    HW = H * W
    mid = params["w1t"].shape[1]
    # 128-aligned pad that covers the maximum conv offset 3*W + 3.
    LPAD = ((3 * W + 3 + 127) // 128) * 128

    xf = x.reshape(B, C, HW).astype(jnp.float32)

    call = pl.pallas_call(
        functools.partial(_cbam_kernel, H, W, LPAD),
        out_shape=jax.ShapeDtypeStruct((B, C, HW), jnp.float32),
        grid_spec=pltpu.PrefetchScalarGridSpec(
            num_scalar_prefetch=0,
            grid=(B,),
            in_specs=[
                pl.BlockSpec((1, C, HW), lambda b: (b, 0, 0)),
                pl.BlockSpec((C, mid), lambda b: (0, 0)),
                pl.BlockSpec((1, mid), lambda b: (0, 0)),
                pl.BlockSpec((C, mid), lambda b: (0, 0)),
                pl.BlockSpec((C, 1), lambda b: (0, 0)),
                pl.BlockSpec(memory_space=pltpu.MemorySpace.SMEM),
                pl.BlockSpec(memory_space=pltpu.MemorySpace.SMEM),
            ],
            out_specs=pl.BlockSpec((1, C, HW), lambda b: (b, 0, 0)),
            scratch_shapes=[pltpu.VMEM((2, HW + 2 * LPAD), jnp.float32)],
        ),
        compiler_params=pltpu.CompilerParams(
            dimension_semantics=("parallel",)),
        input_output_aliases={0: 0},   # output overwrites the (B,C,HW) input
    )
    out = call(xf, params["w1t"], params["b1r"], params["w2s"],
               params["b2c"], params["wconv_flat"], params["bconv"])
    return out.reshape(B, C, H, W)


# ----------------------------- Pure-JAX reference ---------------------------
def cbam_reference(x, params):
    B, C, H, W = x.shape
    w1 = params["w1t"].T                # (mid, C) torch Linear1.weight
    b1 = params["b1r"].reshape(-1)
    w2 = params["w2s"]                  # (C, mid) torch Linear2.weight
    b2 = params["b2c"].reshape(-1)

    avg = x.mean(axis=(2, 3))
    mx = x.max(axis=(2, 3))

    def mlp(v):
        h = jnp.maximum(v @ w1.T + b1, 0.0)
        return h @ w2.T + b2

    ca = jax.nn.sigmoid(mlp(avg) + mlp(mx))[:, :, None, None]
    x1 = ca * x

    mean_c = x1.mean(axis=1, keepdims=True)
    max_c = x1.max(axis=1, keepdims=True)
    stats = jnp.concatenate([mean_c, max_c], axis=1)
    wconv = params["wconv_flat"].reshape(1, 2, 7, 7)
    sa = jax.lax.conv_general_dilated(
        stats, wconv, window_strides=(1, 1), padding=((3, 3), (3, 3)),
        dimension_numbers=("NCHW", "OIHW", "NCHW")) + params["bconv"][0]
    sa = jax.nn.sigmoid(sa)
    return sa * x1


if __name__ == "__main__":
    B, C, H, W = 2, 32, 16, 16
    reduction = 16
    mid = C // reduction

    key = jax.random.PRNGKey(0)
    keys = jax.random.split(key, 6)
    x = jax.random.normal(keys[0], (B, C, H, W), jnp.float32)

    # Deterministic synthetic parameters (torch shapes noted):
    w1_t = jax.random.normal(keys[1], (mid, C), jnp.float32) * 0.1   # Linear1.weight (mid, C)
    b1_t = jax.random.normal(keys[2], (mid,), jnp.float32) * 0.1     # Linear1.bias
    w2_t = jax.random.normal(keys[3], (C, mid), jnp.float32) * 0.1   # Linear2.weight (C, mid)
    b2_t = jax.random.normal(keys[4], (C,), jnp.float32) * 0.1       # Linear2.bias
    wconv = jax.random.normal(keys[5], (1, 2, 7, 7), jnp.float32) * 0.1  # Conv2d.weight
    bconv = jnp.full((1,), 0.05, jnp.float32)                        # Conv2d.bias

    params = dict(
        w1t=w1_t.T,                     # (C, mid)
        b1r=b1_t.reshape(1, mid),       # (1, mid)
        w2s=w2_t,                       # (C, mid)
        b2c=b2_t.reshape(C, 1),         # (C, 1)
        wconv_flat=wconv.reshape(-1),   # (98,) -> SMEM scalars
        bconv=bconv,                    # (1,)  -> SMEM scalar
    )

    out = jax.block_until_ready(jax.jit(cbam_forward)(x, params))
    ref = cbam_reference(x, params)
    max_err = float(jnp.max(jnp.abs(out - ref)))
    assert out.shape == (B, C, H, W)
    assert jnp.allclose(out, ref, rtol=1e-4, atol=1e-4), max_err
    print("KERNEL_OK")
</pallas_src>

<mosaic_0001>
module attributes {stable_mosaic.version = 11 : i64} {
  func.func @_cbam_kernel(%arg0: i32, %arg1: memref<1x32x256xf32, #tpu.memory_space<vmem>>, %arg2: memref<32x2xf32, #tpu.memory_space<vmem>>, %arg3: memref<1x2xf32, #tpu.memory_space<vmem>>, %arg4: memref<32x2xf32, #tpu.memory_space<vmem>>, %arg5: memref<32x1xf32, #tpu.memory_space<vmem>>, %arg6: memref<98xf32, #tpu.memory_space<smem>>, %arg7: memref<1xf32, #tpu.memory_space<smem>>, %arg8: memref<1x32x256xf32, #tpu.memory_space<vmem>>, %arg9: memref<2x512xf32, #tpu.memory_space<vmem>>) attributes {dimension_semantics = [#tpu.dimension_semantics<parallel>], iteration_bounds = array<i64: 2>, scalar_prefetch = 0 : i64, scratch_operands = 1 : i64, tpu.core_type = #tpu.core_type<tc>, window_params = [{transform_indices = @transform_0, window_bounds = array<i64: 1, 32, 256>}, {pipeline_mode = #tpu.pipeline_mode<synchronous>, transform_indices = @transform_1, window_bounds = array<i64: 32, 2>}, {pipeline_mode = #tpu.pipeline_mode<synchronous>, transform_indices = @transform_2, window_bounds = array<i64: 1, 2>}, {pipeline_mode = #tpu.pipeline_mode<synchronous>, transform_indices = @transform_3, window_bounds = array<i64: 32, 2>}, {pipeline_mode = #tpu.pipeline_mode<synchronous>, transform_indices = @transform_4, window_bounds = array<i64: 32, 1>}, {transform_indices = @transform_5, window_bounds = array<i64: 98>}, {transform_indices = @transform_6, window_bounds = array<i64: 1>}, {transform_indices = @transform_7, window_bounds = array<i64: 1, 32, 256>}]} {
    %c0 = arith.constant 0 : index
    %c0_0 = arith.constant 0 : index
    %c0_1 = arith.constant 0 : index
    %0 = vector.load %arg1[%c0, %c0_0, %c0_1] : memref<1x32x256xf32, #tpu.memory_space<vmem>>, vector<1x32x256xf32>
    %1 = vector.shape_cast %0 : vector<1x32x256xf32> to vector<32x256xf32>
    %cst = arith.constant dense<0.000000e+00> : vector<32xf32>
    %2 = vector.multi_reduction <add>, %1, %cst [1] : vector<32x256xf32> to vector<32xf32>
    %3 = vector.shape_cast %2 : vector<32xf32> to vector<32x1xf32>
    %cst_2 = arith.constant 2.560000e+02 : f32
    %4 = vector.broadcast %cst_2 : f32 to vector<32x1xf32>
    %5 = arith.divf %3, %4 : vector<32x1xf32>
    %cst_3 = arith.constant dense<0xFF800000> : vector<32xf32>
    %6 = vector.multi_reduction <maximumf>, %1, %cst_3 [1] : vector<32x256xf32> to vector<32xf32>
    %7 = vector.shape_cast %6 : vector<32xf32> to vector<32x1xf32>
    %c0_4 = arith.constant 0 : index
    %c0_5 = arith.constant 0 : index
    %8 = vector.load %arg2[%c0_4, %c0_5] : memref<32x2xf32, #tpu.memory_space<vmem>>, vector<32x2xf32>
    %c0_6 = arith.constant 0 : index
    %c0_7 = arith.constant 0 : index
    %9 = vector.load %arg3[%c0_6, %c0_7] : memref<1x2xf32, #tpu.memory_space<vmem>>, vector<1x2xf32>
    %c0_8 = arith.constant 0 : index
    %c0_9 = arith.constant 0 : index
    %10 = vector.load %arg4[%c0_8, %c0_9] : memref<32x2xf32, #tpu.memory_space<vmem>>, vector<32x2xf32>
    %c0_10 = arith.constant 0 : index
    %c0_11 = arith.constant 0 : index
    %11 = vector.load %arg5[%c0_10, %c0_11] : memref<32x1xf32, #tpu.memory_space<vmem>>, vector<32x1xf32>
    %12 = vector.broadcast %5 : vector<32x1xf32> to vector<32x2xf32>
    %13 = arith.mulf %8, %12 : vector<32x2xf32>
    %cst_12 = arith.constant dense<0.000000e+00> : vector<2xf32>
    %14 = vector.multi_reduction <add>, %13, %cst_12 [0] : vector<32x2xf32> to vector<2xf32>
    %15 = vector.shape_cast %14 : vector<2xf32> to vector<1x2xf32>
    %16 = arith.addf %15, %9 : vector<1x2xf32>
    %17 = vector.broadcast %7 : vector<32x1xf32> to vector<32x2xf32>
    %18 = arith.mulf %8, %17 : vector<32x2xf32>
    %cst_13 = arith.constant dense<0.000000e+00> : vector<2xf32>
    %19 = vector.multi_reduction <add>, %18, %cst_13 [0] : vector<32x2xf32> to vector<2xf32>
    %20 = vector.shape_cast %19 : vector<2xf32> to vector<1x2xf32>
    %21 = arith.addf %20, %9 : vector<1x2xf32>
    %cst_14 = arith.constant 0.000000e+00 : f32
    %22 = vector.broadcast %cst_14 : f32 to vector<1x2xf32>
    %23 = arith.maximumf %16, %22 : vector<1x2xf32>
    %cst_15 = arith.constant 0.000000e+00 : f32
    %24 = vector.broadcast %cst_15 : f32 to vector<1x2xf32>
    %25 = arith.maximumf %21, %24 : vector<1x2xf32>
    %26 = arith.addf %23, %25 : vector<1x2xf32>
    %27 = vector.broadcast %26 : vector<1x2xf32> to vector<32x2xf32>
    %28 = arith.mulf %10, %27 : vector<32x2xf32>
    %cst_16 = arith.constant dense<0.000000e+00> : vector<32xf32>
    %29 = vector.multi_reduction <add>, %28, %cst_16 [1] : vector<32x2xf32> to vector<32xf32>
    %30 = vector.shape_cast %29 : vector<32xf32> to vector<32x1xf32>
    %cst_17 = arith.constant 2.000000e+00 : f32
    %31 = vector.broadcast %cst_17 : f32 to vector<32x1xf32>
    %32 = arith.mulf %31, %11 : vector<32x1xf32>
    %33 = arith.addf %30, %32 : vector<32x1xf32>
    %34 = arith.negf %33 : vector<32x1xf32>
    %35 = math.exp %34 : vector<32x1xf32>
    %cst_18 = arith.constant 1.000000e+00 : f32
    %36 = vector.broadcast %cst_18 : f32 to vector<32x1xf32>
    %37 = arith.addf %36, %35 : vector<32x1xf32>
    %38 = arith.divf %36, %37 : vector<32x1xf32>
    %39 = vector.broadcast %38 : vector<32x1xf32> to vector<32x256xf32>
    %40 = arith.mulf %1, %39 : vector<32x256xf32>
    %cst_19 = arith.constant dense<0.000000e+00> : vector<256xf32>
    %41 = vector.multi_reduction <add>, %40, %cst_19 [0] : vector<32x256xf32> to vector<256xf32>
    %42 = vector.shape_cast %41 : vector<256xf32> to vector<1x256xf32>
    %cst_20 = arith.constant 3.200000e+01 : f32
    %43 = vector.broadcast %cst_20 : f32 to vector<1x256xf32>
    %44 = arith.divf %42, %43 : vector<1x256xf32>
    %cst_21 = arith.constant dense<0xFF800000> : vector<256xf32>
    %45 = vector.multi_reduction <maximumf>, %40, %cst_21 [0] : vector<32x256xf32> to vector<256xf32>
    %46 = vector.shape_cast %45 : vector<256xf32> to vector<1x256xf32>
    %cst_22 = arith.constant 0.000000e+00 : f32
    %47 = vector.broadcast %cst_22 : f32 to vector<2x512xf32>
    %c0_23 = arith.constant 0 : index
    %c0_24 = arith.constant 0 : index
    %48 = vector.load %arg9[%c0_23, %c0_24] : memref<2x512xf32, #tpu.memory_space<vmem>>, vector<2x512xf32>
    tpu.vector_store %arg9[%c0_23, %c0_24], %47 {strides = array<i32>} : memref<2x512xf32, #tpu.memory_space<vmem>>, vector<2x512xf32>,
    %c0_25 = arith.constant 0 : index
    %c128 = arith.constant 128 : index
    %49 = vector.load %arg9[%c0_25, %c128] : memref<2x512xf32, #tpu.memory_space<vmem>>, vector<1x256xf32>
    tpu.vector_store %arg9[%c0_25, %c128], %44 {strides = array<i32>} : memref<2x512xf32, #tpu.memory_space<vmem>>, vector<1x256xf32>,
    %c1 = arith.constant 1 : index
    %c128_26 = arith.constant 128 : index
    %50 = vector.load %arg9[%c1, %c128_26] : memref<2x512xf32, #tpu.memory_space<vmem>>, vector<1x256xf32>
    tpu.vector_store %arg9[%c1, %c128_26], %46 {strides = array<i32>} : memref<2x512xf32, #tpu.memory_space<vmem>>, vector<1x256xf32>,
    %51 = tpu.iota {dimensions = array<i32: 1>} : vector<1x256xi32>
    %c16_i32 = arith.constant 16 : i32
    %c0_i32 = arith.constant 0 : i32
    %52 = arith.cmpi eq, %c16_i32, %c0_i32 : i32
    %c1_i32 = arith.constant 1 : i32
    %53 = arith.select %52, %c1_i32, %c16_i32 : i32
    %54 = vector.broadcast %53 : i32 to vector<1x256xi32>
    %55 = arith.remsi %51, %54 : vector<1x256xi32>
    %c0_i32_27 = arith.constant 0 : i32
    %56 = vector.broadcast %c0_i32_27 : i32 to vector<1x256xi32>
    %57 = arith.cmpi ne, %55, %56 : vector<1x256xi32>
    %c0_i32_28 = arith.constant 0 : i32
    %58 = vector.broadcast %c0_i32_28 : i32 to vector<1x256xi32>
    %59 = arith.cmpi slt, %55, %58 : vector<1x256xi32>
    %c0_i32_29 = arith.constant 0 : i32
    %60 = arith.cmpi slt, %53, %c0_i32_29 : i32
    %61 = vector.broadcast %60 : i1 to vector<1x256xi1>
    %62 = vector.broadcast %61 : vector<1x256xi1> to vector<1x256xi1>
    %63 = arith.xori %59, %62 : vector<1x256xi1>
    %64 = arith.andi %63, %57 : vector<1x256xi1>
    %65 = vector.broadcast %53 : i32 to vector<1x256xi32>
    %66 = arith.addi %55, %65 : vector<1x256xi32>
    %67 = arith.select %64, %66, %55 : vector<1x256xi1>, vector<1x256xi32>
    %c-3_i32 = arith.constant -3 : i32
    %68 = vector.broadcast %c-3_i32 : i32 to vector<1x256xi32>
    %69 = arith.addi %67, %68 : vector<1x256xi32>
    %c0_i32_30 = arith.constant 0 : i32
    %70 = vector.broadcast %c0_i32_30 : i32 to vector<1x256xi32>
    %71 = arith.cmpi sge, %69, %70 : vector<1x256xi32>
    %c-3_i32_31 = arith.constant -3 : i32
    %72 = vector.broadcast %c-3_i32_31 : i32 to vector<1x256xi32>
    %73 = arith.addi %67, %72 : vector<1x256xi32>
    %c16_i32_32 = arith.constant 16 : i32
    %74 = vector.broadcast %c16_i32_32 : i32 to vector<1x256xi32>
    %75 = arith.cmpi slt, %73, %74 : vector<1x256xi32>
    %76 = arith.andi %71, %75 : vector<1x256xi1>
    %c-2_i32 = arith.constant -2 : i32
    %77 = vector.broadcast %c-2_i32 : i32 to vector<1x256xi32>
    %78 = arith.addi %67, %77 : vector<1x256xi32>
    %c0_i32_33 = arith.constant 0 : i32
    %79 = vector.broadcast %c0_i32_33 : i32 to vector<1x256xi32>
    %80 = arith.cmpi sge, %78, %79 : vector<1x256xi32>
    %c-2_i32_34 = arith.constant -2 : i32
    %81 = vector.broadcast %c-2_i32_34 : i32 to vector<1x256xi32>
    %82 = arith.addi %67, %81 : vector<1x256xi32>
    %c16_i32_35 = arith.constant 16 : i32
    %83 = vector.broadcast %c16_i32_35 : i32 to vector<1x256xi32>
    %84 = arith.cmpi slt, %82, %83 : vector<1x256xi32>
    %85 = arith.andi %80, %84 : vector<1x256xi1>
    %c-1_i32 = arith.constant -1 : i32
    %86 = vector.broadcast %c-1_i32 : i32 to vector<1x256xi32>
    %87 = arith.addi %67, %86 : vector<1x256xi32>
    %c0_i32_36 = arith.constant 0 : i32
    %88 = vector.broadcast %c0_i32_36 : i32 to vector<1x256xi32>
    %89 = arith.cmpi sge, %87, %88 : vector<1x256xi32>
    %c-1_i32_37 = arith.constant -1 : i32
    %90 = vector.broadcast %c-1_i32_37 : i32 to vector<1x256xi32>
    %91 = arith.addi %67, %90 : vector<1x256xi32>
    %c16_i32_38 = arith.constant 16 : i32
    %92 = vector.broadcast %c16_i32_38 : i32 to vector<1x256xi32>
    %93 = arith.cmpi slt, %91, %92 : vector<1x256xi32>
    %94 = arith.andi %89, %93 : vector<1x256xi1>
    %c0_i32_39 = arith.constant 0 : i32
    %95 = vector.broadcast %c0_i32_39 : i32 to vector<1x256xi32>
    %96 = arith.addi %67, %95 : vector<1x256xi32>
    %c0_i32_40 = arith.constant 0 : i32
    %97 = vector.broadcast %c0_i32_40 : i32 to vector<1x256xi32>
    %98 = arith.cmpi sge, %96, %97 : vector<1x256xi32>
    %c0_i32_41 = arith.constant 0 : i32
    %99 = vector.broadcast %c0_i32_41 : i32 to vector<1x256xi32>
    %100 = arith.addi %67, %99 : vector<1x256xi32>
    %c16_i32_42 = arith.constant 16 : i32
    %101 = vector.broadcast %c16_i32_42 : i32 to vector<1x256xi32>
    %102 = arith.cmpi slt, %100, %101 : vector<1x256xi32>
    %103 = arith.andi %98, %102 : vector<1x256xi1>
    %c1_i32_43 = arith.constant 1 : i32
    %104 = vector.broadcast %c1_i32_43 : i32 to vector<1x256xi32>
    %105 = arith.addi %67, %104 : vector<1x256xi32>
    %c0_i32_44 = arith.constant 0 : i32
    %106 = vector.broadcast %c0_i32_44 : i32 to vector<1x256xi32>
    %107 = arith.cmpi sge, %105, %106 : vector<1x256xi32>
    %c1_i32_45 = arith.constant 1 : i32
    %108 = vector.broadcast %c1_i32_45 : i32 to vector<1x256xi32>
    %109 = arith.addi %67, %108 : vector<1x256xi32>
    %c16_i32_46 = arith.constant 16 : i32
    %110 = vector.broadcast %c16_i32_46 : i32 to vector<1x256xi32>
    %111 = arith.cmpi slt, %109, %110 : vector<1x256xi32>
    %112 = arith.andi %107, %111 : vector<1x256xi1>
    %c2_i32 = arith.constant 2 : i32
    %113 = vector.broadcast %c2_i32 : i32 to vector<1x256xi32>
    %114 = arith.addi %67, %113 : vector<1x256xi32>
    %c0_i32_47 = arith.constant 0 : i32
    %115 = vector.broadcast %c0_i32_47 : i32 to vector<1x256xi32>
    %116 = arith.cmpi sge, %114, %115 : vector<1x256xi32>
    %c2_i32_48 = arith.constant 2 : i32
    %117 = vector.broadcast %c2_i32_48 : i32 to vector<1x256xi32>
    %118 = arith.addi %67, %117 : vector<1x256xi32>
    %c16_i32_49 = arith.constant 16 : i32
    %119 = vector.broadcast %c16_i32_49 : i32 to vector<1x256xi32>
    %120 = arith.cmpi slt, %118, %119 : vector<1x256xi32>
    %121 = arith.andi %116, %120 : vector<1x256xi1>
    %c3_i32 = arith.constant 3 : i32
    %122 = vector.broadcast %c3_i32 : i32 to vector<1x256xi32>
    %123 = arith.addi %67, %122 : vector<1x256xi32>
    %c0_i32_50 = arith.constant 0 : i32
    %124 = vector.broadcast %c0_i32_50 : i32 to vector<1x256xi32>
    %125 = arith.cmpi sge, %123, %124 : vector<1x256xi32>
    %c3_i32_51 = arith.constant 3 : i32
    %126 = vector.broadcast %c3_i32_51 : i32 to vector<1x256xi32>
    %127 = arith.addi %67, %126 : vector<1x256xi32>
    %c16_i32_52 = arith.constant 16 : i32
    %128 = vector.broadcast %c16_i32_52 : i32 to vector<1x256xi32>
    %129 = arith.cmpi slt, %127, %128 : vector<1x256xi32>
    %130 = arith.andi %125, %129 : vector<1x256xi1>
    %c0_53 = arith.constant 0 : index
    %131 = memref.load %arg7[%c0_53] : memref<1xf32, #tpu.memory_space<smem>>
    %132 = vector.broadcast %131 : f32 to vector<1x256xf32>
    %cst_54 = arith.constant 0.000000e+00 : f32
    %133 = vector.broadcast %cst_54 : f32 to vector<1x256xf32>
    %c0_55 = arith.constant 0 : index
    %c77 = arith.constant 77 : index
    %134 = vector.load %arg9[%c0_55, %c77] : memref<2x512xf32, #tpu.memory_space<vmem>>, vector<2x256xf32>
    %c0_56 = arith.constant 0 : index
    %135 = memref.load %arg6[%c0_56] : memref<98xf32, #tpu.memory_space<smem>>
    %c49 = arith.constant 49 : index
    %136 = memref.load %arg6[%c49] : memref<98xf32, #tpu.memory_space<smem>>
    %137 = vector.extract_strided_slice %134 {offsets = [0, 0], sizes = [1, 256], strides = [1, 1]} : vector<2x256xf32> to vector<1x256xf32>
    %138 = vector.broadcast %135 : f32 to vector<1x256xf32>
    %139 = arith.mulf %137, %138 : vector<1x256xf32>
    %140 = arith.addf %133, %139 : vector<1x256xf32>
    %141 = vector.extract_strided_slice %134 {offsets = [1, 0], sizes = [1, 256], strides = [1, 1]} : vector<2x256xf32> to vector<1x256xf32>
    %142 = vector.broadcast %136 : f32 to vector<1x256xf32>
    %143 = arith.mulf %141, %142 : vector<1x256xf32>
    %144 = arith.addf %140, %143 : vector<1x256xf32>
    %c0_57 = arith.constant 0 : index
    %c93 = arith.constant 93 : index
    %145 = vector.load %arg9[%c0_57, %c93] : memref<2x512xf32, #tpu.memory_space<vmem>>, vector<2x256xf32>
    %c7 = arith.constant 7 : index
    %146 = memref.load %arg6[%c7] : memref<98xf32, #tpu.memory_space<smem>>
    %c56 = arith.constant 56 : index
    %147 = memref.load %arg6[%c56] : memref<98xf32, #tpu.memory_space<smem>>
    %148 = vector.extract_strided_slice %145 {offsets = [0, 0], sizes = [1, 256], strides = [1, 1]} : vector<2x256xf32> to vector<1x256xf32>
    %149 = vector.broadcast %146 : f32 to vector<1x256xf32>
    %150 = arith.mulf %148, %149 : vector<1x256xf32>
    %151 = arith.addf %144, %150 : vector<1x256xf32>
    %152 = vector.extract_strided_slice %145 {offsets = [1, 0], sizes = [1, 256], strides = [1, 1]} : vector<2x256xf32> to vector<1x256xf32>
    %153 = vector.broadcast %147 : f32 to vector<1x256xf32>
    %154 = arith.mulf %152, %153 : vector<1x256xf32>
    %155 = arith.addf %151, %154 : vector<1x256xf32>
    %c0_58 = arith.constant 0 : index
    %c109 = arith.constant 109 : index
    %156 = vector.load %arg9[%c0_58, %c109] : memref<2x512xf32, #tpu.memory_space<vmem>>, vector<2x256xf32>
    %c14 = arith.constant 14 : index
    %157 = memref.load %arg6[%c14] : memref<98xf32, #tpu.memory_space<smem>>
    %c63 = arith.constant 63 : index
    %158 = memref.load %arg6[%c63] : memref<98xf32, #tpu.memory_space<smem>>
    %159 = vector.extract_strided_slice %156 {offsets = [0, 0], sizes = [1, 256], strides = [1, 1]} : vector<2x256xf32> to vector<1x256xf32>
    %160 = vector.broadcast %157 : f32 to vector<1x256xf32>
    %161 = arith.mulf %159, %160 : vector<1x256xf32>
    %162 = arith.addf %155, %161 : vector<1x256xf32>
    %163 = vector.extract_strided_slice %156 {offsets = [1, 0], sizes = [1, 256], strides = [1, 1]} : vector<2x256xf32> to vector<1x256xf32>
    %164 = vector.broadcast %158 : f32 to vector<1x256xf32>
    %165 = arith.mulf %163, %164 : vector<1x256xf32>
    %166 = arith.addf %162, %165 : vector<1x256xf32>
    %c0_59 = arith.constant 0 : index
    %c125 = arith.constant 125 : index
    %167 = vector.load %arg9[%c0_59, %c125] : memref<2x512xf32, #tpu.memory_space<vmem>>, vector<2x256xf32>
    %c21 = arith.constant 21 : index
    %168 = memref.load %arg6[%c21] : memref<98xf32, #tpu.memory_space<smem>>
    %c70 = arith.constant 70 : index
    %169 = memref.load %arg6[%c70] : memref<98xf32, #tpu.memory_space<smem>>
    %170 = vector.extract_strided_slice %167 {offsets = [0, 0], sizes = [1, 256], strides = [1, 1]} : vector<2x256xf32> to vector<1x256xf32>
    %171 = vector.broadcast %168 : f32 to vector<1x256xf32>
    %172 = arith.mulf %170, %171 : vector<1x256xf32>
    %173 = arith.addf %166, %172 : vector<1x256xf32>
    %174 = vector.extract_strided_slice %167 {offsets = [1, 0], sizes = [1, 256], strides = [1, 1]} : vector<2x256xf32> to vector<1x256xf32>
    %175 = vector.broadcast %169 : f32 to vector<1x256xf32>
    %176 = arith.mulf %174, %175 : vector<1x256xf32>
    %177 = arith.addf %173, %176 : vector<1x256xf32>
    %c0_60 = arith.constant 0 : index
    %c141 = arith.constant 141 : index
    %178 = vector.load %arg9[%c0_60, %c141] : memref<2x512xf32, #tpu.memory_space<vmem>>, vector<2x256xf32>
    %c28 = arith.constant 28 : index
    %179 = memref.load %arg6[%c28] : memref<98xf32, #tpu.memory_space<smem>>
    %c77_61 = arith.constant 77 : index
    %180 = memref.load %arg6[%c77_61] : memref<98xf32, #tpu.memory_space<smem>>
    %181 = vector.extract_strided_slice %178 {offsets = [0, 0], sizes = [1, 256], strides = [1, 1]} : vector<2x256xf32> to vector<1x256xf32>
    %182 = vector.broadcast %179 : f32 to vector<1x256xf32>
    %183 = arith.mulf %181, %182 : vector<1x256xf32>
    %184 = arith.addf %177, %183 : vector<1x256xf32>
    %185 = vector.extract_strided_slice %178 {offsets = [1, 0], sizes = [1, 256], strides = [1, 1]} : vector<2x256xf32> to vector<1x256xf32>
    %186 = vector.broadcast %180 : f32 to vector<1x256xf32>
    %187 = arith.mulf %185, %186 : vector<1x256xf32>
    %188 = arith.addf %184, %187 : vector<1x256xf32>
    %c0_62 = arith.constant 0 : index
    %c157 = arith.constant 157 : index
    %189 = vector.load %arg9[%c0_62, %c157] : memref<2x512xf32, #tpu.memory_space<vmem>>, vector<2x256xf32>
    %c35 = arith.constant 35 : index
    %190 = memref.load %arg6[%c35] : memref<98xf32, #tpu.memory_space<smem>>
    %c84 = arith.constant 84 : index
    %191 = memref.load %arg6[%c84] : memref<98xf32, #tpu.memory_space<smem>>
    %192 = vector.extract_strided_slice %189 {offsets = [0, 0], sizes = [1, 256], strides = [1, 1]} : vector<2x256xf32> to vector<1x256xf32>
    %193 = vector.broadcast %190 : f32 to vector<1x256xf32>
    %194 = arith.mulf %192, %193 : vector<1x256xf32>
    %195 = arith.addf %188, %194 : vector<1x256xf32>
    %196 = vector.extract_strided_slice %189 {offsets = [1, 0], sizes = [1, 256], strides = [1, 1]} : vector<2x256xf32> to vector<1x256xf32>
    %197 = vector.broadcast %191 : f32 to vector<1x256xf32>
    %198 = arith.mulf %196, %197 : vector<1x256xf32>
    %199 = arith.addf %195, %198 : vector<1x256xf32>
    %c0_63 = arith.constant 0 : index
    %c173 = arith.constant 173 : index
    %200 = vector.load %arg9[%c0_63, %c173] : memref<2x512xf32, #tpu.memory_space<vmem>>, vector<2x256xf32>
    %c42 = arith.constant 42 : index
    %201 = memref.load %arg6[%c42] : memref<98xf32, #tpu.memory_space<smem>>
    %c91 = arith.constant 91 : index
    %202 = memref.load %arg6[%c91] : memref<98xf32, #tpu.memory_space<smem>>
    %203 = vector.extract_strided_slice %200 {offsets = [0, 0], sizes = [1, 256], strides = [1, 1]} : vector<2x256xf32> to vector<1x256xf32>
    %204 = vector.broadcast %201 : f32 to vector<1x256xf32>
    %205 = arith.mulf %203, %204 : vector<1x256xf32>
    %206 = arith.addf %199, %205 : vector<1x256xf32>
    %207 = vector.extract_strided_slice %200 {offsets = [1, 0], sizes = [1, 256], strides = [1, 1]} : vector<2x256xf32> to vector<1x256xf32>
    %208 = vector.broadcast %202 : f32 to vector<1x256xf32>
    %209 = arith.mulf %207, %208 : vector<1x256xf32>
    %210 = arith.addf %206, %209 : vector<1x256xf32>
    %cst_64 = arith.constant 0.000000e+00 : f32
    %211 = vector.broadcast %cst_64 : f32 to vector<1x256xf32>
    %212 = arith.select %76, %210, %211 : vector<1x256xi1>, vector<1x256xf32>
    %213 = arith.addf %132, %212 : vector<1x256xf32>
    %cst_65 = arith.constant 0.000000e+00 : f32
    %214 = vector.broadcast %cst_65 : f32 to vector<1x256xf32>
    %c0_66 = arith.constant 0 : index
    %c78 = arith.constant 78 : index
    %215 = vector.load %arg9[%c0_66, %c78] : memref<2x512xf32, #tpu.memory_space<vmem>>, vector<2x256xf32>
    %c1_67 = arith.constant 1 : index
    %216 = memref.load %arg6[%c1_67] : memref<98xf32, #tpu.memory_space<smem>>
    %c50 = arith.constant 50 : index
    %217 = memref.load %arg6[%c50] : memref<98xf32, #tpu.memory_space<smem>>
    %218 = vector.extract_strided_slice %215 {offsets = [0, 0], sizes = [1, 256], strides = [1, 1]} : vector<2x256xf32> to vector<1x256xf32>
    %219 = vector.broadcast %216 : f32 to vector<1x256xf32>
    %220 = arith.mulf %218, %219 : vector<1x256xf32>
    %221 = arith.addf %214, %220 : vector<1x256xf32>
    %222 = vector.extract_strided_slice %215 {offsets = [1, 0], sizes = [1, 256], strides = [1, 1]} : vector<2x256xf32> to vector<1x256xf32>
    %223 = vector.broadcast %217 : f32 to vector<1x256xf32>
    %224 = arith.mulf %222, %223 : vector<1x256xf32>
    %225 = arith.addf %221, %224 : vector<1x256xf32>
    %c0_68 = arith.constant 0 : index
    %c94 = arith.constant 94 : index
    %226 = vector.load %arg9[%c0_68, %c94] : memref<2x512xf32, #tpu.memory_space<vmem>>, vector<2x256xf32>
    %c8 = arith.constant 8 : index
    %227 = memref.load %arg6[%c8] : memref<98xf32, #tpu.memory_space<smem>>
    %c57 = arith.constant 57 : index
    %228 = memref.load %arg6[%c57] : memref<98xf32, #tpu.memory_space<smem>>
    %229 = vector.extract_strided_slice %226 {offsets = [0, 0], sizes = [1, 256], strides = [1, 1]} : vector<2x256xf32> to vector<1x256xf32>
    %230 = vector.broadcast %227 : f32 to vector<1x256xf32>
    %231 = arith.mulf %229, %230 : vector<1x256xf32>
    %232 = arith.addf %225, %231 : vector<1x256xf32>
    %233 = vector.extract_strided_slice %226 {offsets = [1, 0], sizes = [1, 256], strides = [1, 1]} : vector<2x256xf32> to vector<1x256xf32>
    %234 = vector.broadcast %228 : f32 to vector<1x256xf32>
    %235 = arith.mulf %233, %234 : vector<1x256xf32>
    %236 = arith.addf %232, %235 : vector<1x256xf32>
    %c0_69 = arith.constant 0 : index
    %c110 = arith.constant 110 : index
    %237 = vector.load %arg9[%c0_69, %c110] : memref<2x512xf32, #tpu.memory_space<vmem>>, vector<2x256xf32>
    %c15 = arith.constant 15 : index
    %238 = memref.load %arg6[%c15] : memref<98xf32, #tpu.memory_space<smem>>
    %c64 = arith.constant 64 : index
    %239 = memref.load %arg6[%c64] : memref<98xf32, #tpu.memory_space<smem>>
    %240 = vector.extract_strided_slice %237 {offsets = [0, 0], sizes = [1, 256], strides = [1, 1]} : vector<2x256xf32> to vector<1x256xf32>
    %241 = vector.broadcast %238 : f32 to vector<1x256xf32>
    %242 = arith.mulf %240, %241 : vector<1x256xf32>
    %243 = arith.addf %236, %242 : vector<1x256xf32>
    %244 = vector.extract_strided_slice %237 {offsets = [1, 0], sizes = [1, 256], strides = [1, 1]} : vector<2x256xf32> to vector<1x256xf32>
    %245 = vector.broadcast %239 : f32 to vector<1x256xf32>
    %246 = arith.mulf %244, %245 : vector<1x256xf32>
    %247 = arith.addf %243, %246 : vector<1x256xf32>
    %c0_70 = arith.constant 0 : index
    %c126 = arith.constant 126 : index
    %248 = vector.load %arg9[%c0_70, %c126] : memref<2x512xf32, #tpu.memory_space<vmem>>, vector<2x256xf32>
    %c22 = arith.constant 22 : index
    %249 = memref.load %arg6[%c22] : memref<98xf32, #tpu.memory_space<smem>>
    %c71 = arith.constant 71 : index
    %250 = memref.load %arg6[%c71] : memref<98xf32, #tpu.memory_space<smem>>
    %251 = vector.extract_strided_slice %248 {offsets = [0, 0], sizes = [1, 256], strides = [1, 1]} : vector<2x256xf32> to vector<1x256xf32>
    %252 = vector.broadcast %249 : f32 to vector<1x256xf32>
    %253 = arith.mulf %251, %252 : vector<1x256xf32>
    %254 = arith.addf %247, %253 : vector<1x256xf32>
    %255 = vector.extract_strided_slice %248 {offsets = [1, 0], sizes = [1, 256], strides = [1, 1]} : vector<2x256xf32> to vector<1x256xf32>
    %256 = vector.broadcast %250 : f32 to vector<1x256xf32>
    %257 = arith.mulf %255, %256 : vector<1x256xf32>
    %258 = arith.addf %254, %257 : vector<1x256xf32>
    %c0_71 = arith.constant 0 : index
    %c142 = arith.constant 142 : index
    %259 = vector.load %arg9[%c0_71, %c142] : memref<2x512xf32, #tpu.memory_space<vmem>>, vector<2x256xf32>
    %c29 = arith.constant 29 : index
    %260 = memref.load %arg6[%c29] : memref<98xf32, #tpu.memory_space<smem>>
    %c78_72 = arith.constant 78 : index
    %261 = memref.load %arg6[%c78_72] : memref<98xf32, #tpu.memory_space<smem>>
    %262 = vector.extract_strided_slice %259 {offsets = [0, 0], sizes = [1, 256], strides = [1, 1]} : vector<2x256xf32> to vector<1x256xf32>
    %263 = vector.broadcast %260 : f32 to vector<1x256xf32>
    %264 = arith.mulf %262, %263 : vector<1x256xf32>
    %265 = arith.addf %258, %264 : vector<1x256xf32>
    %266 = vector.extract_strided_slice %259 {offsets = [1, 0], sizes = [1, 256], strides = [1, 1]} : vector<2x256xf32> to vector<1x256xf32>
    %267 = vector.broadcast %261 : f32 to vector<1x256xf32>
    %268 = arith.mulf %266, %267 : vector<1x256xf32>
    %269 = arith.addf %265, %268 : vector<1x256xf32>
    %c0_73 = arith.constant 0 : index
    %c158 = arith.constant 158 : index
    %270 = vector.load %arg9[%c0_73, %c158] : memref<2x512xf32, #tpu.memory_space<vmem>>, vector<2x256xf32>
    %c36 = arith.constant 36 : index
    %271 = memref.load %arg6[%c36] : memref<98xf32, #tpu.memory_space<smem>>
    %c85 = arith.constant 85 : index
    %272 = memref.load %arg6[%c85] : memref<98xf32, #tpu.memory_space<smem>>
    %273 = vector.extract_strided_slice %270 {offsets = [0, 0], sizes = [1, 256], strides = [1, 1]} : vector<2x256xf32> to vector<1x256xf32>
    %274 = vector.broadcast %271 : f32 to vector<1x256xf32>
    %275 = arith.mulf %273, %274 : vector<1x256xf32>
    %276 = arith.addf %269, %275 : vector<1x256xf32>
    %277 = vector.extract_strided_slice %270 {offsets = [1, 0], sizes = [1, 256], strides = [1, 1]} : vector<2x256xf32> to vector<1x256xf32>
    %278 = vector.broadcast %272 : f32 to vector<1x256xf32>
    %279 = arith.mulf %277, %278 : vector<1x256xf32>
    %280 = arith.addf %276, %279 : vector<1x256xf32>
    %c0_74 = arith.constant 0 : index
    %c174 = arith.constant 174 : index
    %281 = vector.load %arg9[%c0_74, %c174] : memref<2x512xf32, #tpu.memory_space<vmem>>, vector<2x256xf32>
    %c43 = arith.constant 43 : index
    %282 = memref.load %arg6[%c43] : memref<98xf32, #tpu.memory_space<smem>>
    %c92 = arith.constant 92 : index
    %283 = memref.load %arg6[%c92] : memref<98xf32, #tpu.memory_space<smem>>
    %284 = vector.extract_strided_slice %281 {offsets = [0, 0], sizes = [1, 256], strides = [1, 1]} : vector<2x256xf32> to vector<1x256xf32>
    %285 = vector.broadcast %282 : f32 to vector<1x256xf32>
    %286 = arith.mulf %284, %285 : vector<1x256xf32>
    %287 = arith.addf %280, %286 : vector<1x256xf32>
    %288 = vector.extract_strided_slice %281 {offsets = [1, 0], sizes = [1, 256], strides = [1, 1]} : vector<2x256xf32> to vector<1x256xf32>
    %289 = vector.broadcast %283 : f32 to vector<1x256xf32>
    %290 = arith.mulf %288, %289 : vector<1x256xf32>
    %291 = arith.addf %287, %290 : vector<1x256xf32>
    %cst_75 = arith.constant 0.000000e+00 : f32
    %292 = vector.broadcast %cst_75 : f32 to vector<1x256xf32>
    %293 = arith.select %85, %291, %292 : vector<1x256xi1>, vector<1x256xf32>
    %294 = arith.addf %213, %293 : vector<1x256xf32>
    %cst_76 = arith.constant 0.000000e+00 : f32
    %295 = vector.broadcast %cst_76 : f32 to vector<1x256xf32>
    %c0_77 = arith.constant 0 : index
    %c79 = arith.constant 79 : index
    %296 = vector.load %arg9[%c0_77, %c79] : memref<2x512xf32, #tpu.memory_space<vmem>>, vector<2x256xf32>
    %c2 = arith.constant 2 : index
    %297 = memref.load %arg6[%c2] : memref<98xf32, #tpu.memory_space<smem>>
    %c51 = arith.constant 51 : index
    %298 = memref.load %arg6[%c51] : memref<98xf32, #tpu.memory_space<smem>>
    %299 = vector.extract_strided_slice %296 {offsets = [0, 0], sizes = [1, 256], strides = [1, 1]} : vector<2x256xf32> to vector<1x256xf32>
    %300 = vector.broadcast %297 : f32 to vector<1x256xf32>
    %301 = arith.mulf %299, %300 : vector<1x256xf32>
    %302 = arith.addf %295, %301 : vector<1x256xf32>
    %303 = vector.extract_strided_slice %296 {offsets = [1, 0], sizes = [1, 256], strides = [1, 1]} : vector<2x256xf32> to vector<1x256xf32>
    %304 = vector.broadcast %298 : f32 to vector<1x256xf32>
    %305 = arith.mulf %303, %304 : vector<1x256xf32>
    %306 = arith.addf %302, %305 : vector<1x256xf32>
    %c0_78 = arith.constant 0 : index
    %c95 = arith.constant 95 : index
    %307 = vector.load %arg9[%c0_78, %c95] : memref<2x512xf32, #tpu.memory_space<vmem>>, vector<2x256xf32>
    %c9 = arith.constant 9 : index
    %308 = memref.load %arg6[%c9] : memref<98xf32, #tpu.memory_space<smem>>
    %c58 = arith.constant 58 : index
    %309 = memref.load %arg6[%c58] : memref<98xf32, #tpu.memory_space<smem>>
    %310 = vector.extract_strided_slice %307 {offsets = [0, 0], sizes = [1, 256], strides = [1, 1]} : vector<2x256xf32> to vector<1x256xf32>
    %311 = vector.broadcast %308 : f32 to vector<1x256xf32>
    %312 = arith.mulf %310, %311 : vector<1x256xf32>
    %313 = arith.addf %306, %312 : vector<1x256xf32>
    %314 = vector.extract_strided_slice %307 {offsets = [1, 0], sizes = [1, 256], strides = [1, 1]} : vector<2x256xf32> to vector<1x256xf32>
    %315 = vector.broadcast %309 : f32 to vector<1x256xf32>
    %316 = arith.mulf %314, %315 : vector<1x256xf32>
    %317 = arith.addf %313, %316 : vector<1x256xf32>
    %c0_79 = arith.constant 0 : index
    %c111 = arith.constant 111 : index
    %318 = vector.load %arg9[%c0_79, %c111] : memref<2x512xf32, #tpu.memory_space<vmem>>, vector<2x256xf32>
    %c16 = arith.constant 16 : index
    %319 = memref.load %arg6[%c16] : memref<98xf32, #tpu.memory_space<smem>>
    %c65 = arith.constant 65 : index
    %320 = memref.load %arg6[%c65] : memref<98xf32, #tpu.memory_space<smem>>
    %321 = vector.extract_strided_slice %318 {offsets = [0, 0], sizes = [1, 256], strides = [1, 1]} : vector<2x256xf32> to vector<1x256xf32>
    %322 = vector.broadcast %319 : f32 to vector<1x256xf32>
    %323 = arith.mulf %321, %322 : vector<1x256xf32>
    %324 = arith.addf %317, %323 : vector<1x256xf32>
    %325 = vector.extract_strided_slice %318 {offsets = [1, 0], sizes = [1, 256], strides = [1, 1]} : vector<2x256xf32> to vector<1x256xf32>
    %326 = vector.broadcast %320 : f32 to vector<1x256xf32>
    %327 = arith.mulf %325, %326 : vector<1x256xf32>
    %328 = arith.addf %324, %327 : vector<1x256xf32>
    %c0_80 = arith.constant 0 : index
    %c127 = arith.constant 127 : index
    %329 = vector.load %arg9[%c0_80, %c127] : memref<2x512xf32, #tpu.memory_space<vmem>>, vector<2x256xf32>
    %c23 = arith.constant 23 : index
    %330 = memref.load %arg6[%c23] : memref<98xf32, #tpu.memory_space<smem>>
    %c72 = arith.constant 72 : index
    %331 = memref.load %arg6[%c72] : memref<98xf32, #tpu.memory_space<smem>>
    %332 = vector.extract_strided_slice %329 {offsets = [0, 0], sizes = [1, 256], strides = [1, 1]} : vector<2x256xf32> to vector<1x256xf32>
    %333 = vector.broadcast %330 : f32 to vector<1x256xf32>
    %334 = arith.mulf %332, %333 : vector<1x256xf32>
    %335 = arith.addf %328, %334 : vector<1x256xf32>
    %336 = vector.extract_strided_slice %329 {offsets = [1, 0], sizes = [1, 256], strides = [1, 1]} : vector<2x256xf32> to vector<1x256xf32>
    %337 = vector.broadcast %331 : f32 to vector<1x256xf32>
    %338 = arith.mulf %336, %337 : vector<1x256xf32>
    %339 = arith.addf %335, %338 : vector<1x256xf32>
    %c0_81 = arith.constant 0 : index
    %c143 = arith.constant 143 : index
    %340 = vector.load %arg9[%c0_81, %c143] : memref<2x512xf32, #tpu.memory_space<vmem>>, vector<2x256xf32>
    %c30 = arith.constant 30 : index
    %341 = memref.load %arg6[%c30] : memref<98xf32, #tpu.memory_space<smem>>
    %c79_82 = arith.constant 79 : index
    %342 = memref.load %arg6[%c79_82] : memref<98xf32, #tpu.memory_space<smem>>
    %343 = vector.extract_strided_slice %340 {offsets = [0, 0], sizes = [1, 256], strides = [1, 1]} : vector<2x256xf32> to vector<1x256xf32>
    %344 = vector.broadcast %341 : f32 to vector<1x256xf32>
    %345 = arith.mulf %343, %344 : vector<1x256xf32>
    %346 = arith.addf %339, %345 : vector<1x256xf32>
    %347 = vector.extract_strided_slice %340 {offsets = [1, 0], sizes = [1, 256], strides = [1, 1]} : vector<2x256xf32> to vector<1x256xf32>
    %348 = vector.broadcast %342 : f32 to vector<1x256xf32>
    %349 = arith.mulf %347, %348 : vector<1x256xf32>
    %350 = arith.addf %346, %349 : vector<1x256xf32>
    %c0_83 = arith.constant 0 : index
    %c159 = arith.constant 159 : index
    %351 = vector.load %arg9[%c0_83, %c159] : memref<2x512xf32, #tpu.memory_space<vmem>>, vector<2x256xf32>
    %c37 = arith.constant 37 : index
    %352 = memref.load %arg6[%c37] : memref<98xf32, #tpu.memory_space<smem>>
    %c86 = arith.constant 86 : index
    %353 = memref.load %arg6[%c86] : memref<98xf32, #tpu.memory_space<smem>>
    %354 = vector.extract_strided_slice %351 {offsets = [0, 0], sizes = [1, 256], strides = [1, 1]} : vector<2x256xf32> to vector<1x256xf32>
    %355 = vector.broadcast %352 : f32 to vector<1x256xf32>
    %356 = arith.mulf %354, %355 : vector<1x256xf32>
    %357 = arith.addf %350, %356 : vector<1x256xf32>
    %358 = vector.extract_strided_slice %351 {offsets = [1, 0], sizes = [1, 256], strides = [1, 1]} : vector<2x256xf32> to vector<1x256xf32>
    %359 = vector.broadcast %353 : f32 to vector<1x256xf32>
    %360 = arith.mulf %358, %359 : vector<1x256xf32>
    %361 = arith.addf %357, %360 : vector<1x256xf32>
    %c0_84 = arith.constant 0 : index
    %c175 = arith.constant 175 : index
    %362 = vector.load %arg9[%c0_84, %c175] : memref<2x512xf32, #tpu.memory_space<vmem>>, vector<2x256xf32>
    %c44 = arith.constant 44 : index
    %363 = memref.load %arg6[%c44] : memref<98xf32, #tpu.memory_space<smem>>
    %c93_85 = arith.constant 93 : index
    %364 = memref.load %arg6[%c93_85] : memref<98xf32, #tpu.memory_space<smem>>
    %365 = vector.extract_strided_slice %362 {offsets = [0, 0], sizes = [1, 256], strides = [1, 1]} : vector<2x256xf32> to vector<1x256xf32>
    %366 = vector.broadcast %363 : f32 to vector<1x256xf32>
    %367 = arith.mulf %365, %366 : vector<1x256xf32>
    %368 = arith.addf %361, %367 : vector<1x256xf32>
    %369 = vector.extract_strided_slice %362 {offsets = [1, 0], sizes = [1, 256], strides = [1, 1]} : vector<2x256xf32> to vector<1x256xf32>
    %370 = vector.broadcast %364 : f32 to vector<1x256xf32>
    %371 = arith.mulf %369, %370 : vector<1x256xf32>
    %372 = arith.addf %368, %371 : vector<1x256xf32>
    %cst_86 = arith.constant 0.000000e+00 : f32
    %373 = vector.broadcast %cst_86 : f32 to vector<1x256xf32>
    %374 = arith.select %94, %372, %373 : vector<1x256xi1>, vector<1x256xf32>
    %375 = arith.addf %294, %374 : vector<1x256xf32>
    %cst_87 = arith.constant 0.000000e+00 : f32
    %376 = vector.broadcast %cst_87 : f32 to vector<1x256xf32>
    %c0_88 = arith.constant 0 : index
    %c80 = arith.constant 80 : index
    %377 = vector.load %arg9[%c0_88, %c80] : memref<2x512xf32, #tpu.memory_space<vmem>>, vector<2x256xf32>
    %c3 = arith.constant 3 : index
    %378 = memref.load %arg6[%c3] : memref<98xf32, #tpu.memory_space<smem>>
    %c52 = arith.constant 52 : index
    %379 = memref.load %arg6[%c52] : memref<98xf32, #tpu.memory_space<smem>>
    %380 = vector.extract_strided_slice %377 {offsets = [0, 0], sizes = [1, 256], strides = [1, 1]} : vector<2x256xf32> to vector<1x256xf32>
    %381 = vector.broadcast %378 : f32 to vector<1x256xf32>
    %382 = arith.mulf %380, %381 : vector<1x256xf32>
    %383 = arith.addf %376, %382 : vector<1x256xf32>
    %384 = vector.extract_strided_slice %377 {offsets = [1, 0], sizes = [1, 256], strides = [1, 1]} : vector<2x256xf32> to vector<1x256xf32>
    %385 = vector.broadcast %379 : f32 to vector<1x256xf32>
    %386 = arith.mulf %384, %385 : vector<1x256xf32>
    %387 = arith.addf %383, %386 : vector<1x256xf32>
    %c0_89 = arith.constant 0 : index
    %c96 = arith.constant 96 : index
    %388 = vector.load %arg9[%c0_89, %c96] : memref<2x512xf32, #tpu.memory_space<vmem>>, vector<2x256xf32>
    %c10 = arith.constant 10 : index
    %389 = memref.load %arg6[%c10] : memref<98xf32, #tpu.memory_space<smem>>
    %c59 = arith.constant 59 : index
    %390 = memref.load %arg6[%c59] : memref<98xf32, #tpu.memory_space<smem>>
    %391 = vector.extract_strided_slice %388 {offsets = [0, 0], sizes = [1, 256], strides = [1, 1]} : vector<2x256xf32> to vector<1x256xf32>
    %392 = vector.broadcast %389 : f32 to vector<1x256xf32>
    %393 = arith.mulf %391, %392 : vector<1x256xf32>
    %394 = arith.addf %387, %393 : vector<1x256xf32>
    %395 = vector.extract_strided_slice %388 {offsets = [1, 0], sizes = [1, 256], strides = [1, 1]} : vector<2x256xf32> to vector<1x256xf32>
    %396 = vector.broadcast %390 : f32 to vector<1x256xf32>
    %397 = arith.mulf %395, %396 : vector<1x256xf32>
    %398 = arith.addf %394, %397 : vector<1x256xf32>
    %c0_90 = arith.constant 0 : index
    %c112 = arith.constant 112 : index
    %399 = vector.load %arg9[%c0_90, %c112] : memref<2x512xf32, #tpu.memory_space<vmem>>, vector<2x256xf32>
    %c17 = arith.constant 17 : index
    %400 = memref.load %arg6[%c17] : memref<98xf32, #tpu.memory_space<smem>>
    %c66 = arith.constant 66 : index
    %401 = memref.load %arg6[%c66] : memref<98xf32, #tpu.memory_space<smem>>
    %402 = vector.extract_strided_slice %399 {offsets = [0, 0], sizes = [1, 256], strides = [1, 1]} : vector<2x256xf32> to vector<1x256xf32>
    %403 = vector.broadcast %400 : f32 to vector<1x256xf32>
    %404 = arith.mulf %402, %403 : vector<1x256xf32>
    %405 = arith.addf %398, %404 : vector<1x256xf32>
    %406 = vector.extract_strided_slice %399 {offsets = [1, 0], sizes = [1, 256], strides = [1, 1]} : vector<2x256xf32> to vector<1x256xf32>
    %407 = vector.broadcast %401 : f32 to vector<1x256xf32>
    %408 = arith.mulf %406, %407 : vector<1x256xf32>
    %409 = arith.addf %405, %408 : vector<1x256xf32>
    %c0_91 = arith.constant 0 : index
    %c128_92 = arith.constant 128 : index
    %410 = vector.load %arg9[%c0_91, %c128_92] : memref<2x512xf32, #tpu.memory_space<vmem>>, vector<2x256xf32>
    %c24 = arith.constant 24 : index
    %411 = memref.load %arg6[%c24] : memref<98xf32, #tpu.memory_space<smem>>
    %c73 = arith.constant 73 : index
    %412 = memref.load %arg6[%c73] : memref<98xf32, #tpu.memory_space<smem>>
    %413 = vector.extract_strided_slice %410 {offsets = [0, 0], sizes = [1, 256], strides = [1, 1]} : vector<2x256xf32> to vector<1x256xf32>
    %414 = vector.broadcast %411 : f32 to vector<1x256xf32>
    %415 = arith.mulf %413, %414 : vector<1x256xf32>
    %416 = arith.addf %409, %415 : vector<1x256xf32>
    %417 = vector.extract_strided_slice %410 {offsets = [1, 0], sizes = [1, 256], strides = [1, 1]} : vector<2x256xf32> to vector<1x256xf32>
    %418 = vector.broadcast %412 : f32 to vector<1x256xf32>
    %419 = arith.mulf %417, %418 : vector<1x256xf32>
    %420 = arith.addf %416, %419 : vector<1x256xf32>
    %c0_93 = arith.constant 0 : index
    %c144 = arith.constant 144 : index
    %421 = vector.load %arg9[%c0_93, %c144] : memref<2x512xf32, #tpu.memory_space<vmem>>, vector<2x256xf32>
    %c31 = arith.constant 31 : index
    %422 = memref.load %arg6[%c31] : memref<98xf32, #tpu.memory_space<smem>>
    %c80_94 = arith.constant 80 : index
    %423 = memref.load %arg6[%c80_94] : memref<98xf32, #tpu.memory_space<smem>>
    %424 = vector.extract_strided_slice %421 {offsets = [0, 0], sizes = [1, 256], strides = [1, 1]} : vector<2x256xf32> to vector<1x256xf32>
    %425 = vector.broadcast %422 : f32 to vector<1x256xf32>
    %426 = arith.mulf %424, %425 : vector<1x256xf32>
    %427 = arith.addf %420, %426 : vector<1x256xf32>
    %428 = vector.extract_strided_slice %421 {offsets = [1, 0], sizes = [1, 256], strides = [1, 1]} : vector<2x256xf32> to vector<1x256xf32>
    %429 = vector.broadcast %423 : f32 to vector<1x256xf32>
    %430 = arith.mulf %428, %429 : vector<1x256xf32>
    %431 = arith.addf %427, %430 : vector<1x256xf32>
    %c0_95 = arith.constant 0 : index
    %c160 = arith.constant 160 : index
    %432 = vector.load %arg9[%c0_95, %c160] : memref<2x512xf32, #tpu.memory_space<vmem>>, vector<2x256xf32>
    %c38 = arith.constant 38 : index
    %433 = memref.load %arg6[%c38] : memref<98xf32, #tpu.memory_space<smem>>
    %c87 = arith.constant 87 : index
    %434 = memref.load %arg6[%c87] : memref<98xf32, #tpu.memory_space<smem>>
    %435 = vector.extract_strided_slice %432 {offsets = [0, 0], sizes = [1, 256], strides = [1, 1]} : vector<2x256xf32> to vector<1x256xf32>
    %436 = vector.broadcast %433 : f32 to vector<1x256xf32>
    %437 = arith.mulf %435, %436 : vector<1x256xf32>
    %438 = arith.addf %431, %437 : vector<1x256xf32>
    %439 = vector.extract_strided_slice %432 {offsets = [1, 0], sizes = [1, 256], strides = [1, 1]} : vector<2x256xf32> to vector<1x256xf32>
    %440 = vector.broadcast %434 : f32 to vector<1x256xf32>
    %441 = arith.mulf %439, %440 : vector<1x256xf32>
    %442 = arith.addf %438, %441 : vector<1x256xf32>
    %c0_96 = arith.constant 0 : index
    %c176 = arith.constant 176 : index
    %443 = vector.load %arg9[%c0_96, %c176] : memref<2x512xf32, #tpu.memory_space<vmem>>, vector<2x256xf32>
    %c45 = arith.constant 45 : index
    %444 = memref.load %arg6[%c45] : memref<98xf32, #tpu.memory_space<smem>>
    %c94_97 = arith.constant 94 : index
    %445 = memref.load %arg6[%c94_97] : memref<98xf32, #tpu.memory_space<smem>>
    %446 = vector.extract_strided_slice %443 {offsets = [0, 0], sizes = [1, 256], strides = [1, 1]} : vector<2x256xf32> to vector<1x256xf32>
    %447 = vector.broadcast %444 : f32 to vector<1x256xf32>
    %448 = arith.mulf %446, %447 : vector<1x256xf32>
    %449 = arith.addf %442, %448 : vector<1x256xf32>
    %450 = vector.extract_strided_slice %443 {offsets = [1, 0], sizes = [1, 256], strides = [1, 1]} : vector<2x256xf32> to vector<1x256xf32>
    %451 = vector.broadcast %445 : f32 to vector<1x256xf32>
    %452 = arith.mulf %450, %451 : vector<1x256xf32>
    %453 = arith.addf %449, %452 : vector<1x256xf32>
    %cst_98 = arith.constant 0.000000e+00 : f32
    %454 = vector.broadcast %cst_98 : f32 to vector<1x256xf32>
    %455 = arith.select %103, %453, %454 : vector<1x256xi1>, vector<1x256xf32>
    %456 = arith.addf %375, %455 : vector<1x256xf32>
    %cst_99 = arith.constant 0.000000e+00 : f32
    %457 = vector.broadcast %cst_99 : f32 to vector<1x256xf32>
    %c0_100 = arith.constant 0 : index
    %c81 = arith.constant 81 : index
    %458 = vector.load %arg9[%c0_100, %c81] : memref<2x512xf32, #tpu.memory_space<vmem>>, vector<2x256xf32>
    %c4 = arith.constant 4 : index
    %459 = memref.load %arg6[%c4] : memref<98xf32, #tpu.memory_space<smem>>
    %c53 = arith.constant 53 : index
    %460 = memref.load %arg6[%c53] : memref<98xf32, #tpu.memory_space<smem>>
    %461 = vector.extract_strided_slice %458 {offsets = [0, 0], sizes = [1, 256], strides = [1, 1]} : vector<2x256xf32> to vector<1x256xf32>
    %462 = vector.broadcast %459 : f32 to vector<1x256xf32>
    %463 = arith.mulf %461, %462 : vector<1x256xf32>
    %464 = arith.addf %457, %463 : vector<1x256xf32>
    %465 = vector.extract_strided_slice %458 {offsets = [1, 0], sizes = [1, 256], strides = [1, 1]} : vector<2x256xf32> to vector<1x256xf32>
    %466 = vector.broadcast %460 : f32 to vector<1x256xf32>
    %467 = arith.mulf %465, %466 : vector<1x256xf32>
    %468 = arith.addf %464, %467 : vector<1x256xf32>
    %c0_101 = arith.constant 0 : index
    %c97 = arith.constant 97 : index
    %469 = vector.load %arg9[%c0_101, %c97] : memref<2x512xf32, #tpu.memory_space<vmem>>, vector<2x256xf32>
    %c11 = arith.constant 11 : index
    %470 = memref.load %arg6[%c11] : memref<98xf32, #tpu.memory_space<smem>>
    %c60 = arith.constant 60 : index
    %471 = memref.load %arg6[%c60] : memref<98xf32, #tpu.memory_space<smem>>
    %472 = vector.extract_strided_slice %469 {offsets = [0, 0], sizes = [1, 256], strides = [1, 1]} : vector<2x256xf32> to vector<1x256xf32>
    %473 = vector.broadcast %470 : f32 to vector<1x256xf32>
    %474 = arith.mulf %472, %473 : vector<1x256xf32>
    %475 = arith.addf %468, %474 : vector<1x256xf32>
    %476 = vector.extract_strided_slice %469 {offsets = [1, 0], sizes = [1, 256], strides = [1, 1]} : vector<2x256xf32> to vector<1x256xf32>
    %477 = vector.broadcast %471 : f32 to vector<1x256xf32>
    %478 = arith.mulf %476, %477 : vector<1x256xf32>
    %479 = arith.addf %475, %478 : vector<1x256xf32>
    %c0_102 = arith.constant 0 : index
    %c113 = arith.constant 113 : index
    %480 = vector.load %arg9[%c0_102, %c113] : memref<2x512xf32, #tpu.memory_space<vmem>>, vector<2x256xf32>
    %c18 = arith.constant 18 : index
    %481 = memref.load %arg6[%c18] : memref<98xf32, #tpu.memory_space<smem>>
    %c67 = arith.constant 67 : index
    %482 = memref.load %arg6[%c67] : memref<98xf32, #tpu.memory_space<smem>>
    %483 = vector.extract_strided_slice %480 {offsets = [0, 0], sizes = [1, 256], strides = [1, 1]} : vector<2x256xf32> to vector<1x256xf32>
    %484 = vector.broadcast %481 : f32 to vector<1x256xf32>
    %485 = arith.mulf %483, %484 : vector<1x256xf32>
    %486 = arith.addf %479, %485 : vector<1x256xf32>
    %487 = vector.extract_strided_slice %480 {offsets = [1, 0], sizes = [1, 256], strides = [1, 1]} : vector<2x256xf32> to vector<1x256xf32>
    %488 = vector.broadcast %482 : f32 to vector<1x256xf32>
    %489 = arith.mulf %487, %488 : vector<1x256xf32>
    %490 = arith.addf %486, %489 : vector<1x256xf32>
    %c0_103 = arith.constant 0 : index
    %c129 = arith.constant 129 : index
    %491 = vector.load %arg9[%c0_103, %c129] : memref<2x512xf32, #tpu.memory_space<vmem>>, vector<2x256xf32>
    %c25 = arith.constant 25 : index
    %492 = memref.load %arg6[%c25] : memref<98xf32, #tpu.memory_space<smem>>
    %c74 = arith.constant 74 : index
    %493 = memref.load %arg6[%c74] : memref<98xf32, #tpu.memory_space<smem>>
    %494 = vector.extract_strided_slice %491 {offsets = [0, 0], sizes = [1, 256], strides = [1, 1]} : vector<2x256xf32> to vector<1x256xf32>
    %495 = vector.broadcast %492 : f32 to vector<1x256xf32>
    %496 = arith.mulf %494, %495 : vector<1x256xf32>
    %497 = arith.addf %490, %496 : vector<1x256xf32>
    %498 = vector.extract_strided_slice %491 {offsets = [1, 0], sizes = [1, 256], strides = [1, 1]} : vector<2x256xf32> to vector<1x256xf32>
    %499 = vector.broadcast %493 : f32 to vector<1x256xf32>
    %500 = arith.mulf %498, %499 : vector<1x256xf32>
    %501 = arith.addf %497, %500 : vector<1x256xf32>
    %c0_104 = arith.constant 0 : index
    %c145 = arith.constant 145 : index
    %502 = vector.load %arg9[%c0_104, %c145] : memref<2x512xf32, #tpu.memory_space<vmem>>, vector<2x256xf32>
    %c32 = arith.constant 32 : index
    %503 = memref.load %arg6[%c32] : memref<98xf32, #tpu.memory_space<smem>>
    %c81_105 = arith.constant 81 : index
    %504 = memref.load %arg6[%c81_105] : memref<98xf32, #tpu.memory_space<smem>>
    %505 = vector.extract_strided_slice %502 {offsets = [0, 0], sizes = [1, 256], strides = [1, 1]} : vector<2x256xf32> to vector<1x256xf32>
    %506 = vector.broadcast %503 : f32 to vector<1x256xf32>
    %507 = arith.mulf %505, %506 : vector<1x256xf32>
    %508 = arith.addf %501, %507 : vector<1x256xf32>
    %509 = vector.extract_strided_slice %502 {offsets = [1, 0], sizes = [1, 256], strides = [1, 1]} : vector<2x256xf32> to vector<1x256xf32>
    %510 = vector.broadcast %504 : f32 to vector<1x256xf32>
    %511 = arith.mulf %509, %510 : vector<1x256xf32>
    %512 = arith.addf %508, %511 : vector<1x256xf32>
    %c0_106 = arith.constant 0 : index
    %c161 = arith.constant 161 : index
    %513 = vector.load %arg9[%c0_106, %c161] : memref<2x512xf32, #tpu.memory_space<vmem>>, vector<2x256xf32>
    %c39 = arith.constant 39 : index
    %514 = memref.load %arg6[%c39] : memref<98xf32, #tpu.memory_space<smem>>
    %c88 = arith.constant 88 : index
    %515 = memref.load %arg6[%c88] : memref<98xf32, #tpu.memory_space<smem>>
    %516 = vector.extract_strided_slice %513 {offsets = [0, 0], sizes = [1, 256], strides = [1, 1]} : vector<2x256xf32> to vector<1x256xf32>
    %517 = vector.broadcast %514 : f32 to vector<1x256xf32>
    %518 = arith.mulf %516, %517 : vector<1x256xf32>
    %519 = arith.addf %512, %518 : vector<1x256xf32>
    %520 = vector.extract_strided_slice %513 {offsets = [1, 0], sizes = [1, 256], strides = [1, 1]} : vector<2x256xf32> to vector<1x256xf32>
    %521 = vector.broadcast %515 : f32 to vector<1x256xf32>
    %522 = arith.mulf %520, %521 : vector<1x256xf32>
    %523 = arith.addf %519, %522 : vector<1x256xf32>
    %c0_107 = arith.constant 0 : index
    %c177 = arith.constant 177 : index
    %524 = vector.load %arg9[%c0_107, %c177] : memref<2x512xf32, #tpu.memory_space<vmem>>, vector<2x256xf32>
    %c46 = arith.constant 46 : index
    %525 = memref.load %arg6[%c46] : memref<98xf32, #tpu.memory_space<smem>>
    %c95_108 = arith.constant 95 : index
    %526 = memref.load %arg6[%c95_108] : memref<98xf32, #tpu.memory_space<smem>>
    %527 = vector.extract_strided_slice %524 {offsets = [0, 0], sizes = [1, 256], strides = [1, 1]} : vector<2x256xf32> to vector<1x256xf32>
    %528 = vector.broadcast %525 : f32 to vector<1x256xf32>
    %529 = arith.mulf %527, %528 : vector<1x256xf32>
    %530 = arith.addf %523, %529 : vector<1x256xf32>
    %531 = vector.extract_strided_slice %524 {offsets = [1, 0], sizes = [1, 256], strides = [1, 1]} : vector<2x256xf32> to vector<1x256xf32>
    %532 = vector.broadcast %526 : f32 to vector<1x256xf32>
    %533 = arith.mulf %531, %532 : vector<1x256xf32>
    %534 = arith.addf %530, %533 : vector<1x256xf32>
    %cst_109 = arith.constant 0.000000e+00 : f32
    %535 = vector.broadcast %cst_109 : f32 to vector<1x256xf32>
    %536 = arith.select %112, %534, %535 : vector<1x256xi1>, vector<1x256xf32>
    %537 = arith.addf %456, %536 : vector<1x256xf32>
    %cst_110 = arith.constant 0.000000e+00 : f32
    %538 = vector.broadcast %cst_110 : f32 to vector<1x256xf32>
    %c0_111 = arith.constant 0 : index
    %c82 = arith.constant 82 : index
    %539 = vector.load %arg9[%c0_111, %c82] : memref<2x512xf32, #tpu.memory_space<vmem>>, vector<2x256xf32>
    %c5 = arith.constant 5 : index
    %540 = memref.load %arg6[%c5] : memref<98xf32, #tpu.memory_space<smem>>
    %c54 = arith.constant 54 : index
    %541 = memref.load %arg6[%c54] : memref<98xf32, #tpu.memory_space<smem>>
    %542 = vector.extract_strided_slice %539 {offsets = [0, 0], sizes = [1, 256], strides = [1, 1]} : vector<2x256xf32> to vector<1x256xf32>
    %543 = vector.broadcast %540 : f32 to vector<1x256xf32>
    %544 = arith.mulf %542, %543 : vector<1x256xf32>
    %545 = arith.addf %538, %544 : vector<1x256xf32>
    %546 = vector.extract_strided_slice %539 {offsets = [1, 0], sizes = [1, 256], strides = [1, 1]} : vector<2x256xf32> to vector<1x256xf32>
    %547 = vector.broadcast %541 : f32 to vector<1x256xf32>
    %548 = arith.mulf %546, %547 : vector<1x256xf32>
    %549 = arith.addf %545, %548 : vector<1x256xf32>
    %c0_112 = arith.constant 0 : index
    %c98 = arith.constant 98 : index
    %550 = vector.load %arg9[%c0_112, %c98] : memref<2x512xf32, #tpu.memory_space<vmem>>, vector<2x256xf32>
    %c12 = arith.constant 12 : index
    %551 = memref.load %arg6[%c12] : memref<98xf32, #tpu.memory_space<smem>>
    %c61 = arith.constant 61 : index
    %552 = memref.load %arg6[%c61] : memref<98xf32, #tpu.memory_space<smem>>
    %553 = vector.extract_strided_slice %550 {offsets = [0, 0], sizes = [1, 256], strides = [1, 1]} : vector<2x256xf32> to vector<1x256xf32>
    %554 = vector.broadcast %551 : f32 to vector<1x256xf32>
    %555 = arith.mulf %553, %554 : vector<1x256xf32>
    %556 = arith.addf %549, %555 : vector<1x256xf32>
    %557 = vector.extract_strided_slice %550 {offsets = [1, 0], sizes = [1, 256], strides = [1, 1]} : vector<2x256xf32> to vector<1x256xf32>
    %558 = vector.broadcast %552 : f32 to vector<1x256xf32>
    %559 = arith.mulf %557, %558 : vector<1x256xf32>
    %560 = arith.addf %556, %559 : vector<1x256xf32>
    %c0_113 = arith.constant 0 : index
    %c114 = arith.constant 114 : index
    %561 = vector.load %arg9[%c0_113, %c114] : memref<2x512xf32, #tpu.memory_space<vmem>>, vector<2x256xf32>
    %c19 = arith.constant 19 : index
    %562 = memref.load %arg6[%c19] : memref<98xf32, #tpu.memory_space<smem>>
    %c68 = arith.constant 68 : index
    %563 = memref.load %arg6[%c68] : memref<98xf32, #tpu.memory_space<smem>>
    %564 = vector.extract_strided_slice %561 {offsets = [0, 0], sizes = [1, 256], strides = [1, 1]} : vector<2x256xf32> to vector<1x256xf32>
    %565 = vector.broadcast %562 : f32 to vector<1x256xf32>
    %566 = arith.mulf %564, %565 : vector<1x256xf32>
    %567 = arith.addf %560, %566 : vector<1x256xf32>
    %568 = vector.extract_strided_slice %561 {offsets = [1, 0], sizes = [1, 256], strides = [1, 1]} : vector<2x256xf32> to vector<1x256xf32>
    %569 = vector.broadcast %563 : f32 to vector<1x256xf32>
    %570 = arith.mulf %568, %569 : vector<1x256xf32>
    %571 = arith.addf %567, %570 : vector<1x256xf32>
    %c0_114 = arith.constant 0 : index
    %c130 = arith.constant 130 : index
    %572 = vector.load %arg9[%c0_114, %c130] : memref<2x512xf32, #tpu.memory_space<vmem>>, vector<2x256xf32>
    %c26 = arith.constant 26 : index
    %573 = memref.load %arg6[%c26] : memref<98xf32, #tpu.memory_space<smem>>
    %c75 = arith.constant 75 : index
    %574 = memref.load %arg6[%c75] : memref<98xf32, #tpu.memory_space<smem>>
    %575 = vector.extract_strided_slice %572 {offsets = [0, 0], sizes = [1, 256], strides = [1, 1]} : vector<2x256xf32> to vector<1x256xf32>
    %576 = vector.broadcast %573 : f32 to vector<1x256xf32>
    %577 = arith.mulf %575, %576 : vector<1x256xf32>
    %578 = arith.addf %571, %577 : vector<1x256xf32>
    %579 = vector.extract_strided_slice %572 {offsets = [1, 0], sizes = [1, 256], strides = [1, 1]} : vector<2x256xf32> to vector<1x256xf32>
    %580 = vector.broadcast %574 : f32 to vector<1x256xf32>
    %581 = arith.mulf %579, %580 : vector<1x256xf32>
    %582 = arith.addf %578, %581 : vector<1x256xf32>
    %c0_115 = arith.constant 0 : index
    %c146 = arith.constant 146 : index
    %583 = vector.load %arg9[%c0_115, %c146] : memref<2x512xf32, #tpu.memory_space<vmem>>, vector<2x256xf32>
    %c33 = arith.constant 33 : index
    %584 = memref.load %arg6[%c33] : memref<98xf32, #tpu.memory_space<smem>>
    %c82_116 = arith.constant 82 : index
    %585 = memref.load %arg6[%c82_116] : memref<98xf32, #tpu.memory_space<smem>>
    %586 = vector.extract_strided_slice %583 {offsets = [0, 0], sizes = [1, 256], strides = [1, 1]} : vector<2x256xf32> to vector<1x256xf32>
    %587 = vector.broadcast %584 : f32 to vector<1x256xf32>
    %588 = arith.mulf %586, %587 : vector<1x256xf32>
    %589 = arith.addf %582, %588 : vector<1x256xf32>
    %590 = vector.extract_strided_slice %583 {offsets = [1, 0], sizes = [1, 256], strides = [1, 1]} : vector<2x256xf32> to vector<1x256xf32>
    %591 = vector.broadcast %585 : f32 to vector<1x256xf32>
    %592 = arith.mulf %590, %591 : vector<1x256xf32>
    %593 = arith.addf %589, %592 : vector<1x256xf32>
    %c0_117 = arith.constant 0 : index
    %c162 = arith.constant 162 : index
    %594 = vector.load %arg9[%c0_117, %c162] : memref<2x512xf32, #tpu.memory_space<vmem>>, vector<2x256xf32>
    %c40 = arith.constant 40 : index
    %595 = memref.load %arg6[%c40] : memref<98xf32, #tpu.memory_space<smem>>
    %c89 = arith.constant 89 : index
    %596 = memref.load %arg6[%c89] : memref<98xf32, #tpu.memory_space<smem>>
    %597 = vector.extract_strided_slice %594 {offsets = [0, 0], sizes = [1, 256], strides = [1, 1]} : vector<2x256xf32> to vector<1x256xf32>
    %598 = vector.broadcast %595 : f32 to vector<1x256xf32>
    %599 = arith.mulf %597, %598 : vector<1x256xf32>
    %600 = arith.addf %593, %599 : vector<1x256xf32>
    %601 = vector.extract_strided_slice %594 {offsets = [1, 0], sizes = [1, 256], strides = [1, 1]} : vector<2x256xf32> to vector<1x256xf32>
    %602 = vector.broadcast %596 : f32 to vector<1x256xf32>
    %603 = arith.mulf %601, %602 : vector<1x256xf32>
    %604 = arith.addf %600, %603 : vector<1x256xf32>
    %c0_118 = arith.constant 0 : index
    %c178 = arith.constant 178 : index
    %605 = vector.load %arg9[%c0_118, %c178] : memref<2x512xf32, #tpu.memory_space<vmem>>, vector<2x256xf32>
    %c47 = arith.constant 47 : index
    %606 = memref.load %arg6[%c47] : memref<98xf32, #tpu.memory_space<smem>>
    %c96_119 = arith.constant 96 : index
    %607 = memref.load %arg6[%c96_119] : memref<98xf32, #tpu.memory_space<smem>>
    %608 = vector.extract_strided_slice %605 {offsets = [0, 0], sizes = [1, 256], strides = [1, 1]} : vector<2x256xf32> to vector<1x256xf32>
    %609 = vector.broadcast %606 : f32 to vector<1x256xf32>
    %610 = arith.mulf %608, %609 : vector<1x256xf32>
    %611 = arith.addf %604, %610 : vector<1x256xf32>
    %612 = vector.extract_strided_slice %605 {offsets = [1, 0], sizes = [1, 256], strides = [1, 1]} : vector<2x256xf32> to vector<1x256xf32>
    %613 = vector.broadcast %607 : f32 to vector<1x256xf32>
    %614 = arith.mulf %612, %613 : vector<1x256xf32>
    %615 = arith.addf %611, %614 : vector<1x256xf32>
    %cst_120 = arith.constant 0.000000e+00 : f32
    %616 = vector.broadcast %cst_120 : f32 to vector<1x256xf32>
    %617 = arith.select %121, %615, %616 : vector<1x256xi1>, vector<1x256xf32>
    %618 = arith.addf %537, %617 : vector<1x256xf32>
    %cst_121 = arith.constant 0.000000e+00 : f32
    %619 = vector.broadcast %cst_121 : f32 to vector<1x256xf32>
    %c0_122 = arith.constant 0 : index
    %c83 = arith.constant 83 : index
    %620 = vector.load %arg9[%c0_122, %c83] : memref<2x512xf32, #tpu.memory_space<vmem>>, vector<2x256xf32>
    %c6 = arith.constant 6 : index
    %621 = memref.load %arg6[%c6] : memref<98xf32, #tpu.memory_space<smem>>
    %c55 = arith.constant 55 : index
    %622 = memref.load %arg6[%c55] : memref<98xf32, #tpu.memory_space<smem>>
    %623 = vector.extract_strided_slice %620 {offsets = [0, 0], sizes = [1, 256], strides = [1, 1]} : vector<2x256xf32> to vector<1x256xf32>
    %624 = vector.broadcast %621 : f32 to vector<1x256xf32>
    %625 = arith.mulf %623, %624 : vector<1x256xf32>
    %626 = arith.addf %619, %625 : vector<1x256xf32>
    %627 = vector.extract_strided_slice %620 {offsets = [1, 0], sizes = [1, 256], strides = [1, 1]} : vector<2x256xf32> to vector<1x256xf32>
    %628 = vector.broadcast %622 : f32 to vector<1x256xf32>
    %629 = arith.mulf %627, %628 : vector<1x256xf32>
    %630 = arith.addf %626, %629 : vector<1x256xf32>
    %c0_123 = arith.constant 0 : index
    %c99 = arith.constant 99 : index
    %631 = vector.load %arg9[%c0_123, %c99] : memref<2x512xf32, #tpu.memory_space<vmem>>, vector<2x256xf32>
    %c13 = arith.constant 13 : index
    %632 = memref.load %arg6[%c13] : memref<98xf32, #tpu.memory_space<smem>>
    %c62 = arith.constant 62 : index
    %633 = memref.load %arg6[%c62] : memref<98xf32, #tpu.memory_space<smem>>
    %634 = vector.extract_strided_slice %631 {offsets = [0, 0], sizes = [1, 256], strides = [1, 1]} : vector<2x256xf32> to vector<1x256xf32>
    %635 = vector.broadcast %632 : f32 to vector<1x256xf32>
    %636 = arith.mulf %634, %635 : vector<1x256xf32>
    %637 = arith.addf %630, %636 : vector<1x256xf32>
    %638 = vector.extract_strided_slice %631 {offsets = [1, 0], sizes = [1, 256], strides = [1, 1]} : vector<2x256xf32> to vector<1x256xf32>
    %639 = vector.broadcast %633 : f32 to vector<1x256xf32>
    %640 = arith.mulf %638, %639 : vector<1x256xf32>
    %641 = arith.addf %637, %640 : vector<1x256xf32>
    %c0_124 = arith.constant 0 : index
    %c115 = arith.constant 115 : index
    %642 = vector.load %arg9[%c0_124, %c115] : memref<2x512xf32, #tpu.memory_space<vmem>>, vector<2x256xf32>
    %c20 = arith.constant 20 : index
    %643 = memref.load %arg6[%c20] : memref<98xf32, #tpu.memory_space<smem>>
    %c69 = arith.constant 69 : index
    %644 = memref.load %arg6[%c69] : memref<98xf32, #tpu.memory_space<smem>>
    %645 = vector.extract_strided_slice %642 {offsets = [0, 0], sizes = [1, 256], strides = [1, 1]} : vector<2x256xf32> to vector<1x256xf32>
    %646 = vector.broadcast %643 : f32 to vector<1x256xf32>
    %647 = arith.mulf %645, %646 : vector<1x256xf32>
    %648 = arith.addf %641, %647 : vector<1x256xf32>
    %649 = vector.extract_strided_slice %642 {offsets = [1, 0], sizes = [1, 256], strides = [1, 1]} : vector<2x256xf32> to vector<1x256xf32>
    %650 = vector.broadcast %644 : f32 to vector<1x256xf32>
    %651 = arith.mulf %649, %650 : vector<1x256xf32>
    %652 = arith.addf %648, %651 : vector<1x256xf32>
    %c0_125 = arith.constant 0 : index
    %c131 = arith.constant 131 : index
    %653 = vector.load %arg9[%c0_125, %c131] : memref<2x512xf32, #tpu.memory_space<vmem>>, vector<2x256xf32>
    %c27 = arith.constant 27 : index
    %654 = memref.load %arg6[%c27] : memref<98xf32, #tpu.memory_space<smem>>
    %c76 = arith.constant 76 : index
    %655 = memref.load %arg6[%c76] : memref<98xf32, #tpu.memory_space<smem>>
    %656 = vector.extract_strided_slice %653 {offsets = [0, 0], sizes = [1, 256], strides = [1, 1]} : vector<2x256xf32> to vector<1x256xf32>
    %657 = vector.broadcast %654 : f32 to vector<1x256xf32>
    %658 = arith.mulf %656, %657 : vector<1x256xf32>
    %659 = arith.addf %652, %658 : vector<1x256xf32>
    %660 = vector.extract_strided_slice %653 {offsets = [1, 0], sizes = [1, 256], strides = [1, 1]} : vector<2x256xf32> to vector<1x256xf32>
    %661 = vector.broadcast %655 : f32 to vector<1x256xf32>
    %662 = arith.mulf %660, %661 : vector<1x256xf32>
    %663 = arith.addf %659, %662 : vector<1x256xf32>
    %c0_126 = arith.constant 0 : index
    %c147 = arith.constant 147 : index
    %664 = vector.load %arg9[%c0_126, %c147] : memref<2x512xf32, #tpu.memory_space<vmem>>, vector<2x256xf32>
    %c34 = arith.constant 34 : index
    %665 = memref.load %arg6[%c34] : memref<98xf32, #tpu.memory_space<smem>>
    %c83_127 = arith.constant 83 : index
    %666 = memref.load %arg6[%c83_127] : memref<98xf32, #tpu.memory_space<smem>>
    %667 = vector.extract_strided_slice %664 {offsets = [0, 0], sizes = [1, 256], strides = [1, 1]} : vector<2x256xf32> to vector<1x256xf32>
    %668 = vector.broadcast %665 : f32 to vector<1x256xf32>
    %669 = arith.mulf %667, %668 : vector<1x256xf32>
    %670 = arith.addf %663, %669 : vector<1x256xf32>
    %671 = vector.extract_strided_slice %664 {offsets = [1, 0], sizes = [1, 256], strides = [1, 1]} : vector<2x256xf32> to vector<1x256xf32>
    %672 = vector.broadcast %666 : f32 to vector<1x256xf32>
    %673 = arith.mulf %671, %672 : vector<1x256xf32>
    %674 = arith.addf %670, %673 : vector<1x256xf32>
    %c0_128 = arith.constant 0 : index
    %c163 = arith.constant 163 : index
    %675 = vector.load %arg9[%c0_128, %c163] : memref<2x512xf32, #tpu.memory_space<vmem>>, vector<2x256xf32>
    %c41 = arith.constant 41 : index
    %676 = memref.load %arg6[%c41] : memref<98xf32, #tpu.memory_space<smem>>
    %c90 = arith.constant 90 : index
    %677 = memref.load %arg6[%c90] : memref<98xf32, #tpu.memory_space<smem>>
    %678 = vector.extract_strided_slice %675 {offsets = [0, 0], sizes = [1, 256], strides = [1, 1]} : vector<2x256xf32> to vector<1x256xf32>
    %679 = vector.broadcast %676 : f32 to vector<1x256xf32>
    %680 = arith.mulf %678, %679 : vector<1x256xf32>
    %681 = arith.addf %674, %680 : vector<1x256xf32>
    %682 = vector.extract_strided_slice %675 {offsets = [1, 0], sizes = [1, 256], strides = [1, 1]} : vector<2x256xf32> to vector<1x256xf32>
    %683 = vector.broadcast %677 : f32 to vector<1x256xf32>
    %684 = arith.mulf %682, %683 : vector<1x256xf32>
    %685 = arith.addf %681, %684 : vector<1x256xf32>
    %c0_129 = arith.constant 0 : index
    %c179 = arith.constant 179 : index
    %686 = vector.load %arg9[%c0_129, %c179] : memref<2x512xf32, #tpu.memory_space<vmem>>, vector<2x256xf32>
    %c48 = arith.constant 48 : index
    %687 = memref.load %arg6[%c48] : memref<98xf32, #tpu.memory_space<smem>>
    %c97_130 = arith.constant 97 : index
    %688 = memref.load %arg6[%c97_130] : memref<98xf32, #tpu.memory_space<smem>>
    %689 = vector.extract_strided_slice %686 {offsets = [0, 0], sizes = [1, 256], strides = [1, 1]} : vector<2x256xf32> to vector<1x256xf32>
    %690 = vector.broadcast %687 : f32 to vector<1x256xf32>
    %691 = arith.mulf %689, %690 : vector<1x256xf32>
    %692 = arith.addf %685, %691 : vector<1x256xf32>
    %693 = vector.extract_strided_slice %686 {offsets = [1, 0], sizes = [1, 256], strides = [1, 1]} : vector<2x256xf32> to vector<1x256xf32>
    %694 = vector.broadcast %688 : f32 to vector<1x256xf32>
    %695 = arith.mulf %693, %694 : vector<1x256xf32>
    %696 = arith.addf %692, %695 : vector<1x256xf32>
    %cst_131 = arith.constant 0.000000e+00 : f32
    %697 = vector.broadcast %cst_131 : f32 to vector<1x256xf32>
    %698 = arith.select %130, %696, %697 : vector<1x256xi1>, vector<1x256xf32>
    %699 = arith.addf %618, %698 : vector<1x256xf32>
    %700 = arith.negf %699 : vector<1x256xf32>
    %701 = math.exp %700 : vector<1x256xf32>
    %cst_132 = arith.constant 1.000000e+00 : f32
    %702 = vector.broadcast %cst_132 : f32 to vector<1x256xf32>
    %703 = arith.addf %702, %701 : vector<1x256xf32>
    %704 = arith.divf %702, %703 : vector<1x256xf32>
    %705 = vector.broadcast %704 : vector<1x256xf32> to vector<32x256xf32>
    %706 = arith.mulf %40, %705 : vector<32x256xf32>
    %c0_133 = arith.constant 0 : index
    %c0_134 = arith.constant 0 : index
    %c0_135 = arith.constant 0 : index
    %707 = vector.load %arg8[%c0_133, %c0_134, %c0_135] : memref<1x32x256xf32, #tpu.memory_space<vmem>>, vector<1x32x256xf32>
    %708 = vector.shape_cast %707 : vector<1x32x256xf32> to vector<32x256xf32>
    %709 = vector.shape_cast %706 : vector<32x256xf32> to vector<1x32x256xf32>
    tpu.vector_store %arg8[%c0_133, %c0_134, %c0_135], %709 {strides = array<i32>} : memref<1x32x256xf32, #tpu.memory_space<vmem>>, vector<1x32x256xf32>,
    return
  }
  func.func @transform_0(%arg0: i32) -> (i32, i32, i32) {
    %c0_i32 = arith.constant 0 : i32
    %c0_i32_0 = arith.constant 0 : i32
    %c0_i32_1 = arith.constant 0 : i32
    return %arg0, %c0_i32, %c0_i32_0 : i32, i32, i32
  }
  func.func @transform_1(%arg0: i32) -> (i32, i32) {
    %c0_i32 = arith.constant 0 : i32
    %c0_i32_0 = arith.constant 0 : i32
    %c0_i32_1 = arith.constant 0 : i32
    return %c0_i32, %c0_i32_0 : i32, i32
  }
  func.func @transform_2(%arg0: i32) -> (i32, i32) {
    %c0_i32 = arith.constant 0 : i32
    %c0_i32_0 = arith.constant 0 : i32
    %c0_i32_1 = arith.constant 0 : i32
    return %c0_i32, %c0_i32_0 : i32, i32
  }
  func.func @transform_3(%arg0: i32) -> (i32, i32) {
    %c0_i32 = arith.constant 0 : i32
    %c0_i32_0 = arith.constant 0 : i32
    %c0_i32_1 = arith.constant 0 : i32
    return %c0_i32, %c0_i32_0 : i32, i32
  }
  func.func @transform_4(%arg0: i32) -> (i32, i32) {
    %c0_i32 = arith.constant 0 : i32
    %c0_i32_0 = arith.constant 0 : i32
    %c0_i32_1 = arith.constant 0 : i32
    return %c0_i32, %c0_i32_0 : i32, i32
  }
  func.func @transform_5(%arg0: i32) -> i32 {
    %c0_i32 = arith.constant 0 : i32
    %c0_i32_0 = arith.constant 0 : i32
    return %c0_i32 : i32
  }
  func.func @transform_6(%arg0: i32) -> i32 {
    %c0_i32 = arith.constant 0 : i32
    %c0_i32_0 = arith.constant 0 : i32
    return %c0_i32 : i32
  }
  func.func @transform_7(%arg0: i32) -> (i32, i32, i32) {
    %c0_i32 = arith.constant 0 : i32
    %c0_i32_0 = arith.constant 0 : i32
    %c0_i32_1 = arith.constant 0 : i32
    return %arg0, %c0_i32, %c0_i32_0 : i32, i32, i32
  }
}

</mosaic_0001>

<bundles_post_ra>
// kernel: cbam_forward.1
= control target key start
LH: loop header
LB: loop body
LE: loop exit
PB: predicated region body
PF: predicated region fallthrough
CT: control target
= control target key end

     0   :  { %s3036_s0 = inlined_call_operand.vmem [shape: f32[2,32,256], index: 0, kind: input, shape index: {}, may-alias: {0,7}]   ;;  %s3037_s1 = inlined_call_operand.vmem [shape: f32[32,2], index: 1, kind: input, shape index: {}]   ;;  %s3038_s2 = inlined_call_operand.vmem [shape: f32[1,2], index: 2, kind: input, shape index: {}]   ;;  %s3039_s3 = inlined_call_operand.vmem [shape: f32[32,2], index: 3, kind: input, shape index: {}]   ;;  %s3040_s4 = inlined_call_operand.vmem [shape: f32[32,1], index: 4, kind: input, shape index: {}]   ;;  %s3041_s5 = inlined_call_operand.vmem [shape: f32[98], index: 5, kind: input, shape index: {}]   ;;  %s3042_s6 = inlined_call_operand.<no memory space> [shape: f32[1], index: 6, kind: input, shape index: {}]   ;;  %s3043_s7 = inlined_call_operand.vmem [shape: f32[2,32,256], index: 7, kind: output, shape index: {}, may-alias: {0,7}]  }
   0x1   :  { %12 = sst [smem:[#allocation3]] %s3042_s6 }
   0x2   :  { %13 = vsyncpa [#allocation5], 0  ;;  %s2259_s26 = smov 0  }
   0x3 LB: > { %s1939_s27 = sadd.s32 4294967295, %s2197_s26   ;;  %p1941_p0 = scmp.ge.s32.totalorder %s2197_s26, 1  ;;  %s2197_s26 = sphi %s2259_s26, %s19_s26  }
   0x4   : > { %p202_p1 = scmp.lt.s32.totalorder %s2197_s26, 3  ;;  %s226_s30 = sshll.u32 %s3041_s5, 4  ;;  %s227_s30 = int_to_ptr.vmem [resolvable:$true] %s226_s30 }
   0x5   : > { %p2114_p3 = scmp.eq.s32.totalorder %s1939_s27, 0  ;;  %s2199_s6 = smov [#allocation4]  }
   0x6   : > { %p203_p2 = pnand %p1941_p0, %p202_p1 }
   0x8   : > { %p2110_p4 = pneg %p203_p2  ;;  %250 = sbr.rel (%p203_p2) target bundleno = 997 (0x3e5), region = 48 }
   0xa   : > { %p2111_p5 = pnand %p2114_p3, %p2110_p4 }
   0xc   : > { %2113 = dma.vmem_to_smem (!%p2111_p5), %s227_s30, 16, %s2199_s6, [#allocation5]  }
   0xd   : > { %2192 = dma.done.wait (%p2114_p3), [#allocation5], 16  }
   0xe   : > { %2194 = vsyncadd (%p2114_p3), [#allocation5], 4294967280 }
   0xf   : > { %257 = sfence }
  0x10   : > { %p284_p6 = scmp.lt.s32.totalorder %s1939_s27, 1  ;;  %v2200_v16 = vmov 256.0   ;;  %v337_v27 = vld [vmem:[%s3037_s1] sm:$0xff]  ;;  %v338_v29 = vld [vmem:[%s3037_s1 + $0x8] sm:$0xff]  ;;  %v339_v32 = vld [vmem:[%s3037_s1 + $0x10] sm:$0xff]  ;;  %vm354_vm1 = vcmask 15360  }
  0x11   : > { %2144 = vrcp.f32 %v2200_v16  ;;  %v340_v37 = vld [vmem:[%s3037_s1 + $0x18] sm:$0xff]  ;;  %s1965_s17 = sld [smem:[#allocation4 + $0x1c]]  ;;  %s2204_s23 = smov 64  }
  0x12   : > { %s3068_s27 = smov (!%p284_p6, %s1939_s27), 1  ;;  %s1962_s18 = sld [smem:[#allocation4 + $0x15]] }
  0x13   : > { %s2104_s8 = sshll.u32 %s3068_s27, 6  ;;  %s1956_s19 = sld [smem:[#allocation4 + $0x7]] }
  0x14   : > { %s288_s11 = scalar_lea.vmem %s3036_s0, %s2104_s8  ;;  %s1977_s20 = sld [smem:[#allocation4 + $0x8]] }
  0x15   : > { %v2278_v0 = vld [vmem:[%s288_s11] sm:$0xff]  ;;  %v2280_v1 = vld [vmem:[%s288_s11 + $0x8] sm:$0xff]  ;;  %v2292_v7 = vld [vmem:[%s288_s11 + $0x10] sm:$0xff]  ;;  %s1971_s21 = sld [smem:[#allocation4 + $0x2a]]  ;;  %s2205_s24 = smov 80  }
  0x16   : > { %v2282_v2 = vld [vmem:[%s288_s11 + $0x20] sm:$0xff]  ;;  %v325_v3 = vmax.f32 %v2278_v0, %v2280_v1  ;;  %v302_v4 = vadd.f32 %v2280_v1, %v2278_v0  ;;  %v2288_v5 = vld [vmem:[%s288_s11 + $0x28] sm:$0xff]  ;;  %v2294_v8 = vld [vmem:[%s288_s11 + $0x18] sm:$0xff]  ;;  %s1959_s22 = sld [smem:[#allocation4 + $0xe]]  ;;  %s2206_s25 = smov 112  }
  0x17   : > { %v308_v6 = vadd.f32 %v2288_v5, %v2282_v2  ;;  %v2296_v9 = vld [vmem:[%s288_s11 + $0x30] sm:$0xff]  ;;  %v2298_v10 = vld [vmem:[%s288_s11 + $0x38] sm:$0xff]  ;;  %v328_v11 = vmax.f32 %v2292_v7, %v2294_v8  ;;  %v305_v12 = vadd.f32 %v2294_v8, %v2292_v7  ;;  %v331_v14 = vmax.f32 %v2282_v2, %v2288_v5  ;;  %v2145_v17 = vpop.eup %2144  ;;  %s1986_s28 = sld [smem:[#allocation4 + $0x1d]]  ;;  %s2207_s6 = smov 32  }
  0x18   : > { %326 = vmax.xlane.f32.xlu2 %v325_v3  ;;  %303 = vadd.xlane.f32.xlu0 %v302_v4  ;;  %v311_v13 = vadd.f32 %v2298_v10, %v2296_v9  ;;  %v334_v15 = vmax.f32 %v2296_v9, %v2298_v10  ;;  %v315_v18 = vmul.f32 256.0, %v2145_v17  ;;  %vm319_vm0 = vweird.f32 %v2145_v17  ;;  %s1983_s29 = sld [smem:[#allocation4 + $0x16]]  ;;  %s2208_s9 = smov 96  }
  0x19   : > { %309 = vadd.xlane.f32.xlu1 %v308_v6  ;;  %s1968_s30 = sld [smem:[#allocation4 + $0x23]]  ;;  %s2209_s13 = smov 48  }
  0x1a   : > { %v316_v19 = vsub.f32 1.0, %v315_v18  ;;  %s1998_s10 = sld [smem:[#allocation4 + $0x9]] }
  0x1b   : > { %s1992_s11 = sld [smem:[#allocation4 + $0x2b]] }
  0x1c   : > { %v317_v20 = vmul.f32 %v2145_v17, %v316_v19  ;;  %s1980_s12 = sld [smem:[#allocation4 + $0xf]] }
  0x1d   : > { %s2007_s14 = sld [smem:[#allocation4 + $0x1e]] }
  0x1e   : > { %v318_v21 = vadd.f32 %v2145_v17, %v317_v20  ;;  %s2004_s15 = sld [smem:[#allocation4 + $0x17]] }
  0x1f   : > { %s1989_s16 = sld [smem:[#allocation4 + $0x24]] }
  0x20   : > { %329 = vmax.xlane.f32.xlu2 %v328_v11  ;;  %306 = vadd.xlane.f32.xlu0 %v305_v12  ;;  %v320_v25 = vsel %vm319_vm0, %v2145_v17, %v318_v21 }
  0x21   : > { %312 = vadd.xlane.f32.xlu1 %v311_v13 }
  0x28   : > { %332 = vmax.xlane.f32.xlu0 %v331_v14 }
  0x29   : > { %335 = vmax.xlane.f32.xlu1 %v334_v15  ;;  %v341_v15 = vld [vmem:[%s3038_s2] sm:$0x1] }
  0x8b   : > { %v327_v22 = vpop.xlane.xlu2 %326  ;;  %v304_v23 = vpop.xlane.xlu0 %303 }
  0x8c   : > { %v310_v24 = vpop.xlane.xlu1 %309  ;;  %v321_v26 = vmul.f32 %v320_v25, %v304_v23  ;;  %v369_v41 = vmul.f32 %v337_v27, %v327_v22  ;;  %v344_v23 = vld [vmem:[%s3039_s3 + $0x10] sm:$0xff] }
  0x8d   : > { %v323_v28 = vmul.f32 %v320_v25, %v310_v24  ;;  %v343_v24 = vld [vmem:[%s3039_s3 + $0x8] sm:$0xff] }
  0x8e   : > { %v350_v33 = vmul.f32 %v337_v27, %v321_v26  ;;  %v373_v50 = vsel %vm354_vm1, %v369_v41, 0.0 }
  0x8f   : > { %v352_v40 = vmul.f32 %v339_v32, %v323_v28 }
  0x90   : > { %v355_v42 = vsel %vm354_vm1, %v350_v33, 0.0  ;;  %v345_v33 = vld [vmem:[%s3039_s3 + $0x18] sm:$0xff] }
  0x91   : > { %v358_v47 = vsel %vm354_vm1, %v352_v40, 0.0 }
  0x93   : > { %v330_v30 = vpop.xlane.xlu2 %329  ;;  %v307_v31 = vpop.xlane.xlu0 %306 }
  0x94   : > { %v322_v34 = vmul.f32 %v320_v25, %v307_v31  ;;  %v313_v35 = vpop.xlane.xlu1 %312  ;;  %v370_v38 = vmul.f32 %v338_v29, %v330_v30 }
  0x95   : > { %v324_v36 = vmul.f32 %v320_v25, %v313_v35  ;;  %v342_v25 = vld [vmem:[%s3039_s3] sm:$0xff] }
  0x96   : > { %v351_v39 = vmul.f32 %v338_v29, %v322_v34  ;;  %v374_v46 = vsel %vm354_vm1, %v370_v38, 0.0  ;;  %v346_v38 = vld [vmem:[%s3040_s4] sm:$0xff] }
  0x97   : > { %v353_v44 = vmul.f32 %v340_v37, %v324_v36  ;;  %v375_v54 = vadd.f32 %v374_v46, %v373_v50  ;;  %v348_v36 = vld [vmem:[%s3040_s4 + $0x10] sm:$0xff] }
  0x98   : > { %v356_v43 = vsel %vm354_vm1, %v351_v39, 0.0  ;;  %v2201_v39 = vmov 0   ;;  %v409_v40 = vmul.f32 2.0, %v348_v36 }
  0x99   : > { %v357_v45 = vadd.f32 %v356_v43, %v355_v42  ;;  %v360_v52 = vsel %vm354_vm1, %v353_v44, 0.0  ;;  %2143 = vset.pattern.permute.xlu2 %v2201_v39  ;;  %2142 = vset.pattern.permute.xlu1 %v2201_v39  ;;  %v407_v42 = vmul.f32 2.0, %v346_v38 }
  0x9a   : > { %2141 = vset.pattern.permute.xlu0 %v2201_v39 }
  0x9b   : > { %v359_v48 = vadd.f32 %v358_v47, %v357_v45  ;;  %v333_v49 = vpop.xlane.xlu0 %332 }
  0x9c   : > { %v371_v51 = vmul.f32 %v339_v32, %v333_v49  ;;  %v336_v53 = vpop.xlane.xlu1 %335 }
  0x9d   : > { %v361_v55 = vadd.f32 %v360_v52, %v359_v48  ;;  %v372_v56 = vmul.f32 %v340_v37, %v336_v53  ;;  %v347_v37 = vld [vmem:[%s3040_s4 + $0x8] sm:$0xff] }
  0x9e   : > { %v376_v57 = vsel %vm354_vm1, %v371_v51, 0.0  ;;  %v408_v41 = vmul.f32 2.0, %v347_v37  ;;  %v349_v51 = vld [vmem:[%s3040_s4 + $0x18] sm:$0xff] }
  0x9f   : > { %v377_v58 = vadd.f32 %v376_v57, %v375_v54  ;;  %v362_v59 = vrot.slane %v361_v55, 4  ;;  %v378_v60 = vsel %vm354_vm1, %v372_v56, 0.0  ;;  %v410_v53 = vmul.f32 2.0, %v349_v51 }
  0xa0   : > { %v2203_v51 = vmov 32.0  }
  0xa1   : > { %v363_v61 = vadd.f32 %v362_v59, %v361_v55  ;;  %v379_v62 = vadd.f32 %v378_v60, %v377_v58 }
  0xa3   : > { %v364_v63 = vrot.slane %v363_v61, 2  ;;  %v380_v3 = vrot.slane %v379_v62, 4 }
  0xa5   : > { %v365_v4 = vadd.f32 %v364_v63, %v363_v61  ;;  %v381_v6 = vadd.f32 %v380_v3, %v379_v62 }
  0xa7   : > { %v366_v11 = vrot.slane %v365_v4, 1  ;;  %v382_v12 = vrot.slane %v381_v6, 2 }
  0xa9   : > { %v367_v13 = vadd.f32 %v366_v11, %v365_v4  ;;  %v383_v14 = vadd.f32 %v382_v12, %v381_v6 }
  0xab   : > { %v384_v16 = vrot.slane %v383_v14, 1  ;;  %v368_v18 = vadd.f32 %v367_v13, %v341_v15 }
  0xad   : > { %v385_v17 = vadd.f32 %v384_v16, %v383_v14  ;;  %v387_v21 = vmax.f32 %v368_v18, 0.0 }
  0xaf   : > { %v386_v19 = vadd.f32 %v385_v17, %v341_v15 }
  0xb1   : > { %v388_v20 = vmax.f32 %v386_v19, 0.0 }
  0xb3   : > { %v389_v22 = vadd.f32 %v388_v20, %v387_v21 }
  0xb5   : > { %v390_v26 = vperm.slane %v389_v22, 0 }
  0xb7   : > { %v393_v27 = vmul.f32 %v390_v26, %v344_v23  ;;  %v392_v28 = vmul.f32 %v390_v26, %v343_v24  ;;  %v391_v29 = vmul.f32 %v390_v26, %v342_v25  ;;  %v394_v34 = vmul.f32 %v390_v26, %v345_v33 }
  0xb9   : > { %v401_v30 = vsel %vm354_vm1, %v393_v27, 0.0  ;;  %v398_v31 = vsel %vm354_vm1, %v392_v28, 0.0  ;;  %v395_v32 = vsel %vm354_vm1, %v391_v29, 0.0  ;;  %v404_v35 = vsel %vm354_vm1, %v394_v34, 0.0 }
  0xba   : > { %402 = vadd.xlane.f32.xlu1 %v401_v30  ;;  %399 = vadd.xlane.f32.xlu0 %v398_v31 }
  0xbb   : > { %396 = vadd.xlane.f32.xlu2 %v395_v32 }
  0xc3   : > { %405 = vadd.xlane.f32.xlu2 %v404_v35 }
 0x12d   : > { %v403_v43 = vpop.xlane.xlu1 %402  ;;  %v400_v44 = vpop.xlane.xlu0 %399 }
 0x12e   : > { %v413_v45 = vadd.f32 %v409_v40, %v403_v43  ;;  %v412_v46 = vadd.f32 %v408_v41, %v400_v44  ;;  %v397_v47 = vpop.xlane.xlu2 %396 }
 0x12f   : > { %v411_v48 = vadd.f32 %v407_v42, %v397_v47 }
 0x130   : > { %v1952_v49 = vmul.f32 -1.442695, %v413_v45  ;;  %v1951_v50 = vmul.f32 -1.442695, %v412_v46 }
 0x131   : > { %v1950_v52 = vmul.f32 -1.442695, %v411_v48 }
 0x132   : > { %2146 = vpow2.f32 %v1952_v49  ;;  %v2202_v49 = vmov 0.0  }
 0x133   : > { %2148 = vpow2.f32 %v1951_v50  ;;  %564 = vst [vmem:[#allocation2] sm:$0xff] %v2202_v49  ;;  %v728_v49 = vstv %s1962_s18  ;;  %s2013_s18 = sld [smem:[#allocation4 + $0x2c]] }
 0x134   : > { %2150 = vpow2.f32 %v1950_v52 }
 0x136   : > { %v406_v54 = vpop.xlane.xlu2 %405 }
 0x137   : > { %v414_v55 = vadd.f32 %v410_v53, %v406_v54 }
 0x138   : > { %v2147_v56 = vpop.eup %2146 }
 0x139   : > { %v2149_v57 = vpop.eup %2148  ;;  %v429_v58 = vadd.f32 1.0, %v2147_v56  ;;  %v1953_v61 = vmul.f32 -1.442695, %v414_v55 }
 0x13a   : > { %v2151_v59 = vpop.eup %2150  ;;  %v428_v60 = vadd.f32 1.0, %v2149_v57 }
 0x13b   : > { %2152 = vrcp.f32 %v429_v58  ;;  %v427_v62 = vadd.f32 1.0, %v2151_v59  ;;  %vm466_vm2 = vweird.f32 %v429_v58  ;;  %v470_v14 = vand.u32 2147483647, %v429_v58 }
 0x13c   : > { %2154 = vrcp.f32 %v428_v60  ;;  %v455_v18 = vand.u32 2147483647, %v428_v60  ;;  %v472_v19 = vand.u32 2147483648, %v429_v58  ;;  %v457_v20 = vand.u32 2147483648, %v428_v60 }
 0x13d   : > { %2156 = vrcp.f32 %v427_v62  ;;  %v442_v24 = vand.u32 2147483648, %v427_v62  ;;  %v440_v27 = vand.u32 2147483647, %v427_v62  ;;  %vm451_vm6 = vweird.f32 %v428_v60 }
 0x13e   : > { %2158 = vpow2.f32 %v1953_v61  ;;  %vm471_vm8 = vcmp.eq.f32.partialorder %v470_v14, 8.507059e+37  ;;  %v473_v29 = vor.u32 1.1754944e-38, %v472_v19  ;;  %v458_v30 = vor.u32 1.1754944e-38, %v457_v20 }
 0x13f   : > { %vm436_vm10 = vweird.f32 %v427_v62  ;;  %vm456_vm11 = vcmp.eq.f32.partialorder %v455_v18, 8.507059e+37  ;;  %v443_v35 = vor.u32 1.1754944e-38, %v442_v24  ;;  %vm441_vm13 = vcmp.eq.f32.partialorder %v440_v27, 8.507059e+37 }
 0x141   : > { %v2153_v63 = vpop.eup %2152 }
 0x142   : > { %v2155_v3 = vpop.eup %2154  ;;  %v462_v4 = vmul.f32 %v2153_v63, %v429_v58  ;;  %vm467_vm3 = vweird.f32 %v2153_v63 }
 0x143   : > { %v2157_v6 = vpop.eup %2156  ;;  %v447_v11 = vmul.f32 %v2155_v3, %v428_v60  ;;  %vm452_vm4 = vweird.f32 %v2155_v3  ;;  %vm468_vm7 = vmor %vm466_vm2, %vm467_vm3  ;;  %vm568_vm3 = vcmask 1040384  }
 0x144   : > { %v2159_v12 = vpop.eup %2158  ;;  %v463_v13 = vsub.f32 1.0, %v462_v4  ;;  %v432_v15 = vmul.f32 %v2157_v6, %v427_v62  ;;  %vm437_vm5 = vweird.f32 %v2157_v6  ;;  %vm453_vm9 = vmor %vm451_vm6, %vm452_vm4  ;;  %vm711_vm6 = vcmask 785408  }
 0x145   : > { %v430_v16 = vadd.f32 1.0, %v2159_v12  ;;  %v448_v17 = vsub.f32 1.0, %v447_v11  ;;  %vm438_vm12 = vmor %vm436_vm10, %vm437_vm5  ;;  %vm688_vm5 = vcmask 916480   ;;  %vm804_vm10 = vcmask 261120  }
 0x146   : > { %v464_v21 = vmul.f32 %v2153_v63, %v463_v13  ;;  %v433_v22 = vsub.f32 1.0, %v432_v15 }
 0x147   : > { %2160 = vrcp.f32 %v430_v16  ;;  %v449_v23 = vmul.f32 %v2155_v3, %v448_v17  ;;  %v487_v42 = vand.u32 2147483648, %v430_v16  ;;  %v485_v44 = vand.u32 2147483647, %v430_v16 }
 0x148   : > { %v465_v25 = vadd.f32 %v2153_v63, %v464_v21  ;;  %v434_v26 = vmul.f32 %v2157_v6, %v433_v22  ;;  %vm481_vm15 = vweird.f32 %v430_v16  ;;  %2162 = vrcp.f32 %v2203_v51 }
 0x149   : > { %v450_v28 = vadd.f32 %v2155_v3, %v449_v23  ;;  %v488_v46 = vor.u32 1.1754944e-38, %v487_v42  ;;  %vm486_vm1 = vcmp.eq.f32.partialorder %v485_v44, 8.507059e+37 }
 0x14a   : > { %v469_v31 = vsel %vm468_vm7, %v2153_v63, %v465_v25  ;;  %v435_v32 = vadd.f32 %v2157_v6, %v434_v26  ;;  %vm734_vm7 = vcmask 654336  }
 0x14b   : > { %v454_v33 = vsel %vm453_vm9, %v2155_v3, %v450_v28  ;;  %v474_v34 = vsel %vm471_vm8, %v473_v29, %v469_v31  ;;  %vm758_vm8 = vcmask 523264   ;;  %vm781_vm9 = vcmask 392192  }
 0x14c   : > { %v459_v36 = vsel %vm456_vm11, %v458_v30, %v454_v33  ;;  %503 = vperm.xlu2 %2143, %v474_v34   ;;  %v439_v37 = vsel %vm438_vm12, %v2157_v6, %v435_v32  ;;  %v3044_v30 = vlaneseq  ;;  %vm829_vm11 = vcmask 416768  }
 0x14d   : > { %v2161_v38 = vpop.eup %2160  ;;  %498 = vperm.xlu1 %2142, %v459_v36   ;;  %v444_v39 = vsel %vm441_vm13, %v443_v35, %v439_v37  ;;  %vm992_vm12 = vcmask 408576  }
 0x14e   : > { %493 = vperm.xlu0 %2141, %v444_v39   ;;  %v477_v40 = vmul.f32 %v2161_v38, %v430_v16  ;;  %vm482_vm14 = vweird.f32 %v2161_v38  ;;  %v2163_v53 = vpop.eup %2162  ;;  %vm573_vm4 = vcmp.lt.s32.totalorder %v3044_v30, 256 }
 0x14f   : > { %vm483_vm0 = vmor %vm481_vm15, %vm482_vm14  ;;  %vm542_vm2 = vweird.f32 %v2163_v53  ;;  %vm1155_vm14 = vcmask 400384  }
 0x150   : > { %v478_v41 = vsub.f32 1.0, %v477_v40 }
 0x152   : > { %v479_v43 = vmul.f32 %v2161_v38, %v478_v41 }
 0x154   : > { %v480_v45 = vadd.f32 %v2161_v38, %v479_v43 }
 0x156   : > { %v484_v47 = vsel %vm483_vm0, %v2161_v38, %v480_v45 }
 0x157   : > { %v489_v48 = vsel %vm486_vm1, %v488_v46, %v484_v47  ;;  %vm1481_vm1 = vcmask 384000  }
 0x158   : > { %508 = vperm.xlu2 %2143, %v489_v48   ;;  %v752_v48 = vstv %s1965_s17  ;;  %s2019_s17 = sld [smem:[#allocation4 + $0xa]] }
 0x1a6   : > { %v504_v50 = vpop.permute.xlu2 %503 }
 0x1a7   : > { %v2376_v60 = vmul.f32 %v504_v50, %v2282_v2  ;;  %v2379_v61 = vmul.f32 %v504_v50, %v2288_v5  ;;  %v682_v50 = vstv %s1956_s19  ;;  %s2001_s19 = sld [smem:[#allocation4 + $0x10]] }
 0x1a9   : > { %3056 = vst [vmem:[#allocation11_spill] sm:$0xff] %v2376_v60 }
 0x1aa   : > { %3057 = vst [vmem:[#allocation12_spill] sm:$0xff] %v2379_v61 }
 0x1b2   : > { %v509_v52 = vpop.permute.xlu2 %508 }
 0x1b3   : > { %v2364_v55 = vmul.f32 %v509_v52, %v2296_v9  ;;  %v2367_v56 = vmul.f32 %v509_v52, %v2298_v10  ;;  %v538_v10 = vmul.f32 32.0, %v2163_v53 }
 0x1b5   : > { %3052 = vst [vmem:[#allocation7_spill] sm:$0xff] %v2364_v55  ;;  %v539_v11 = vsub.f32 1.0, %v538_v10  ;;  %v705_v10 = vstv %s1959_s22  ;;  %s2010_s22 = sld [smem:[#allocation4 + $0x25]] }
 0x1b6   : > { %3053 = vst [vmem:[#allocation8_spill] sm:$0xff] %v2367_v56 }
 0x1b7   : > { %v540_v20 = vmul.f32 %v2163_v53, %v539_v11 }
 0x1b9   : > { %v541_v29 = vadd.f32 %v2163_v53, %v540_v20  ;;  %v940_v20 = vstv %s1989_s16  ;;  %s2040_s16 = sld [smem:[#allocation4 + $0xb]] }
 0x1bb   : > { %v543_v38 = vsel %vm542_vm2, %v2163_v53, %v541_v29 }
 0x1bf   : > { %v499_v54 = vpop.permute.xlu1 %498 }
 0x1c0   : > { %v2370_v57 = vmul.f32 %v499_v54, %v2292_v7  ;;  %v2373_v58 = vmul.f32 %v499_v54, %v2294_v8  ;;  %v494_v59 = vpop.permute.xlu0 %493 }
 0x1c1   : > { %v2382_v62 = vmul.f32 %v494_v59, %v2278_v0  ;;  %v2385_v9 = vmul.f32 %v494_v59, %v2280_v1 }
 0x1c2   : > { %3054 = vst [vmem:[#allocation9_spill] sm:$0xff] %v2370_v57  ;;  %v547_v7 = vmax.f32 %v2370_v57, %v2364_v55  ;;  %v556_v8 = vmax.f32 %v2373_v58, %v2367_v56 }
 0x1c3   : > { %3055 = vst [vmem:[#allocation10_spill] sm:$0xff] %v2373_v58  ;;  %v519_v2 = vadd.f32 %v2370_v57, %v2382_v62  ;;  %v528_v5 = vadd.f32 %v2373_v58, %v2385_v9  ;;  %v546_v0 = vmax.f32 %v2382_v62, %v2376_v60  ;;  %v555_v1 = vmax.f32 %v2385_v9, %v2379_v61 }
 0x1c4   : > { %3058 = vst [vmem:[#allocation13_spill] sm:$0xff] %v2382_v62 }
 0x1c5   : > { %v520_v63 = vadd.f32 %v519_v2, %v2376_v60  ;;  %v529_v3 = vadd.f32 %v528_v5, %v2379_v61  ;;  %v548_v4 = vmax.f32 %v546_v0, %v547_v7  ;;  %v557_v6 = vmax.f32 %v555_v1, %v556_v8 }
 0x1c6   : > { %v852_v7 = vstv %s1977_s20  ;;  %v798_v8 = vstv %s1971_s21  ;;  %v918_v1 = vstv %s1986_s28  ;;  %s2028_s20 = sld [smem:[#allocation4 + $0x1f]] }
 0x1c7   : > { %v521_v12 = vadd.f32 %v520_v63, %v2364_v55  ;;  %v530_v13 = vadd.f32 %v529_v3, %v2367_v56  ;;  %v549_v14 = vrot.slane %v548_v4, 4  ;;  %v558_v15 = vrot.slane %v557_v6, 4  ;;  %s2025_s21 = sld [smem:[#allocation4 + $0x18]] }
 0x1c8   : > { %v896_v63 = vstv %s1983_s29  ;;  %v775_v3 = vstv %s1968_s30  ;;  %s2064_s28 = sld [smem:[#allocation4 + $0x13]] }
 0x1c9   : > { %v522_v16 = vrot.slane %v521_v12, 4  ;;  %v531_v17 = vrot.slane %v530_v13, 4  ;;  %v550_v18 = vmax.f32 %v548_v4, %v549_v14  ;;  %v559_v19 = vmax.f32 %v557_v6, %v558_v15  ;;  %s2034_s29 = sld [smem:[#allocation4 + $0x2d]] }
 0x1ca   : > { %v874_v14 = vstv %s1980_s12  ;;  %s2022_s30 = sld [smem:[#allocation4 + $0x11]] }
 0x1cb   : > { %v523_v21 = vadd.f32 %v522_v16, %v521_v12  ;;  %v532_v22 = vadd.f32 %v531_v17, %v530_v13  ;;  %v551_v23 = vrot.slane %v550_v18, 2  ;;  %v560_v24 = vrot.slane %v559_v19, 2  ;;  %s2031_s12 = sld [smem:[#allocation4 + $0x26]] }
 0x1cc   : > { %v1015_v12 = vstv %s1998_s10  ;;  %v962_v13 = vstv %s1992_s11  ;;  %s2067_s10 = sld [smem:[#allocation4 + $0x1a]] }
 0x1cd   : > { %v524_v25 = vrot.slane %v523_v21, 2  ;;  %v533_v26 = vrot.slane %v532_v22, 2  ;;  %v552_v27 = vmax.f32 %v550_v18, %v551_v23  ;;  %v561_v28 = vmax.f32 %v559_v19, %v560_v24  ;;  %s2061_s11 = sld [smem:[#allocation4 + $0xc]] }
 0x1ce   : > { %v1081_v18 = vstv %s2007_s14  ;;  %v1059_v19 = vstv %s2004_s15  ;;  %v1178_v24 = vstv %s2019_s17  ;;  %s2070_s14 = sld [smem:[#allocation4 + $0x21]] }
 0x1cf   : > { %v525_v31 = vadd.f32 %v524_v25, %v523_v21  ;;  %v534_v32 = vadd.f32 %v533_v26, %v532_v22  ;;  %v553_v33 = vrot.slane %v552_v27, 1  ;;  %v562_v34 = vrot.slane %v561_v28, 1  ;;  %s2082_s15 = sld [smem:[#allocation4 + $0xd]] }
 0x1d0   : > { %v1125_v25 = vstv %s2013_s18  ;;  %v1037_v26 = vstv %s2001_s19  ;;  %s2073_s17 = sld [smem:[#allocation4 + $0x28]] }
 0x1d1   : > { %v526_v35 = vrot.slane %v525_v31, 1  ;;  %v535_v36 = vrot.slane %v534_v32, 1  ;;  %v563_v37 = vmax.f32 %v561_v28, %v562_v34  ;;  %v554_v41 = vmax.f32 %v552_v27, %v553_v33  ;;  %s2085_s18 = sld [smem:[#allocation4 + $0x14]] }
 0x1d2   : > { %v1223_v33 = vstv %s2025_s21  ;;  %v1103_v34 = vstv %s2010_s22  ;;  %s2043_s19 = sld [smem:[#allocation4 + $0x12]] }
 0x1d3   : > { %v527_v39 = vadd.f32 %v526_v35, %v525_v31  ;;  %v536_v40 = vadd.f32 %v535_v36, %v534_v32  ;;  %v579_v42 = vrot.slane %v563_v37, 7  ;;  %v1245_v31 = vstv %s2028_s20  ;;  %s1960_s20 = sld [smem:[#allocation4 + $0x3f]] }
 0x1d4   : > { %s2088_s21 = sld [smem:[#allocation4 + $0x1b]] }
 0x1d5   : > { %v545_v43 = vmul.f32 %v543_v38, %v536_v40  ;;  %v580_v44 = vsel %vm568_vm3, %v554_v41, %v579_v42  ;;  %v544_v45 = vmul.f32 %v543_v38, %v527_v39  ;;  %v1526_v38 = vstv %s2064_s28  ;;  %s2046_s22 = sld [smem:[#allocation4 + $0x19]] }
 0x1d6   : > { %583 = vst.msk [vmem:[#allocation2 + $0x3] ss:$2 sm:$0x3] %vm573_vm4, %v580_v44  ;;  %v1289_v39 = vstv %s2034_s29  ;;  %v1200_v40 = vstv %s2022_s30  ;;  %v1548_v44 = vstv %s2067_s10  ;;  %s1969_s28 = sld [smem:[#allocation4 + $0x54]] }
 0x1d7   : > { %v567_v46 = vrot.slane %v545_v43, 7  ;;  %s2091_s29 = sld [smem:[#allocation4 + $0x22]] }
 0x1d8   : > { %s2049_s30 = sld [smem:[#allocation4 + $0x20]] }
 0x1d9   : > { %v569_v47 = vsel %vm568_vm3, %v544_v45, %v567_v46  ;;  %v1504_v45 = vstv %s2061_s11  ;;  %v1267_v46 = vstv %s2031_s12  ;;  %s1981_s10 = sld [smem:[#allocation4 + $0x40]]  ;;  %vm1644_vm3 = vcmask 375808  }
 0x1da   : > { %576 = vst.msk [vmem:[#allocation2 + $0x2] ss:$2 sm:$0x3] %vm573_vm4, %v569_v47  ;;  %s2094_s11 = sld [smem:[#allocation4 + $0x29]] }
 0x1db   : > { %s2052_s12 = sld [smem:[#allocation4 + $0x27]] }
 0x1e1   : > { %v2404_v51 = vld [vmem:[#allocation2] sm:$0x3f] }
 0x1e2   : > { %v2406_v52 = vld [vmem:[#allocation2 + $0x2] sm:$0x3f]  ;;  %v729_v54 = vmul.f32 %v728_v49, %v2404_v51  ;;  %v683_v59 = vmul.f32 %v682_v50, %v2404_v51  ;;  %v853_v2 = vmul.f32 %v852_v7, %v2404_v51  ;;  %v706_v0 = vmul.f32 %v705_v10, %v2404_v51 }
 0x1e3   : > { %v753_v53 = vmul.f32 %v752_v48, %v2406_v52  ;;  %v799_v5 = vmul.f32 %v798_v8, %v2406_v52  ;;  %v919_v4 = vmul.f32 %v918_v1, %v2406_v52  ;;  %v897_v6 = vmul.f32 %v896_v63, %v2404_v51  ;;  %v2444_v32 = vld [vmem:[#allocation2 + $0x2] sm:$0xf] }
 0x1e4   : > { %731 = vrot.lane.b32.xlu2 %v729_v54, %s2205_s24  ;;  %685 = vrot.lane.b32.xlu1 %v683_v59, %s2206_s25  ;;  %v776_v11 = vmul.f32 %v775_v3, %v2406_v52  ;;  %v1016_v15 = vmul.f32 %v1015_v12, %v2404_v51  ;;  %v963_v16 = vmul.f32 %v962_v13, %v2406_v52  ;;  %v1570_v50 = vstv %s2070_s14  ;;  %s1990_s14 = sld [smem:[#allocation4 + $0x55]] }
 0x1e5   : > { %755 = vrot.lane.b32.xlu0 %v753_v53, %s2204_s23  ;;  %v875_v17 = vmul.f32 %v874_v14, %v2404_v51  ;;  %v1082_v21 = vmul.f32 %v1081_v18, %v2406_v52  ;;  %v1060_v22 = vmul.f32 %v1059_v19, %v2404_v51  ;;  %v941_v23 = vmul.f32 %v940_v20, %v2406_v52 }
 0x1e6   : > { %v1179_v27 = vmul.f32 %v1178_v24, %v2404_v51  ;;  %v1126_v28 = vmul.f32 %v1125_v25, %v2406_v52  ;;  %v1038_v29 = vmul.f32 %v1037_v26, %v2404_v51  ;;  %v1246_v35 = vmul.f32 %v1245_v31, %v2406_v52 }
 0x1e7   : > { %v1224_v36 = vmul.f32 %v1223_v33, %v2444_v32  ;;  %v1104_v37 = vmul.f32 %v1103_v34, %v2406_v52  ;;  %v1527_v41 = vmul.f32 %v1526_v38, %v2404_v51  ;;  %v1290_v42 = vmul.f32 %v1289_v39, %v2406_v52 }
 0x1e8   : > { %v1201_v43 = vmul.f32 %v1200_v40, %v2404_v51  ;;  %v1549_v47 = vmul.f32 %v1548_v44, %v2406_v52  ;;  %v1505_v48 = vmul.f32 %v1504_v45, %v2404_v51  ;;  %v1268_v49 = vmul.f32 %v1267_v46, %v2406_v52 }
 0x1e9   : > { %v1667_v53 = vstv %s2082_s15  ;;  %v1341_v54 = vstv %s2040_s16  ;;  %v1571_v59 = vmul.f32 %v1570_v50, %v2406_v52  ;;  %v1592_v10 = vstv %s2073_s17  ;;  %s1954_s15 = sld [smem:[#allocation4 + $0x31]] }
 0x1ea   : > { %v1668_v7 = vmul.f32 %v1667_v53, %v2404_v51  ;;  %v1342_v8 = vmul.f32 %v1341_v54, %v2404_v51  ;;  %v715_v3 = vstv %s1960_s20  ;;  %v1733_v18 = vstv %s2091_s29  ;;  %s2076_s16 = sld [smem:[#allocation4 + $0x2f]] }
 0x1eb   : > { %v1407_v19 = vstv %s2049_s30  ;;  %v1734_v20 = vmul.f32 %v1733_v18, %v2406_v52  ;;  %v1755_v26 = vstv %s2094_s11  ;;  %s2055_s17 = sld [smem:[#allocation4 + $0x2e]]  ;;  %v949_v33 = vstv %s1990_s14 }
 0x1ec   : > { %801 = vrot.lane.b32.xlu2 %v799_v5, %s2207_s6  ;;  %708 = vrot.lane.b32.xlu1 %v706_v0, %s2208_s9  ;;  %v1363_v5 = vstv %s2043_s19  ;;  %v1593_v0 = vmul.f32 %v1592_v10, %v2406_v52  ;;  %s2002_s19 = sld [smem:[#allocation4 + $0x41]] }
 0x1ed   : > { %855 = vrot.lane.b32.xlu0 %v853_v2, %s2206_s25  ;;  %v1689_v2 = vstv %s2085_s18  ;;  %v1364_v63 = vmul.f32 %v1363_v5, %v2404_v51  ;;  %s2494_s18 = sld [smem:[#allocation4]] }
 0x1ee   : > { %v1690_v1 = vmul.f32 %v1689_v2, %v2404_v51  ;;  %s2499_s20 = sld [smem:[#allocation4 + $0x46]] }
 0x1ef   : > { %s2511_s29 = sld [smem:[#allocation4 + $0x56]] }
 0x1f0   : > { %s2514_s30 = sld [smem:[#allocation4 + $0x38]] }
 0x1f1   : > { %v1451_v38 = vstv %s2055_s17  ;;  %s2535_s11 = sld [smem:[#allocation4 + $0x42]] }
 0x1f2   : > { %s2546_s14 = sld [smem:[#allocation4 + $0x47]] }
 0x1f3   : > { %v670_v44 = vstv %s2494_s18  ;;  %s2564_s17 = sld [smem:[#allocation4 + $0x57]] }
 0x1f4   : > { %899 = vrot.lane.b32.xlu2 %v897_v6, %s2205_s24  ;;  %778 = vrot.lane.b32.xlu1 %v776_v11, %s2209_s13  ;;  %v1711_v6 = vstv %s2088_s21  ;;  %v1385_v11 = vstv %s2046_s22  ;;  %s2502_s21 = sld [smem:[#allocation4 + $0x32]]  ;;  %v671_v54 = vmul.f32 %v670_v44, %v2404_v51 }
 0x1f5   : > { %921 = vrot.lane.b32.xlu0 %v919_v4, %s2204_s23  ;;  %v716_v4 = vmul.f32 %v715_v3, %v2404_v51  ;;  %v1712_v12 = vmul.f32 %v1711_v6, %v2406_v52  ;;  %v1386_v14 = vmul.f32 %v1385_v11, %v2406_v52  ;;  %s2097_s22 = sld [smem:[#allocation4 + $0x30]]  ;;  %v738_v45 = vstv %s2499_s20 }
 0x1f6   : > { %v1112_v6 = vstv %s2511_s29  ;;  %v692_v11 = vstv %s2514_s30  ;;  %s2568_s18 = sld [smem:[#allocation4 + $0x39]] }
 0x1f7   : > { %v1961_v13 = vrot.slane %v716_v4, 9  ;;  %v1113_v18 = vmul.f32 %v1112_v6, %v2406_v52  ;;  %s2587_s20 = sld [smem:[#allocation4 + $0x3c]] }
 0x1f8   : > { %s2602_s29 = sld [smem:[#allocation4 + $0x36]] }
 0x1f9   : > { %s2612_s30 = sld [smem:[#allocation4 + $0x3]] }
 0x1fc   : > { %965 = vrot.lane.b32.xlu2 %v963_v16, %s2207_s6  ;;  %877 = vrot.lane.b32.xlu1 %v875_v17, %s2208_s9 }
 0x1fd   : > { %1018 = vrot.lane.b32.xlu0 %v1016_v15, %s2206_s25  ;;  %v785_v15 = vstv %s1969_s28  ;;  %s2508_s28 = sld [smem:[#allocation4 + $0x1]] }
 0x1fe   : > { %v786_v17 = vmul.f32 %v785_v15, %v2406_v52 }
 0x204   : > { %1062 = vrot.lane.b32.xlu2 %v1060_v22, %s2205_s24  ;;  %943 = vrot.lane.b32.xlu1 %v941_v23, %s2209_s13  ;;  %v1408_v22 = vmul.f32 %v1407_v19, %v2406_v52  ;;  %v883_v23 = vstv %s1981_s10  ;;  %s2520_s10 = sld [smem:[#allocation4 + $0x5b]]  ;;  %v693_v19 = vmul.f32 %v692_v11, %v2404_v51 }
 0x205   : > { %1084 = vrot.lane.b32.xlu0 %v1082_v21, %s2204_s23  ;;  %v1970_v21 = vrot.slane %v786_v17, 9  ;;  %v884_v25 = vmul.f32 %v883_v23, %v2404_v51 }
 0x20c   : > { %1128 = vrot.lane.b32.xlu2 %v1126_v28, %s2207_s6  ;;  %1040 = vrot.lane.b32.xlu1 %v1038_v29, %s2208_s9  ;;  %v1756_v28 = vmul.f32 %v1755_v26, %v2406_v52  ;;  %v1982_v29 = vrot.slane %v884_v25, 9 }
 0x20d   : > { %1181 = vrot.lane.b32.xlu0 %v1179_v27, %s2206_s25  ;;  %v1429_v27 = vstv %s2052_s12  ;;  %s2541_s12 = sld [smem:[#allocation4 + $0x4d]] }
 0x20e   : > { %v1430_v31 = vmul.f32 %v1429_v27, %v2406_v52  ;;  %v2012_v27 = vrot.slane %v1113_v18, 9 }
 0x214   : > { %1226 = vrot.lane.b32.xlu2 %v1224_v36, %s2205_s24  ;;  %1106 = vrot.lane.b32.xlu1 %v1104_v37, %s2209_s13  ;;  %v673_v36 = vstv %s1954_s15  ;;  %v1614_v37 = vstv %s2076_s16  ;;  %s2549_s15 = sld [smem:[#allocation4 + $0x33]] }
 0x215   : > { %1248 = vrot.lane.b32.xlu0 %v1246_v35, %s2204_s23  ;;  %v950_v35 = vmul.f32 %v949_v33, %v2406_v52  ;;  %v674_v39 = vmul.f32 %v673_v36, %v2404_v51  ;;  %v1615_v40 = vmul.f32 %v1614_v37, %v2406_v52  ;;  %s2560_s16 = sld [smem:[#allocation4 + $0x2]]  ;;  %v762_v33 = vstv %s2541_s12 }
 0x216   : > { %s2623_s12 = sld [smem:[#allocation4 + $0x3a]] }
 0x217   : > { %v1955_v46 = vrot.slane %v674_v39, 9 }
 0x219   : > { %v679_v2 = vadd.f32 %v1955_v46, %v671_v54 }
 0x21a   : > { %v1006_v36 = vstv %s2549_s15  ;;  %s2633_s15 = sld [smem:[#allocation4 + $0x37]] }
 0x21c   : > { %1292 = vrot.lane.b32.xlu2 %v1290_v42, %s2207_s6  ;;  %1203 = vrot.lane.b32.xlu1 %v1201_v43, %s2208_s9  ;;  %v1452_v42 = vmul.f32 %v1451_v38, %v2406_v52  ;;  %v1046_v43 = vstv %s2002_s19  ;;  %s2573_s19 = sld [smem:[#allocation4 + $0x5c]] }
 0x21d   : > { %1529 = vrot.lane.b32.xlu0 %v1527_v41, %s2208_s9  ;;  %v1991_v41 = vrot.slane %v950_v35, 9  ;;  %v1047_v50 = vmul.f32 %v1046_v43, %v2404_v51  ;;  %v905_v35 = vstv %s2546_s14  ;;  %v1007_v43 = vmul.f32 %v1006_v36, %v2404_v51  ;;  %s2628_s14 = sld [smem:[#allocation4 + $0x5d]] }
 0x21f   : > { %v1997_v54 = vrot.slane %v1007_v43, 9 }
 0x224   : > { %1507 = vrot.lane.b32.xlu2 %v1505_v48, %s2206_s25  ;;  %1270 = vrot.lane.b32.xlu1 %v1268_v49, %s2209_s13 }
 0x225   : > { %1551 = vrot.lane.b32.xlu0 %v1549_v47, %s2205_s24  ;;  %v843_v47 = vstv %s2502_s21  ;;  %s2589_s21 = sld [smem:[#allocation4 + $0x4e]] }
 0x226   : > { %v844_v10 = vmul.f32 %v843_v47, %v2404_v51  ;;  %v1003_v47 = vstv %s2560_s16  ;;  %s2646_s16 = sld [smem:[#allocation4 + $0x6]] }
 0x22b   : > { %v927_v18 = vstv %s2589_s21  ;;  %s2682_s21 = sld [smem:[#allocation4 + $0x3b]] }
 0x22c   : > { %1670 = vrot.lane.b32.xlu2 %v1668_v7, %s2206_s25  ;;  %1344 = vrot.lane.b32.xlu1 %v1342_v8, %s2206_s25  ;;  %v739_v7 = vmul.f32 %v738_v45, %v2404_v51 }
 0x22d   : > { %1573 = vrot.lane.b32.xlu0 %v1571_v59, %s2204_s23  ;;  %v1777_v59 = vstv %s2097_s22  ;;  %s2594_s22 = sld [smem:[#allocation4 + $0x48]] }
 0x22e   : > { %v1964_v4 = vrot.slane %v739_v7, 9  ;;  %v1004_v7 = vmul.f32 %v1003_v47, %v2404_v51 }
 0x234   : > { %1692 = vrot.lane.b32.xlu2 %v1690_v1, %s2208_s9  ;;  %1366 = vrot.lane.b32.xlu1 %v1364_v63, %s2208_s9  ;;  %v2003_v1 = vrot.slane %v1047_v50, 9  ;;  %v840_v63 = vstv %s2508_s28  ;;  %v1276_v50 = vstv %s2564_s17  ;;  %s2599_s28 = sld [smem:[#allocation4 + $0x34]] }
 0x235   : > { %1595 = vrot.lane.b32.xlu0 %v1593_v0, %s2209_s13  ;;  %v1778_v0 = vmul.f32 %v1777_v59, %v2406_v52  ;;  %v841_v15 = vmul.f32 %v840_v63, %v2404_v51  ;;  %v971_v59 = vstv %s2573_s19  ;;  %s2649_s17 = sld [smem:[#allocation4 + $0x44]] }
 0x236   : > { %v972_v63 = vmul.f32 %v971_v59, %v2406_v52  ;;  %s2659_s19 = sld [smem:[#allocation4 + $0x49]] }
 0x23c   : > { %1714 = vrot.lane.b32.xlu2 %v1712_v12, %s2205_s24  ;;  %1388 = vrot.lane.b32.xlu1 %v1386_v14, %s2205_s24  ;;  %v1976_v12 = vrot.slane %v844_v10, 9 }
 0x23d   : > { %720 = vrot.lane.b32.xlu0 %v1961_v13, %s2208_s9  ;;  %v808_v13 = vstv %s2520_s10  ;;  %s2615_s10 = sld [smem:[#allocation4 + $0x5]] }
 0x23e   : > { %v2482_v16 = vpop.permute.xlu2 %731  ;;  %v849_v23 = vadd.f32 %v1976_v12, %v841_v15  ;;  %v1350_v15 = vstv %s2587_s20  ;;  %s2677_s20 = sld [smem:[#allocation4 + $0x4b]] }
 0x243   : > { %v1492_v43 = vstv %s2615_s10  ;;  %s2038_s10 = sld [smem:[#allocation4 + $0x35]] }
 0x244   : > { %1736 = vrot.lane.b32.xlu2 %v1734_v20, %s2204_s23  ;;  %1410 = vrot.lane.b32.xlu1 %v1408_v22, %s2204_s23  ;;  %v809_v22 = vmul.f32 %v808_v13, %v2406_v52 }
 0x245   : > { %790 = vrot.lane.b32.xlu0 %v1970_v21, %s2209_s13 }
 0x246   : > { %v2490_v24 = vpop.permute.xlu2 %801 }
 0x24c   : > { %1758 = vrot.lane.b32.xlu2 %v1756_v28, %s2209_s13  ;;  %1432 = vrot.lane.b32.xlu1 %v1430_v31, %s2209_s13  ;;  %v1958_v28 = vrot.slane %v693_v19, 9  ;;  %v1209_v31 = vstv %s2535_s11  ;;  %s2619_s11 = sld [smem:[#allocation4 + $0x3d]]  ;;  %v1068_v19 = vstv %s2594_s22 }
 0x24d   : > { %888 = vrot.lane.b32.xlu0 %v1982_v29, %s2208_s9  ;;  %v1973_v29 = vrot.slane %v809_v22, 9  ;;  %v1210_v39 = vmul.f32 %v1209_v31, %v2404_v51  ;;  %v1495_v22 = vstv %s2602_s29  ;;  %v1069_v31 = vmul.f32 %v1068_v19, %v2404_v51  ;;  %s2687_s22 = sld [smem:[#allocation4 + $0x43]] }
 0x24e   : > { %v2504_v34 = vpop.permute.xlu2 %899  ;;  %s2029_s29 = sld [smem:[#allocation4 + $0x50]] }
 0x24f   : > { %v2024_v44 = vrot.slane %v1210_v39, 9 }
 0x254   : > { %1617 = vrot.lane.b32.xlu2 %v1615_v40, %s2207_s6  ;;  %1454 = vrot.lane.b32.xlu1 %v1452_v42, %s2207_s6  ;;  %v763_v40 = vmul.f32 %v762_v33, %v2406_v52  ;;  %v906_v42 = vmul.f32 %v905_v35, %v2404_v51  ;;  %v1496_v35 = vmul.f32 %v1495_v22, %v2404_v51 }
 0x255   : > { %954 = vrot.lane.b32.xlu0 %v1991_v41, %s2209_s13 }
 0x256   : > { %v2526_v49 = vpop.permute.xlu2 %965  ;;  %v686_v53 = vpop.permute.xlu1 %685  ;;  %v1967_v45 = vrot.slane %v763_v40, 9  ;;  %v1985_v46 = vrot.slane %v906_v42, 9  ;;  %v1166_v40 = vstv %s2612_s30  ;;  %v2006_v42 = vrot.slane %v1069_v31, 9  ;;  %s2047_s30 = sld [smem:[#allocation4 + $0x4a]] }
 0x257   : > { %v2524_v48 = vpop.permute.xlu0 %755  ;;  %v687_v8 = vrot.slane %v686_v53, 2  ;;  %v2060_v47 = vrot.slane %v1496_v35, 9  ;;  %v1655_v31 = vstv %s2646_s16  ;;  %s2738_s16 = sld [smem:[#allocation4 + $0x5f]] }
 0x259   : > { %v689_v5 = vsel %vm688_vm5, %v686_v53, %v687_v8  ;;  %v861_v53 = vstv %s2568_s18  ;;  %s2654_s18 = sld [smem:[#allocation4 + $0x4f]] }
 0x25a   : > { %v2537_v3 = vadd.f32 %v689_v5, %v679_v2  ;;  %v1277_v2 = vmul.f32 %v1276_v50, %v2406_v52  ;;  %v862_v5 = vmul.f32 %v861_v53, %v2404_v51  ;;  %v1134_v50 = vstv %s2628_s14  ;;  %s2723_s14 = sld [smem:[#allocation4 + $0x3e]] }
 0x25b   : > { %v1658_v53 = vstv %s2633_s15  ;;  %s2050_s15 = sld [smem:[#allocation4 + $0x51]] }
 0x25c   : > { %1780 = vrot.lane.b32.xlu2 %v1778_v0, %s2207_s6  ;;  %743 = vrot.lane.b32.xlu1 %v1964_v4, %s2205_s24  ;;  %v1012_v4 = vadd.f32 %v1997_v54, %v1004_v7  ;;  %v2033_v12 = vrot.slane %v1277_v2, 9  ;;  %v1979_v13 = vrot.slane %v862_v5, 9  ;;  %v1167_v54 = vmul.f32 %v1166_v40, %v2404_v51 }
 0x25d   : > { %1051 = vrot.lane.b32.xlu0 %v2003_v1, %s2208_s9  ;;  %v1493_v7 = vmul.f32 %v1492_v43, %v2404_v51 }
 0x25e   : > { %v2552_v17 = vpop.permute.xlu2 %1062  ;;  %v2556_v21 = vpop.permute.xlu1 %708 }
 0x25f   : > { %v856_v14 = vpop.permute.xlu0 %855  ;;  %v1090_v35 = vstv %s2654_s18  ;;  %s2747_s18 = sld [smem:[#allocation4 + $0x58]] }
 0x260   : > { %v857_v20 = vrot.slane %v856_v14, 2 }
 0x262   : > { %v858_v25 = vsel %vm688_vm5, %v856_v14, %v857_v20  ;;  %v1994_v14 = vrot.slane %v972_v63, 9  ;;  %v1169_v20 = vstv %s2599_s28  ;;  %s2701_s28 = sld [smem:[#allocation4 + $0x52]] }
 0x263   : > { %v2562_v26 = vadd.f32 %v858_v25, %v849_v23  ;;  %v1170_v33 = vmul.f32 %v1169_v20, %v2404_v51 }
 0x264   : > { %697 = vrot.lane.b32.xlu2 %v1958_v28, %s2206_s25  ;;  %813 = vrot.lane.b32.xlu1 %v1973_v29, %s2207_s6  ;;  %v928_v28 = vmul.f32 %v927_v18, %v2406_v52 }
 0x265   : > { %1117 = vrot.lane.b32.xlu0 %v2012_v27, %s2209_s13  ;;  %v1351_v27 = vmul.f32 %v1350_v15, %v2404_v51 }
 0x266   : > { %v2579_v38 = vpop.permute.xlu2 %1128  ;;  %v2583_v41 = vpop.permute.xlu1 %778  ;;  %v1988_v39 = vrot.slane %v928_v28, 9 }
 0x267   : > { %v2577_v37 = vpop.permute.xlu0 %921  ;;  %v2042_v36 = vrot.slane %v1351_v27, 9  ;;  %v780_v56 = vrot.slane %v2583_v41, 6 }
 0x26c   : > { %767 = vrot.lane.b32.xlu2 %v1967_v45, %s2204_s23  ;;  %910 = vrot.lane.b32.xlu1 %v1985_v46, %s2205_s24  ;;  %v1024_v45 = vstv %s2623_s12  ;;  %v2018_v46 = vrot.slane %v1170_v33, 9  ;;  %v1535_v33 = vstv %s2649_s17  ;;  %s2720_s12 = sld [smem:[#allocation4 + $0x59]] }
 0x26d   : > { %1214 = vrot.lane.b32.xlu0 %v2024_v44, %s2208_s9  ;;  %v1513_v44 = vstv %s2619_s11  ;;  %v1025_v5 = vmul.f32 %v1024_v45, %v2404_v51  ;;  %v1091_v45 = vmul.f32 %v1090_v35, %v2406_v52  ;;  %s2718_s11 = sld [smem:[#allocation4 + $0x4]] }
 0x26e   : > { %v2605_v10 = vpop.permute.xlu2 %1226  ;;  %v2609_v1 = vpop.permute.xlu1 %877  ;;  %v1514_v2 = vmul.f32 %v1513_v44, %v2404_v51  ;;  %v1536_v44 = vmul.f32 %v1535_v33, %v2404_v51  ;;  %v1394_v33 = vstv %s2047_s30  ;;  %s2742_s17 = sld [smem:[#allocation4 + $0x45]] }
 0x26f   : > { %v1019_v8 = vpop.permute.xlu0 %1018  ;;  %v2000_v27 = vrot.slane %v1025_v5, 9  ;;  %v1557_v5 = vstv %s2677_s20  ;;  %s2089_s20 = sld [smem:[#allocation4 + $0x4c]] }
 0x270   : > { %v1020_v0 = vrot.slane %v1019_v8, 2  ;;  %v2063_v22 = vrot.slane %v1514_v2, 9  ;;  %s2992_s30 = sld [smem:[#allocation3]] }
 0x272   : > { %v1021_v6 = vsel %vm688_vm5, %v1019_v8, %v1020_v0 }
 0x273   : > { %v2617_v11 = vadd.f32 %v1021_v6, %v1012_v4  ;;  %v1135_v6 = vmul.f32 %v1134_v50, %v2406_v52 }
 0x274   : > { %866 = vrot.lane.b32.xlu2 %v1979_v13, %s2206_s25  ;;  %976 = vrot.lane.b32.xlu1 %v1994_v14, %s2207_s6  ;;  %v1501_v13 = vadd.f32 %v2060_v47, %v1493_v7  ;;  %v1659_v14 = vmul.f32 %v1658_v53, %v2404_v51  ;;  %v2066_v7 = vrot.slane %v1536_v44, 9 }
 0x275   : > { %1281 = vrot.lane.b32.xlu0 %v2033_v12, %s2209_s13  ;;  %v1175_v12 = vadd.f32 %v2018_v46, %v1167_v54  ;;  %v2015_v28 = vrot.slane %v1135_v6, 9 }
 0x276   : > { %v2637_v25 = vpop.permute.xlu2 %1292  ;;  %v2641_v29 = vpop.permute.xlu1 %943 }
 0x277   : > { %v2635_v23 = vpop.permute.xlu0 %1084 }
 0x27c   : > { %932 = vrot.lane.b32.xlu2 %v1988_v39, %s2204_s23  ;;  %1073 = vrot.lane.b32.xlu1 %v2006_v42, %s2205_s24  ;;  %v1232_v39 = vstv %s2659_s19  ;;  %v1656_v42 = vmul.f32 %v1655_v31, %v2404_v51  ;;  %v1254_v31 = vstv %s2029_s29  ;;  %s2077_s19 = sld [smem:[#allocation4 + $0x60]]  ;;  %s2215_s29 = smov 45  }
 0x27d   : > { %1355 = vrot.lane.b32.xlu0 %v2042_v36, %s2206_s25  ;;  %v2081_v36 = vrot.slane %v1659_v14, 9  ;;  %v1233_v50 = vmul.f32 %v1232_v39, %v2444_v32 }
 0x27e   : > { %v1508_v8 = vpop.permute.xlu2 %1507  ;;  %v2667_v4 = vpop.permute.xlu1 %1040 }
 0x27f   : > { %v1182_v59 = vpop.permute.xlu0 %1181  ;;  %v1509_v63 = vrot.slane %v1508_v8, 2  ;;  %v1664_v53 = vadd.f32 %v2081_v36, %v1656_v42  ;;  %v2027_v2 = vrot.slane %v1233_v50, 9  ;;  %v1255_v42 = vmul.f32 %v1254_v31, %v2406_v52 }
 0x280   : > { %v1183_v0 = vrot.slane %v1182_v59, 2 }
 0x281   : > { %v1510_v18 = vsel %vm688_vm5, %v1508_v8, %v1509_v63  ;;  %v2009_v8 = vrot.slane %v1091_v45, 9  ;;  %v1372_v63 = vstv %s2687_s22  ;;  %v1395_v45 = vmul.f32 %v1394_v33, %v2406_v52  ;;  %s2095_s22 = sld [smem:[#allocation4 + $0x5a]] }
 0x282   : > { %v1184_v15 = vsel %vm688_vm5, %v1182_v59, %v1183_v0  ;;  %v2675_v20 = vadd.f32 %v1510_v18, %v1501_v13  ;;  %v1187_v0 = vstv %s2682_s21  ;;  %s2035_s21 = sld [smem:[#allocation4 + $0x5e]] }
 0x283   : > { %v2673_v19 = vadd.f32 %v1184_v15, %v1175_v12  ;;  %v1558_v12 = vmul.f32 %v1557_v5, %v2406_v52  ;;  %v1188_v13 = vmul.f32 %v1187_v0, %v2404_v51  ;;  %v1373_v15 = vmul.f32 %v1372_v63, %v2404_v51 }
 0x284   : > { %1029 = vrot.lane.b32.xlu2 %v2000_v27, %s2206_s25  ;;  %1139 = vrot.lane.b32.xlu1 %v2015_v28, %s2207_s6  ;;  %v1579_v28 = vstv %s2701_s28  ;;  %v1416_v5 = vstv %s2050_s15  ;;  %s2213_s28 = smov 47  }
 0x285   : > { %1518 = vrot.lane.b32.xlu0 %v2063_v22, %s2206_s25  ;;  %v2069_v18 = vrot.slane %v1558_v12, 9  ;;  %v2021_v22 = vrot.slane %v1188_v13, 9  ;;  %v2045_v27 = vrot.slane %v1373_v15, 9  ;;  %v1580_v39 = vmul.f32 %v1579_v28, %v2406_v52 }
 0x286   : > { %v1671_v43 = vpop.permute.xlu2 %1670  ;;  %v2695_v47 = vpop.permute.xlu1 %1106 }
 0x287   : > { %v2690_v40 = vpop.permute.xlu0 %1248  ;;  %v1672_v46 = vrot.slane %v1671_v43, 2  ;;  %v2072_v50 = vrot.slane %v1580_v39, 9 }
 0x289   : > { %v1673_v54 = vsel %vm688_vm5, %v1671_v43, %v1672_v46  ;;  %v1332_v43 = vstv %s2038_s10 }
 0x28a   : > { %v2699_v59 = vadd.f32 %v1673_v54, %v1664_v53  ;;  %v1333_v46 = vmul.f32 %v1332_v43, %v2404_v51  ;;  %v2030_v53 = vrot.slane %v1255_v42, 9  ;;  %v2048_v54 = vrot.slane %v1395_v45, 9 }
 0x28c   : > { %1095 = vrot.lane.b32.xlu2 %v2009_v8, %s2204_s23  ;;  %1237 = vrot.lane.b32.xlu1 %v2027_v2, %s2205_s24  ;;  %v1676_v8 = vstv %s2723_s14  ;;  %v1329_v2 = vstv %s2718_s11  ;;  %v2039_v0 = vrot.slane %v1333_v46, 9 }
 0x28d   : > { %1540 = vrot.lane.b32.xlu0 %v2066_v7, %s2208_s9  ;;  %v1601_v7 = vstv %s2720_s12  ;;  %v1677_v15 = vmul.f32 %v1676_v8, %v2404_v51  ;;  %v1460_v46 = vstv %s2738_s16  ;;  %s293_s12 = scalar_lea.vmem %s3043_s7, %s2104_s8 }
 0x28e   : > { %v2711_v6 = vpop.permute.xlu2 %1692  ;;  %v2715_v14 = vpop.permute.xlu1 %1203  ;;  %v1602_v13 = vmul.f32 %v1601_v7, %v2406_v52  ;;  %v1461_v8 = vmul.f32 %v1460_v46, %v2406_v52 }
 0x28f   : > { %v2709_v32 = vpop.permute.xlu0 %1529  ;;  %v2084_v42 = vrot.slane %v1677_v15, 9 }
 0x290   : > { %v2075_v39 = vrot.slane %v1602_v13, 9  ;;  %v2057_v13 = vrot.slane %v1461_v8, 9 }
 0x294   : > { %1192 = vrot.lane.b32.xlu2 %v2021_v22, %s2206_s25  ;;  %1377 = vrot.lane.b32.xlu1 %v2045_v27, %s2208_s9  ;;  %v1417_v27 = vmul.f32 %v1416_v5, %v2406_v52 }
 0x295   : > { %1562 = vrot.lane.b32.xlu0 %v2069_v18, %s2205_s24  ;;  %v1330_v18 = vmul.f32 %v1329_v2, %v2404_v51 }
 0x296   : > { %v2730_v36 = vpop.permute.xlu2 %1714  ;;  %v2734_v44 = vpop.permute.xlu1 %1270  ;;  %v2051_v45 = vrot.slane %v1417_v27, 9  ;;  %v1720_v27 = vstv %s2089_s20 }
 0x297   : > { %v2728_v35 = vpop.permute.xlu0 %1551  ;;  %v1338_v31 = vadd.f32 %v2039_v0, %v1330_v18 }
 0x29c   : > { %1259 = vrot.lane.b32.xlu2 %v2030_v53, %s2204_s23  ;;  %1399 = vrot.lane.b32.xlu1 %v2048_v54, %s2205_s24  ;;  %v1438_v53 = vstv %s2747_s18 }
 0x29d   : > { %1584 = vrot.lane.b32.xlu0 %v2072_v50, %s2204_s23  ;;  %v1698_v50 = vstv %s2742_s17  ;;  %v1439_v0 = vmul.f32 %v1438_v53, %v2406_v52 }
 0x29e   : > { %v2752_v12 = vpop.permute.xlu2 %1736  ;;  %v1345_v22 = vpop.permute.xlu1 %1344  ;;  %v1699_v2 = vmul.f32 %v1698_v50, %v2404_v51 }
 0x29f   : > { %v2750_v63 = vpop.permute.xlu0 %1573  ;;  %v1346_v28 = vrot.slane %v1345_v22, 2  ;;  %v2054_v18 = vrot.slane %v1439_v0, 9 }
 0x2a0   : > { %v2087_v15 = vrot.slane %v1699_v2, 9  ;;  %v1764_v2 = vstv %s2095_s22 }
 0x2a1   : > { %v1347_v33 = vsel %vm688_vm5, %v1345_v22, %v1346_v28  ;;  %v1623_v22 = vstv %s2077_s19  ;;  %v1298_v28 = vstv %s2035_s21 }
 0x2a2   : > { %v2759_v43 = vadd.f32 %v1347_v33, %v1338_v31  ;;  %v1624_v33 = vmul.f32 %v1623_v22, %v2406_v52  ;;  %v1765_v22 = vmul.f32 %v1764_v2, %v2406_v52 }
 0x2a4   : > { %1681 = vrot.lane.b32.xlu2 %v2084_v42, %s2206_s25  ;;  %1421 = vrot.lane.b32.xlu1 %v2051_v45, %s2204_s23  ;;  %s2092_s25 = sld [smem:[#allocation4 + $0x53]]  ;;  %v1299_v45 = vmul.f32 %v1298_v28, %v2406_v52  ;;  %v2078_v46 = vrot.slane %v1624_v33, 9  ;;  %v2096_v28 = vrot.slane %v1765_v22, 9  ;;  %v733_v22 = vrot.slane %v2482_v16, 2 }
 0x2a5   : > { %1606 = vrot.lane.b32.xlu0 %v2075_v39, %s2209_s13  ;;  %v1721_v39 = vmul.f32 %v1720_v27, %v2406_v52 }
 0x2a6   : > { %v2769_v7 = vpop.permute.xlu2 %1758  ;;  %v2773_v5 = vpop.permute.xlu1 %1366  ;;  %v2036_v53 = vrot.slane %v1299_v45, 9 }
 0x2a7   : > { %v2767_v54 = vpop.permute.xlu0 %1595  ;;  %v2090_v50 = vrot.slane %v1721_v39, 9 }
 0x2aa   : > { %v1742_v8 = vstv %s2092_s25 }
 0x2ac   : > { %1703 = vrot.lane.b32.xlu2 %v2087_v15, %s2208_s9  ;;  %1443 = vrot.lane.b32.xlu1 %v2054_v18, %s2209_s13  ;;  %s2098_s9 = sld [smem:[#allocation4 + $0x61]]  ;;  %v1743_v15 = vmul.f32 %v1742_v8, %v2406_v52 }
 0x2ad   : > { %1465 = vrot.lane.b32.xlu0 %v2057_v13, %s2207_s6 }
 0x2ae   : > { %v2779_v31 = vpop.permute.xlu2 %1617  ;;  %v2783_v42 = vpop.permute.xlu1 %1388  ;;  %v2093_v27 = vrot.slane %v1743_v15, 9 }
 0x2af   : > { %v721_v51 = vpop.permute.xlu0 %720 }
 0x2b0   : > { %v722_v30 = vrot.slane %v721_v51, 2 }
 0x2b2   : > { %v1786_v33 = vstv %s2098_s9  ;;  %v723_v60 = vsel %vm711_vm6, %v721_v51, %v722_v30  ;;  %v757_v30 = vrot.slane %v2524_v48, 6 }
 0x2b3   : > { %v1787_v8 = vmul.f32 %v1786_v33, %v2406_v52 }
 0x2b4   : > { %1725 = vrot.lane.b32.xlu2 %v2090_v50, %s2205_s24  ;;  %1303 = vrot.lane.b32.xlu1 %v2036_v53, %s2207_s6  ;;  %v759_v62 = vsel %vm758_vm8, %v757_v30, %v2524_v48  ;;  %v782_v30 = vsel %vm781_vm9, %v780_v56, %v2583_v41  ;;  %s2211_s24 = smov 50  }
 0x2b5   : > { %1628 = vrot.lane.b32.xlu0 %v2078_v46, %s2207_s6  ;;  %v710_v46 = vrot.slane %v2556_v21, 2 }
 0x2b6   : > { %v2789_v0 = vpop.permute.xlu2 %1780  ;;  %v2794_v18 = vpop.permute.xlu1 %1410 }
 0x2b7   : > { %v2791_v13 = vpop.permute.xlu0 %790 }
 0x2bc   : > { %1747 = vrot.lane.b32.xlu2 %v2093_v27, %s2204_s23  ;;  %1769 = vrot.lane.b32.xlu1 %v2096_v28, %s2209_s13  ;;  %v712_v27 = vsel %vm711_vm6, %v2556_v21, %v710_v46  ;;  %v2099_v28 = vrot.slane %v1787_v8, 9  ;;  %v879_v46 = vrot.slane %v2609_v1, 2  ;;  %s2210_s23 = smov 51  }
 0x2be   : > { %v698_v45 = vpop.permute.xlu2 %697  ;;  %v2800_v53 = vpop.permute.xlu1 %1432 }
 0x2bf   : > { %v889_v39 = vpop.permute.xlu0 %888  ;;  %v699_v50 = vrot.slane %v698_v45, 2 }
 0x2c1   : > { %v700_v2 = vsel %vm688_vm5, %v698_v45, %v699_v50  ;;  %v735_v45 = vsel %vm734_vm7, %v2482_v16, %v733_v22 }
 0x2c2   : > { %v702_v15 = vadd.f32 %v700_v2, %v2537_v3 }
 0x2c4   : > { %v714_v55 = vadd.f32 %v712_v27, %v702_v15  ;;  %1791 = vrot.lane.b32.xlu1 %v2099_v28, %s2207_s6  ;;  %v890_v27 = vrot.slane %v889_v39, 2  ;;  %v901_v28 = vrot.slane %v2504_v34, 2  ;;  %s2212_s6 = smov 49  }
 0x2c6   : > { %v768_v52 = vpop.permute.xlu2 %767  ;;  %v725_v33 = vadd.f32 %v723_v60, %v714_v55  ;;  %v2814_v3 = vpop.permute.xlu1 %1454 }
 0x2c7   : > { %v2810_v57 = vpop.permute.xlu0 %954  ;;  %v769_v60 = vrot.slane %v768_v52, 6 }
 0x2c8   : > { %v737_v50 = vadd.f32 %v735_v45, %v725_v33  ;;  %v880_v33 = vsel %vm711_vm6, %v2609_v1, %v879_v46  ;;  %v902_v1 = vsel %vm734_vm7, %v2504_v34, %v901_v28  ;;  %v803_v46 = vrot.slane %v2490_v24, 6 }
 0x2ce   : > { %v867_v21 = vpop.permute.xlu2 %866  ;;  %v744_v15 = vpop.permute.xlu1 %743 }
 0x2cf   : > { %v2816_v2 = vpop.permute.xlu0 %1051  ;;  %v868_v8 = vrot.slane %v867_v21, 2  ;;  %v745_v51 = vrot.slane %v744_v15, 2 }
 0x2d1   : > { %v869_v55 = vsel %vm688_vm5, %v867_v21, %v868_v8  ;;  %v746_v22 = vsel %vm734_vm7, %v744_v15, %v745_v51  ;;  %v891_v21 = vsel %vm711_vm6, %v889_v39, %v890_v27  ;;  %v770_v15 = vsel %vm758_vm8, %v769_v60, %v768_v52 }
 0x2d2   : > { %v871_v16 = vadd.f32 %v869_v55, %v2562_v26  ;;  %v748_v45 = vadd.f32 %v746_v22, %v737_v50  ;;  %v792_v26 = vrot.slane %v2791_v13, 6 }
 0x2d4   : > { %v882_v61 = vadd.f32 %v880_v33, %v871_v16  ;;  %v761_v8 = vadd.f32 %v759_v62, %v748_v45  ;;  %v793_v52 = vsel %vm781_vm9, %v792_v26, %v2791_v13  ;;  %v1042_v33 = vrot.slane %v2667_v4, 2 }
 0x2d5   : > { %v923_v45 = vrot.slane %v2577_v37, 6  ;;  %v1053_v13 = vrot.slane %v2816_v2, 2 }
 0x2d6   : > { %v933_v55 = vpop.permute.xlu2 %932  ;;  %v893_v58 = vadd.f32 %v891_v21, %v882_v61  ;;  %v772_v50 = vadd.f32 %v770_v15, %v761_v8  ;;  %v814_v48 = vpop.permute.xlu1 %813  ;;  %v805_v61 = vsel %vm804_vm10, %v803_v46, %v2490_v24  ;;  %v1064_v46 = vrot.slane %v2552_v17, 2 }
 0x2d7   : > { %v2832_v51 = vpop.permute.xlu0 %1117  ;;  %v815_v27 = vrot.slane %v814_v48, 6  ;;  %v934_v15 = vrot.slane %v933_v55, 6 }
 0x2d8   : > { %v904_v39 = vadd.f32 %v902_v1, %v893_v58  ;;  %v784_v62 = vadd.f32 %v782_v30, %v772_v50  ;;  %v1043_v30 = vsel %vm711_vm6, %v2667_v4, %v1042_v33  ;;  %v1065_v33 = vsel %vm734_vm7, %v2552_v17, %v1064_v46 }
 0x2d9   : > { %v816_v34 = vsel %vm804_vm10, %v815_v27, %v814_v48  ;;  %v945_v27 = vrot.slane %v2641_v29, 6  ;;  %v1205_v17 = vrot.slane %v2715_v14, 2 }
 0x2da   : > { %v795_v60 = vadd.f32 %v793_v52, %v784_v62  ;;  %v924_v52 = vsel %vm758_vm8, %v923_v45, %v2577_v37 }
 0x2dc   : > { %v807_v16 = vadd.f32 %v805_v61, %v795_v60 }
 0x2de   : > { %v1030_v28 = vpop.permute.xlu2 %1029  ;;  %v818_v56 = vadd.f32 %v816_v34, %v807_v16  ;;  %v911_v41 = vpop.permute.xlu1 %910  ;;  %v956_v16 = vrot.slane %v2810_v57, 6  ;;  %v935_v34 = vsel %vm758_vm8, %v934_v15, %v933_v55 }
 0x2df   : > { %v2844_v22 = vpop.permute.xlu0 %1214  ;;  %v1031_v58 = vrot.slane %v1030_v28, 2  ;;  %v912_v21 = vrot.slane %v911_v41, 2 }
 0x2e0   : > { %v822_v26 = vperm.slane %v818_v56, 4  ;;  %v821_v24 = vperm.slane %v818_v56, 2  ;;  %v820_v48 = vperm.slane %v818_v56, 0 }
 0x2e1   : > { %v1032_v8 = vsel %vm688_vm5, %v1030_v28, %v1031_v58  ;;  %v913_v50 = vsel %vm734_vm7, %v911_v41, %v912_v21  ;;  %v967_v58 = vrot.slane %v2526_v49, 6  ;;  %v946_v41 = vsel %vm781_vm9, %v945_v27, %v2641_v29 }
 0x2e2   : > { %v1034_v1 = vadd.f32 %v1032_v8, %v2617_v11  ;;  %v915_v62 = vadd.f32 %v913_v50, %v904_v39  ;;  %827 = vrot.lane.b32.xlu1 %v822_v26, %s2210_s23  ;;  %825 = vrot.lane.b32.xlu2 %v821_v24, %s2210_s23  ;;  %v1054_v11 = vsel %vm711_vm6, %v2816_v2, %v1053_v13  ;;  %v1368_v50 = vrot.slane %v2773_v5, 2 }
 0x2e3   : > { %823 = vrot.lane.b32.xlu0 %v820_v48, %s2210_s23  ;;  %v957_v21 = vsel %vm781_vm9, %v956_v16, %v2810_v57  ;;  %v968_v8 = vsel %vm804_vm10, %v967_v58, %v2526_v49  ;;  %v1086_v57 = vrot.slane %v2635_v23, 6 }
 0x2e4   : > { %v1045_v60 = vadd.f32 %v1043_v30, %v1034_v1  ;;  %v926_v61 = vadd.f32 %v924_v52, %v915_v62  ;;  %v1216_v62 = vrot.slane %v2844_v22, 2  ;;  %v1369_v58 = vsel %vm711_vm6, %v2773_v5, %v1368_v50 }
 0x2e5   : > { %v1130_v50 = vrot.slane %v2579_v38, 6 }
 0x2e6   : > { %v1096_v39 = vpop.permute.xlu2 %1095  ;;  %v1056_v28 = vadd.f32 %v1054_v11, %v1045_v60  ;;  %v937_v37 = vadd.f32 %v935_v34, %v926_v61  ;;  %v977_v56 = vpop.permute.xlu1 %976 }
 0x2e7   : > { %v2862_v4 = vpop.permute.xlu0 %1281  ;;  %v978_v55 = vrot.slane %v977_v56, 6  ;;  %v1097_v52 = vrot.slane %v1096_v39, 6 }
 0x2e8   : > { %v1067_v2 = vadd.f32 %v1065_v33, %v1056_v28  ;;  %v948_v45 = vadd.f32 %v946_v41, %v937_v37  ;;  %v1228_v37 = vrot.slane %v2605_v10, 6 }
 0x2e9   : > { %v979_v24 = vsel %vm804_vm10, %v978_v55, %v977_v56  ;;  %v1206_v56 = vsel %vm711_vm6, %v2715_v14, %v1205_v17  ;;  %v1217_v55 = vsel %vm711_vm6, %v2844_v22, %v1216_v62  ;;  %v1098_v5 = vsel %vm758_vm8, %v1097_v52, %v1096_v39 }
 0x2ea   : > { %v959_v13 = vadd.f32 %v957_v21, %v948_v45  ;;  %v1531_v17 = vrot.slane %v2709_v32, 2  ;;  %v1131_v52 = vsel %vm804_vm10, %v1130_v50, %v2579_v38  ;;  %v1283_v50 = vrot.slane %v2862_v4, 6 }
 0x2ec   : > { %v970_v26 = vadd.f32 %v968_v8, %v959_v13  ;;  %v1119_v13 = vrot.slane %v2832_v51, 6 }
 0x2ee   : > { %v1193_v1 = vpop.permute.xlu2 %1192  ;;  %v981_v29 = vadd.f32 %v979_v24, %v970_v26  ;;  %v1074_v30 = vpop.permute.xlu1 %1073 }
 0x2ef   : > { %v1356_v15 = vpop.permute.xlu0 %1355  ;;  %v1194_v46 = vrot.slane %v1193_v1, 2  ;;  %v1075_v27 = vrot.slane %v1074_v30, 2 }
 0x2f0   : > { %v1357_v48 = vrot.slane %v1356_v15, 2  ;;  %v985_v11 = vperm.slane %v981_v29, 4  ;;  %v984_v61 = vperm.slane %v981_v29, 2  ;;  %v983_v33 = vperm.slane %v981_v29, 0 }
 0x2f1   : > { %v1195_v60 = vsel %vm688_vm5, %v1193_v1, %v1194_v46  ;;  %v1076_v28 = vsel %vm734_vm7, %v1074_v30, %v1075_v27  ;;  %v1120_v46 = vsel %vm781_vm9, %v1119_v13, %v2832_v51  ;;  %v1553_v51 = vrot.slane %v2728_v35, 6 }
 0x2f2   : > { %v1358_v49 = vsel %vm688_vm5, %v1356_v15, %v1357_v48  ;;  %v1197_v34 = vadd.f32 %v1195_v60, %v2673_v19  ;;  %v1078_v41 = vadd.f32 %v1076_v28, %v1067_v2  ;;  %990 = vrot.lane.b32.xlu1 %v985_v11, %s2211_s24  ;;  %988 = vrot.lane.b32.xlu2 %v984_v61, %s2211_s24  ;;  %v1108_v19 = vrot.slane %v2695_v47, 6 }
 0x2f3   : > { %v1360_v16 = vadd.f32 %v1358_v49, %v2759_v43  ;;  %v1087_v43 = vsel %vm758_vm8, %v1086_v57, %v2635_v23  ;;  %986 = vrot.lane.b32.xlu0 %v983_v33, %s2211_s24  ;;  %v1229_v23 = vsel %vm734_vm7, %v1228_v37, %v2605_v10  ;;  %v1532_v57 = vsel %vm711_vm6, %v2709_v32, %v1531_v17 }
 0x2f4   : > { %v1208_v45 = vadd.f32 %v1206_v56, %v1197_v34  ;;  %v1089_v14 = vadd.f32 %v1087_v43, %v1078_v41  ;;  %v1109_v22 = vsel %vm781_vm9, %v1108_v19, %v2695_v47  ;;  %v1694_v47 = vrot.slane %v2711_v6, 2 }
 0x2f5   : > { %v2891_v21 = vadd.f32 %v1369_v58, %v1360_v16  ;;  %v1250_v32 = vrot.slane %v2690_v40, 6  ;;  %v1554_v13 = vsel %vm734_vm7, %v1553_v51, %v2728_v35 }
 0x2f6   : > { %v1260_v8 = vpop.permute.xlu2 %1259  ;;  %v1219_v26 = vadd.f32 %v1217_v55, %v1208_v45  ;;  %v1100_v24 = vadd.f32 %v1098_v5, %v1089_v14  ;;  %v1140_v1 = vpop.permute.xlu1 %1139  ;;  %v1695_v14 = vsel %vm711_vm6, %v2711_v6, %v1694_v47  ;;  %v1575_v6 = vrot.slane %v2750_v63, 6 }
 0x2f7   : > { %v1519_v2 = vpop.permute.xlu0 %1518  ;;  %v1141_v10 = vrot.slane %v1140_v1, 6  ;;  %v1261_v33 = vrot.slane %v1260_v8, 6 }
 0x2f8   : > { %v1520_v15 = vrot.slane %v1519_v2, 2  ;;  %v1231_v29 = vadd.f32 %v1229_v23, %v1219_v26  ;;  %v1111_v39 = vadd.f32 %v1109_v22, %v1100_v24  ;;  %v1716_v24 = vrot.slane %v2730_v36, 6 }
 0x2f9   : > { %v1142_v60 = vsel %vm804_vm10, %v1141_v10, %v1140_v1 }
 0x2fa   : > { %v1521_v48 = vsel %vm688_vm5, %v1519_v2, %v1520_v15  ;;  %v1122_v62 = vadd.f32 %v1120_v46, %v1111_v39  ;;  %v1251_v2 = vsel %vm758_vm8, %v1250_v32, %v2690_v40  ;;  %v1262_v15 = vsel %vm758_vm8, %v1261_v33, %v1260_v8 }
 0x2fb   : > { %v1523_v30 = vadd.f32 %v1521_v48, %v2675_v20  ;;  %v1390_v39 = vrot.slane %v2783_v42, 6  ;;  %v1717_v47 = vsel %vm734_vm7, %v1716_v24, %v2730_v36  ;;  %v1619_v24 = vrot.slane %v2779_v31, 6 }
 0x2fc   : > { %v1133_v49 = vadd.f32 %v1131_v52, %v1122_v62 }
 0x2fd   : > { %v1534_v27 = vadd.f32 %v1532_v57, %v1523_v30  ;;  %v1294_v30 = vrot.slane %v2637_v25, 6 }
 0x2fe   : > { %v1682_v61 = vpop.permute.xlu2 %1681  ;;  %v1144_v16 = vadd.f32 %v1142_v60, %v1133_v49  ;;  %v1238_v28 = vpop.permute.xlu1 %1237  ;;  %v1576_v60 = vsel %vm758_vm8, %v1575_v6, %v2750_v63  ;;  %v1738_v63 = vrot.slane %v2752_v12, 6 }
 0x2ff   : > { %v1541_v11 = vpop.permute.xlu0 %1540  ;;  %v1683_v34 = vrot.slane %v1682_v61, 2  ;;  %v1239_v37 = vrot.slane %v1238_v28, 6 }
 0x300   : > { %v1542_v20 = vrot.slane %v1541_v11, 2  ;;  %v1148_v58 = vperm.slane %v1144_v16, 4  ;;  %v1147_v41 = vperm.slane %v1144_v16, 2  ;;  %v1146_v55 = vperm.slane %v1144_v16, 0 }
 0x301   : > { %v1684_v56 = vsel %vm688_vm5, %v1682_v61, %v1683_v34  ;;  %v1240_v45 = vsel %vm734_vm7, %v1239_v37, %v1238_v28  ;;  %v1391_v61 = vsel %vm734_vm7, %v1390_v39, %v2783_v42  ;;  %v1295_v34 = vsel %vm804_vm10, %v1294_v30, %v2637_v25 }
 0x302   : > { %v1543_v38 = vsel %vm711_vm6, %v1541_v11, %v1542_v20  ;;  %v1686_v19 = vadd.f32 %v1684_v56, %v2699_v59  ;;  %v1242_v5 = vadd.f32 %v1240_v45, %v1231_v29  ;;  %1153 = vrot.lane.b32.xlu1 %v1148_v58, %s2212_s6  ;;  %1151 = vrot.lane.b32.xlu2 %v1147_v41, %s2212_s6  ;;  %v1272_v59 = vrot.slane %v2734_v44, 6 }
 0x303   : > { %v1545_v43 = vadd.f32 %v1543_v38, %v1534_v27  ;;  %1149 = vrot.lane.b32.xlu0 %v1146_v55, %s2212_s6  ;;  %v1284_v11 = vsel %vm781_vm9, %v1283_v50, %v2862_v4  ;;  %v1597_v37 = vrot.slane %v2767_v54, 6  ;;  %v1412_v56 = vrot.slane %v2794_v18, 6 }
 0x304   : > { %v1697_v23 = vadd.f32 %v1695_v14, %v1686_v19  ;;  %v1253_v17 = vadd.f32 %v1251_v2, %v1242_v5  ;;  %v1273_v10 = vsel %vm781_vm9, %v1272_v59, %v2734_v44  ;;  %v1739_v45 = vsel %vm758_vm8, %v1738_v63, %v2752_v12 }
 0x305   : > { %v1556_v26 = vadd.f32 %v1554_v13, %v1545_v43  ;;  %v1598_v55 = vsel %vm781_vm9, %v1597_v37, %v2767_v54  ;;  %v1413_v13 = vsel %vm758_vm8, %v1412_v56, %v2794_v18  ;;  %v1434_v12 = vrot.slane %v2800_v53, 6 }
 0x306   : > { %v1704_v1 = vpop.permute.xlu2 %1703  ;;  %v1264_v22 = vadd.f32 %v1262_v15, %v1253_v17  ;;  %v1378_v40 = vpop.permute.xlu1 %1377  ;;  %v1760_v17 = vrot.slane %v2769_v7, 6 }
 0x307   : > { %v1563_v35 = vpop.permute.xlu0 %1562  ;;  %v1705_v48 = vrot.slane %v1704_v1, 2  ;;  %v1379_v46 = vrot.slane %v1378_v40, 2 }
 0x308   : > { %v1564_v29 = vrot.slane %v1563_v35, 6  ;;  %v1275_v49 = vadd.f32 %v1273_v10, %v1264_v22 }
 0x309   : > { %v1706_v8 = vsel %vm711_vm6, %v1704_v1, %v1705_v48  ;;  %v1380_v27 = vsel %vm711_vm6, %v1378_v40, %v1379_v46  ;;  %v1761_v48 = vsel %vm781_vm9, %v1760_v17, %v2769_v7  ;;  %v1620_v40 = vsel %vm804_vm10, %v1619_v24, %v2779_v31 }
 0x30a   : > { %v1565_v57 = vsel %vm734_vm7, %v1564_v29, %v1563_v35  ;;  %v1708_v52 = vadd.f32 %v1706_v8, %v1697_v23  ;;  %v1382_v44 = vadd.f32 %v1380_v27, %v2891_v21  ;;  %v1286_v20 = vadd.f32 %v1284_v11, %v1275_v49 }
 0x30b   : > { %v1567_v62 = vadd.f32 %v1565_v57, %v1556_v26  ;;  %v1435_v46 = vsel %vm781_vm9, %v1434_v12, %v2800_v53 }
 0x30c   : > { %v1719_v16 = vadd.f32 %v1717_v47, %v1708_v52  ;;  %v1393_v28 = vadd.f32 %v1391_v61, %v1382_v44  ;;  %v1297_v33 = vadd.f32 %v1295_v34, %v1286_v20 }
 0x30d   : > { %v1578_v51 = vadd.f32 %v1576_v60, %v1567_v62  ;;  %v1456_v62 = vrot.slane %v2814_v3, 6 }
 0x30e   : > { %v1726_v36 = vpop.permute.xlu2 %1725  ;;  %v1400_v21 = vpop.permute.xlu1 %1399 }
 0x30f   : > { %v1585_v32 = vpop.permute.xlu0 %1584  ;;  %v1727_v38 = vrot.slane %v1726_v36, 6  ;;  %v1401_v42 = vrot.slane %v1400_v21, 6  ;;  %v1457_v7 = vsel %vm804_vm10, %v1456_v62, %v2814_v3 }
 0x310   : > { %v1586_v4 = vrot.slane %v1585_v32, 6 }
 0x311   : > { %v1728_v41 = vsel %vm734_vm7, %v1727_v38, %v1726_v36  ;;  %v1402_v19 = vsel %vm734_vm7, %v1401_v42, %v1400_v21 }
 0x312   : > { %v1587_v58 = vsel %vm758_vm8, %v1586_v4, %v1585_v32  ;;  %v1730_v25 = vadd.f32 %v1728_v41, %v1719_v16  ;;  %v1404_v14 = vadd.f32 %v1402_v19, %v1393_v28  ;;  %v1782_v32 = vrot.slane %v2789_v0, 6 }
 0x313   : > { %v1589_v43 = vadd.f32 %v1587_v58, %v1578_v51 }
 0x314   : > { %v1741_v2 = vadd.f32 %v1739_v45, %v1730_v25  ;;  %v1415_v26 = vadd.f32 %v1413_v13, %v1404_v14  ;;  %v1783_v38 = vsel %vm804_vm10, %v1782_v32, %v2789_v0 }
 0x315   : > { %v1600_v5 = vadd.f32 %v1598_v55, %v1589_v43 }
 0x316   : > { %v1748_v59 = vpop.permute.xlu2 %1747  ;;  %v1422_v35 = vpop.permute.xlu1 %1421 }
 0x317   : > { %v1607_v23 = vpop.permute.xlu0 %1606  ;;  %v1749_v15 = vrot.slane %v1748_v59, 6  ;;  %v1423_v1 = vrot.slane %v1422_v35, 6 }
 0x318   : > { %v1608_v6 = vrot.slane %v1607_v23, 6 }
 0x319   : > { %v1750_v50 = vsel %vm758_vm8, %v1749_v15, %v1748_v59  ;;  %v1424_v29 = vsel %vm758_vm8, %v1423_v1, %v1422_v35  ;;  %v3059_v1 = vlaneseq  ;;  %vm1807_vm8 = vcmask 367616  }
 0x31a   : > { %v1609_v54 = vsel %vm781_vm9, %v1608_v6, %v1607_v23  ;;  %v1752_v22 = vadd.f32 %v1750_v50, %v1741_v2  ;;  %v1426_v39 = vadd.f32 %v1424_v29, %v1415_v26 }
 0x31b   : > { %v1611_v18 = vadd.f32 %v1609_v54, %v1600_v5  ;;  %v585_v54 = vand.u32 127, %v3059_v1 }
 0x31c   : > { %v1763_v10 = vadd.f32 %v1761_v48, %v1752_v22  ;;  %v1437_v57 = vadd.f32 %v1435_v46, %v1426_v39 }
 0x31d   : > { %v1622_v30 = vadd.f32 %v1620_v40, %v1611_v18  ;;  %v586_v22 = vadd.s32 128, %v585_v54 }
 0x31e   : > { %v1444_v8 = vpop.permute.xlu1 %1443 }
 0x31f   : > { %v1445_v52 = vrot.slane %v1444_v8, 6  ;;  %v1466_v47 = vpop.permute.xlu0 %1465  ;;  %v598_v48 = vand.u32 15, %v586_v22 }
 0x320   : > { %v1467_v61 = vrot.slane %v1466_v47, 6 }
 0x321   : > { %v1446_v27 = vsel %vm781_vm9, %v1445_v52, %v1444_v8  ;;  %v612_v46 = vadd.s32 4294967293, %v598_v48  ;;  %v628_v62 = vadd.s32 4294967295, %v598_v48 }
 0x322   : > { %v1448_v49 = vadd.f32 %v1446_v27, %v1437_v57  ;;  %v1468_v3 = vsel %vm804_vm10, %v1467_v61, %v1466_v47 }
 0x323   : > { %vm614_vm13 = vcmp.ge.s32.totalorder %v612_v46, 0  ;;  %vm630_vm0 = vcmp.ge.s32.totalorder %v628_v62, 0 }
 0x324   : > { %v1459_v60 = vadd.f32 %v1457_v7, %v1448_v49  ;;  %v666_v7 = vstv %s2992_s30 }
 0x326   : > { %v1304_v31 = vpop.permute.xlu1 %1303  ;;  %v1470_v63 = vadd.f32 %v1468_v3, %v1459_v60 }
 0x327   : > { %v1305_v11 = vrot.slane %v1304_v31, 6  ;;  %v1629_v34 = vpop.permute.xlu0 %1628 }
 0x328   : > { %v1630_v37 = vrot.slane %v1629_v34, 6  ;;  %v1474_v56 = vperm.slane %v1470_v63, 4  ;;  %v1473_v42 = vperm.slane %v1470_v63, 2  ;;  %v1472_v41 = vperm.slane %v1470_v63, 0 }
 0x329   : > { %v1306_v44 = vsel %vm804_vm10, %v1305_v11, %v1304_v31  ;;  %v642_v31 = vadd.s32 1, %v598_v48 }
 0x32a   : > { %v1308_v53 = vadd.f32 %v1306_v44, %v1297_v33  ;;  %v1631_v58 = vsel %vm804_vm10, %v1630_v37, %v1629_v34 }
 0x32b   : > { %v1633_v25 = vadd.f32 %v1631_v58, %v1622_v30  ;;  %v2994_v30 = vand.u32 15, %v585_v54  ;;  %vm646_vm4 = vcmp.lt.s32.totalorder %v642_v31, 16 }
 0x32c   : > { %v1312_v51 = vperm.slane %v1308_v53, 4  ;;  %v1311_v16 = vperm.slane %v1308_v53, 2  ;;  %v1310_v20 = vperm.slane %v1308_v53, 0 }
 0x32d   : > { %v1637_v45 = vperm.slane %v1633_v25, 4  ;;  %v1636_v55 = vperm.slane %v1633_v25, 2  ;;  %v1635_v13 = vperm.slane %v1633_v25, 0  ;;  %v611_v52 = vadd.s32 4294967293, %v2994_v30 }
 0x32e   : > { %v1770_v28 = vpop.permute.xlu1 %1769  ;;  %1317 = vrot.lane.b32.xlu1 %v1312_v51, %s2209_s13  ;;  %1315 = vrot.lane.b32.xlu2 %v1311_v16, %s2209_s13  ;;  %v619_v44 = vadd.s32 4294967294, %v2994_v30  ;;  %v650_v16 = vadd.s32 2, %v598_v48  ;;  %v627_v34 = vadd.s32 4294967295, %v2994_v30  ;;  %v657_v22 = vadd.s32 3, %v2994_v30 }
 0x32f   : > { %v1771_v36 = vrot.slane %v1770_v28, 6  ;;  %1313 = vrot.lane.b32.xlu0 %v1310_v20, %s2209_s13  ;;  %s2214_s13 = smov 46   ;;  %vm613_vm2 = vcmp.ge.s32.totalorder %v611_v52, 0 }
 0x330   : > { %vm621_vm5 = vcmp.ge.s32.totalorder %v619_v44, 0  ;;  %vm654_vm6 = vcmp.lt.s32.totalorder %v650_v16, 16  ;;  %vm629_vm7 = vcmp.ge.s32.totalorder %v627_v34, 0 }
 0x331   : > { %v1772_v33 = vsel %vm781_vm9, %v1771_v36, %v1770_v28 }
 0x332   : > { %v1774_v4 = vadd.f32 %v1772_v33, %v1763_v10  ;;  %v620_v10 = vadd.s32 4294967294, %v598_v48 }
 0x334   : > { %v1785_v21 = vadd.f32 %v1783_v38, %v1774_v4  ;;  %vm622_vm15 = vcmp.ge.s32.totalorder %v620_v10, 0  ;;  %v658_v38 = vadd.s32 3, %v598_v48 }
 0x336   : > { %v1792_v43 = vpop.permute.xlu1 %1791  ;;  %1479 = vrot.lane.b32.xlu1 %v1474_v56, %s2213_s28  ;;  %1477 = vrot.lane.b32.xlu2 %v1473_v42, %s2213_s28  ;;  %v641_v42 = vadd.s32 1, %v2994_v30 }
 0x337   : > { %1475 = vrot.lane.b32.xlu0 %v1472_v41, %s2213_s28  ;;  %v1793_v19 = vrot.slane %v1792_v43, 6 }
 0x339   : > { %v1794_v14 = vsel %vm804_vm10, %v1793_v19, %v1792_v43  ;;  %vm662_vm10 = vcmp.lt.s32.totalorder %v658_v38, 16 }
 0x33a   : > { %v1796_v0 = vadd.f32 %v1794_v14, %v1785_v21 }
 0x33c   : > { %v1800_v5 = vperm.slane %v1796_v0, 4  ;;  %v1799_v2 = vperm.slane %v1796_v0, 2  ;;  %v1798_v26 = vperm.slane %v1796_v0, 0  ;;  %v826_v23 = vpop.permute.xlu2 %825 }
 0x33e   : > { %1642 = vrot.lane.b32.xlu1 %v1637_v45, %s2214_s13  ;;  %1640 = vrot.lane.b32.xlu2 %v1636_v55, %s2214_s13  ;;  %v649_v45 = vadd.s32 2, %v2994_v30 }
 0x33f   : > { %1638 = vrot.lane.b32.xlu0 %v1635_v13, %s2214_s13 }
 0x346   : > { %1805 = vrot.lane.b32.xlu1 %v1800_v5, %s2215_s29  ;;  %1803 = vrot.lane.b32.xlu2 %v1799_v2, %s2215_s29 }
 0x347   : > { %1801 = vrot.lane.b32.xlu0 %v1798_v26, %s2215_s29 }
 0x34c   : > { %v989_v24 = vpop.permute.xlu2 %988 }
 0x354   : > { %v828_v59 = vpop.permute.xlu1 %827 }
 0x355   : > { %v824_v17 = vpop.permute.xlu0 %823  ;;  %v831_v8 = vsel %vm829_vm11, %v826_v23, %v828_v59 }
 0x356   : > { %v835_v47 = vsel %vm614_vm13, %v831_v8, 0.0  ;;  %v830_v51 = vsel %vm829_vm11, %v824_v17, %v826_v23  ;;  %vm645_vm11 = vcmp.lt.s32.totalorder %v641_v42, 16 }
 0x357   : > { %v837_v61 = vadd.f32 %v835_v47, %v666_v7  ;;  %v834_v36 = vsel %vm613_vm2, %v830_v51, 0.0 }
 0x358   : > { %v836_v25 = vadd.f32 %v834_v36, %v666_v7 }
 0x35c   : > { %v1152_v35 = vpop.permute.xlu2 %1151 }
 0x364   : > { %v991_v6 = vpop.permute.xlu1 %990 }
 0x365   : > { %v987_v15 = vpop.permute.xlu0 %986  ;;  %v994_v27 = vsel %vm992_vm12, %v989_v24, %v991_v6 }
 0x366   : > { %v998_v11 = vsel %vm622_vm15, %v994_v27, 0.0  ;;  %v993_v63 = vsel %vm992_vm12, %v987_v15, %v989_v24  ;;  %vm653_vm12 = vcmp.lt.s32.totalorder %v649_v45, 16 }
 0x367   : > { %v1000_v32 = vadd.f32 %v998_v11, %v837_v61  ;;  %v997_v58 = vsel %vm621_vm5, %v993_v63, 0.0  ;;  %v3061_v63 = vld [vmem:[#allocation12_spill] sm:$0xff] }
 0x368   : > { %v999_v13 = vadd.f32 %v997_v58, %v836_v25 }
 0x374   : > { %v1154_v12 = vpop.permute.xlu1 %1153 }
 0x375   : > { %v1150_v50 = vpop.permute.xlu0 %1149  ;;  %v1157_v60 = vsel %vm1155_vm14, %v1152_v35, %v1154_v12 }
 0x376   : > { %v1161_v20 = vsel %vm630_vm0, %v1157_v60, 0.0  ;;  %v1156_v21 = vsel %vm1155_vm14, %v1150_v50, %v1152_v35 }
 0x377   : > { %v1163_v33 = vadd.f32 %v1161_v20, %v1000_v32  ;;  %v1160_v55 = vsel %vm629_vm7, %v1156_v21, 0.0 }
 0x378   : > { %v1162_v17 = vadd.f32 %v1160_v55, %v999_v13  ;;  %v3066_v55 = vld [vmem:[#allocation7_spill] sm:$0xff] }
 0x388   : > { %v2988_v18 = vpop.permute.xlu2 %1315 }
 0x390   : > { %v1478_v39 = vpop.permute.xlu2 %1477 }
 0x398   : > { %v1641_v53 = vpop.permute.xlu2 %1640 }
 0x3a0   : > { %v1318_v29 = vpop.permute.xlu1 %1317  ;;  %v1804_v0 = vpop.permute.xlu2 %1803 }
 0x3a1   : > { %v2990_v40 = vpop.permute.xlu0 %1313  ;;  %v1320_v37 = vsel %vm781_vm9, %v2988_v18, %v1318_v29 }
 0x3a2   : > { %v1326_v41 = vadd.f32 %v1320_v37, %v1163_v33  ;;  %v1319_v26 = vsel %vm781_vm9, %v2990_v40, %v2988_v18  ;;  %vm661_vm9 = vcmp.lt.s32.totalorder %v657_v22, 16  ;;  %v3062_v33 = vld [vmem:[#allocation8_spill] sm:$0xff] }
 0x3a3   : > { %v1325_v12 = vadd.f32 %v1319_v26, %v1162_v17 }
 0x3a8   : > { %v1480_v57 = vpop.permute.xlu1 %1479 }
 0x3a9   : > { %v1476_v49 = vpop.permute.xlu0 %1475  ;;  %v1483_v3 = vsel %vm1481_vm1, %v1478_v39, %v1480_v57 }
 0x3aa   : > { %v1487_v56 = vsel %vm646_vm4, %v1483_v3, 0.0  ;;  %v1482_v5 = vsel %vm1481_vm1, %v1476_v49, %v1478_v39  ;;  %v3060_v3 = vld [vmem:[#allocation10_spill] sm:$0xff] }
 0x3ab   : > { %v1489_v14 = vadd.f32 %v1487_v56, %v1326_v41  ;;  %v1486_v15 = vsel %vm645_vm11, %v1482_v5, 0.0  ;;  %v3063_v41 = vld [vmem:[#allocation13_spill] sm:$0xff] }
 0x3ac   : > { %v1488_v50 = vadd.f32 %v1486_v15, %v1325_v12 }
 0x3b0   : > { %v1643_v28 = vpop.permute.xlu1 %1642 }
 0x3b1   : > { %v1646_v4 = vsel %vm1644_vm3, %v1641_v53, %v1643_v28  ;;  %v1639_v43 = vpop.permute.xlu0 %1638 }
 0x3b2   : > { %v1650_v19 = vsel %vm654_vm6, %v1646_v4, 0.0  ;;  %v1645_v24 = vsel %vm1644_vm3, %v1639_v43, %v1641_v53  ;;  %v3064_v43 = vld [vmem:[#allocation9_spill] sm:$0xff] }
 0x3b3   : > { %v1652_v23 = vadd.f32 %v1650_v19, %v1489_v14  ;;  %v1649_v1 = vsel %vm653_vm12, %v1645_v24, 0.0  ;;  %v3065_v19 = vld [vmem:[#allocation11_spill] sm:$0xff] }
 0x3b4   : > { %v1651_v48 = vadd.f32 %v1649_v1, %v1488_v50 }
 0x3b8   : > { %v1806_v2 = vpop.permute.xlu1 %1805 }
 0x3b9   : > { %v1809_v59 = vsel %vm1807_vm8, %v1804_v0, %v1806_v2  ;;  %v1802_v29 = vpop.permute.xlu0 %1801 }
 0x3ba   : > { %v1813_v6 = vsel %vm662_vm10, %v1809_v59, 0.0  ;;  %v1808_v18 = vsel %vm1807_vm8, %v1802_v29, %v1804_v0 }
 0x3bb   : > { %v1815_v35 = vadd.f32 %v1813_v6, %v1652_v23  ;;  %v1812_v40 = vsel %vm661_vm9, %v1808_v18, 0.0 }
 0x3bc   : > { %v1814_v39 = vadd.f32 %v1812_v40, %v1651_v48 }
 0x3bd   : > { %v2101_v54 = vmul.f32 -1.442695, %v1815_v35 }
 0x3be   : > { %v2100_v46 = vmul.f32 -1.442695, %v1814_v39 }
 0x3bf   : > { %2164 = vpow2.f32 %v2101_v54 }
 0x3c0   : > { %2166 = vpow2.f32 %v2100_v46 }
 0x3c5   : > { %v2165_v10 = vpop.eup %2164 }
 0x3c6   : > { %v1823_v57 = vadd.f32 1.0, %v2165_v10  ;;  %v2167_v8 = vpop.eup %2166 }
 0x3c7   : > { %v1822_v62 = vadd.f32 1.0, %v2167_v8 }
 0x3c8   : > { %2168 = vrcp.f32 %v1823_v57  ;;  %v1850_v30 = vand.u32 2147483648, %v1823_v57  ;;  %v1848_v47 = vand.u32 2147483647, %v1823_v57  ;;  %vm1844_vm14 = vweird.f32 %v1823_v57 }
 0x3c9   : > { %2170 = vrcp.f32 %v1822_v62  ;;  %v1835_v20 = vand.u32 2147483648, %v1822_v62  ;;  %v1833_v28 = vand.u32 2147483647, %v1822_v62  ;;  %vm1829_vm2 = vweird.f32 %v1822_v62 }
 0x3ca   : > { %v1851_v11 = vor.u32 1.1754944e-38, %v1850_v30  ;;  %vm1849_vm0 = vcmp.eq.f32.partialorder %v1848_v47, 8.507059e+37 }
 0x3cb   : > { %v1836_v21 = vor.u32 1.1754944e-38, %v1835_v20  ;;  %vm1834_vm4 = vcmp.eq.f32.partialorder %v1833_v28, 8.507059e+37 }
 0x3ce   : > { %v2169_v52 = vpop.eup %2168 }
 0x3cf   : > { %v1840_v27 = vmul.f32 %v2169_v52, %v1823_v57  ;;  %vm1845_vm13 = vweird.f32 %v2169_v52  ;;  %v2171_v60 = vpop.eup %2170 }
 0x3d0   : > { %vm1846_vm15 = vmor %vm1844_vm14, %vm1845_vm13  ;;  %v1825_v44 = vmul.f32 %v2171_v60, %v1822_v62  ;;  %vm1830_vm1 = vweird.f32 %v2171_v60 }
 0x3d1   : > { %v1841_v49 = vsub.f32 1.0, %v1840_v27  ;;  %vm1831_vm3 = vmor %vm1829_vm2, %vm1830_vm1 }
 0x3d2   : > { %v1826_v51 = vsub.f32 1.0, %v1825_v44 }
 0x3d3   : > { %v1842_v7 = vmul.f32 %v2169_v52, %v1841_v49 }
 0x3d4   : > { %v1827_v34 = vmul.f32 %v2171_v60, %v1826_v51 }
 0x3d5   : > { %v1843_v31 = vadd.f32 %v2169_v52, %v1842_v7 }
 0x3d6   : > { %v1828_v38 = vadd.f32 %v2171_v60, %v1827_v34 }
 0x3d7   : > { %v1847_v53 = vsel %vm1846_vm15, %v2169_v52, %v1843_v31 }
 0x3d8   : > { %v1852_v61 = vsel %vm1849_vm0, %v1851_v11, %v1847_v53  ;;  %v1832_v56 = vsel %vm1831_vm3, %v2171_v60, %v1828_v38 }
 0x3d9   : > { %v1855_v16 = vperm.slane %v1852_v61, 0  ;;  %v1837_v42 = vsel %vm1834_vm4, %v1836_v21, %v1832_v56 }
 0x3da   : > { %v1854_v58 = vperm.slane %v1837_v42, 0 }
 0x3db   : > { %v1857_v32 = vmul.f32 %v1855_v16, %v2385_v9  ;;  %v1859_v36 = vmul.f32 %v1855_v16, %v3060_v3  ;;  %v1861_v37 = vmul.f32 %v1855_v16, %v3061_v63  ;;  %v1863_v4 = vmul.f32 %v1855_v16, %v3062_v33 }
 0x3dc   : > { %v1856_v9 = vmul.f32 %v1854_v58, %v3063_v41  ;;  %v1858_v25 = vmul.f32 %v1854_v58, %v3064_v43  ;;  %v1860_v45 = vmul.f32 %v1854_v58, %v3065_v19  ;;  %v1862_v14 = vmul.f32 %v1854_v58, %v3066_v55 }
 0x3dd   : > { %1865 = vst [vmem:[%s293_s12 + $0x8] sm:$0xff] %v1857_v32 }
 0x3de   : > { %1867 = vst [vmem:[%s293_s12 + $0x18] sm:$0xff] %v1859_v36 }
 0x3df   : > { %1869 = vst [vmem:[%s293_s12 + $0x28] sm:$0xff] %v1861_v37 }
 0x3e0   : > { %1871 = vst [vmem:[%s293_s12 + $0x38] sm:$0xff] %v1863_v4 }
 0x3e1   : > { %1864 = vst [vmem:[%s293_s12] sm:$0xff] %v1856_v9 }
 0x3e2   : > { %1866 = vst [vmem:[%s293_s12 + $0x10] sm:$0xff] %v1858_v25 }
 0x3e3   : > { %1868 = vst [vmem:[%s293_s12 + $0x20] sm:$0xff] %v1860_v45 }
 0x3e4   : > { %1870 = vst [vmem:[%s293_s12 + $0x30] sm:$0xff] %v1862_v14 }
 0x3e5 PF: > { %s19_s26 = sadd.s32 1, %s2197_s26  }
 0x3e6   : > { %p16_p7 = scmp.ge.s32.totalorder %s19_s26, 4  }
 0x3e8   :  { %18 = sbr.rel (!%p16_p7) target bundleno = 3 (0x3), region = 85 }
 0x3ed   :  { %1893 = vsyncpa [#allocation5], 1 }
 0x3ee   :  { %1895 = vsyncpa [#allocation5 + $0x1], 1 }

</bundles_post_ra>
